<compile_context>
chip_gen: v5e
topology: v5e:2x2
jax: 0.10.0
libtpu: 0.0.40
codegen_flags: <defaults>
</compile_context>

<pallas_src>
import math

import jax
import jax.numpy as jnp
from jax.experimental import pallas as pl
from jax.experimental.pallas import tpu as pltpu

D_IN = 50 * 448   # 22400
D_HID = 512
BN_EPS = 1e-5


# ----------------------------------------------------------------------------
# Kernel 1: streaming h_raw = x_flat @ W1  (memory-bound on W1)
# ----------------------------------------------------------------------------
def _w1_matmul_kernel(x_ref, w1_ref, out_ref):
    k = pl.program_id(1)

    @pl.when(k == 0)
    def _():
        out_ref[...] = jnp.zeros_like(out_ref)

    # Output block is resident across the K ("arbitrary") axis -> accumulate
    # directly into it; f32 accumulation even for bf16 inputs.
    out_ref[...] += jnp.dot(x_ref[...], w1_ref[...],
                            preferred_element_type=jnp.float32)


def projector_matmul(x_flat, w1, *, tk=4480, tn=256):
    """h_raw = x_flat @ w1, tiled (tk along K, tn along output columns).

    tk must be a multiple of 128 dividing 22400 (e.g. 3200 or 4480); tn a
    multiple of 128 dividing 512.  With tn=256 the double-buffered W1 blocks
    are ~4.6 MiB (bf16) / ~9.2 MiB (f32), comfortably inside every
    generation's scoped-VMEM budget.
    """
    b, k_in = x_flat.shape
    n = w1.shape[1]
    assert k_in % tk == 0, (k_in, tk)
    assert n % tn == 0, (n, tn)
    grid = (n // tn, k_in // tk)   # (column split, K reduction)
    return pl.pallas_call(
        _w1_matmul_kernel,
        out_shape=jax.ShapeDtypeStruct((b, n), jnp.float32),
        grid_spec=pltpu.PrefetchScalarGridSpec(
            num_scalar_prefetch=0,
            grid=grid,
            in_specs=[
                pl.BlockSpec((b, tk), lambda j, k: (0, k)),    # x block
                pl.BlockSpec((tk, tn), lambda j, k: (k, j)),   # W1 block
            ],
            out_specs=pl.BlockSpec((b, tn), lambda j, k: (0, j)),
        ),
        compiler_params=pltpu.CompilerParams(
            # Column axis "parallel" -> sharded across TensorCores on v7x;
            # K axis is the reduction -> "arbitrary".
            dimension_semantics=("parallel", "arbitrary"),
            # Explicit scoped-VMEM limit: raises the v5e default (16 MiB) and
            # matches the v6e/v7x default, so the big tiles fit everywhere.
            vmem_limit_bytes=32 * 1024 * 1024,
        ),
    )(x_flat, w1)


# ----------------------------------------------------------------------------
# Kernel 2: fused projector epilogue + self-attention + (degenerate) cross-attn
# ----------------------------------------------------------------------------
def _tail_kernel(h_ref, b1_ref, g_ref, beta_ref, w2_ref, b2_ref,
                 wqkv_ref, bqkv_ref, wo_ref, bo_ref, out_ref):
    # --- projector epilogue: bias -> BatchNorm1d (training batch stats) -> ReLU -> Linear2
    h = h_ref[...] + b1_ref[...]
    mean = jnp.mean(h, axis=0, keepdims=True)
    var = jnp.mean((h - mean) ** 2, axis=0, keepdims=True)      # biased, as torch
    hn = (h - mean) * jax.lax.rsqrt(var + BN_EPS) * g_ref[...] + beta_ref[...]
    hr = jnp.maximum(hn, 0.0)
    x = (jnp.dot(hr, w2_ref[...], preferred_element_type=jnp.float32)
         + b2_ref[...])                                         # (b, D)

    # --- 1-head nn.MultiheadAttention on (L=b, N=1, E=512): fused QKV matmul
    qkv = (jnp.dot(x, wqkv_ref[...], preferred_element_type=jnp.float32)
           + bqkv_ref[...])                                     # (b, 3D)
    q = qkv[:, :D_HID]
    k = qkv[:, D_HID:2 * D_HID]
    v = qkv[:, 2 * D_HID:]
    scale = 1.0 / math.sqrt(D_HID)                              # 1 head -> head_dim = 512
    scores = jax.lax.dot_general(q, k, (((1,), (1,)), ((), ())),
                                 preferred_element_type=jnp.float32) * scale
    m = jnp.max(scores, axis=-1, keepdims=True)
    e = jnp.exp(scores - m)
    # EUP approximate reciprocal for the softmax denominator (free slot).
    attn = e * pl.reciprocal(jnp.sum(e, axis=-1, keepdims=True), approx=True)
    o = jnp.dot(attn, v, preferred_element_type=jnp.float32)
    selfa = (jnp.dot(o, wo_ref[...], preferred_element_type=jnp.float32)
             + bo_ref[...])                                     # (b, D)

    # --- cross attention: softmax over a singleton key axis == 1, so
    # crossa[i, j, :] = x[i, :].  Combined output is a broadcast-add over t.
    combined = x + selfa                                        # (b, D)
    out_ref[...] = jnp.broadcast_to(combined[:, None, :], out_ref.shape)


def fused_tail(h_raw, t, p):
    b = h_raw.shape[0]
    return pl.pallas_call(
        _tail_kernel,
        out_shape=jax.ShapeDtypeStruct((b, t, D_HID), jnp.float32),
    )(h_raw, p["b1"], p["gamma"], p["beta"], p["w2"], p["b2"],
      p["wqkv"], p["bqkv"], p["wo"], p["bo"])


# ----------------------------------------------------------------------------
# Full forward
# ----------------------------------------------------------------------------
def img_net_forward(img, text, p, *, compute_dtype=jnp.bfloat16):
    """compute_dtype controls the streaming dtype of x/W1 for the big matmul.

    bf16 (default) halves HBM traffic on the dominant, bandwidth-bound W1
    read; in production W1 would be stored pre-cast so this astype is free.
    Pass jnp.float32 for exact module semantics.
    """
    b = img.shape[0]
    t = text.shape[0]
    x_flat = img.reshape(b, D_IN).astype(compute_dtype)   # img.view(-1, 50*448)
    w1 = p["w1"].astype(compute_dtype)
    h_raw = projector_matmul(x_flat, w1)                  # (b, 512) f32
    # NOTE: `text` only sets the output's middle dimension; the module's
    # cross-attention softmax is over a singleton axis so the result is
    # independent of the `text` values (verified against the full reference).
    return fused_tail(h_raw, t, p)                        # (b, t, 512)


# ----------------------------------------------------------------------------
# Pure-JAX reference (keeps the full, un-simplified cross-attention math).
# ----------------------------------------------------------------------------
def reference(img, text, p, compute_dtype=jnp.float32):
    hp = jax.lax.Precision.HIGHEST
    b = img.shape[0]
    x = img.reshape(b, D_IN).astype(compute_dtype).astype(jnp.float32)
    w1 = p["w1"].astype(compute_dtype).astype(jnp.float32)
    h = jnp.dot(x, w1, precision=hp) + p["b1"]
    mean = jnp.mean(h, axis=0, keepdims=True)
    var = jnp.mean((h - mean) ** 2, axis=0, keepdims=True)
    hn = (h - mean) / jnp.sqrt(var + BN_EPS) * p["gamma"] + p["beta"]
    x = jnp.dot(jnp.maximum(hn, 0.0), p["w2"], precision=hp) + p["b2"]
    # cross attention (full math, softmax over the size-1 trailing axis)
    scores = jnp.einsum("bd,td->bt", x, text, precision=hp) / math.sqrt(D_HID)
    attn = jax.nn.softmax(scores[..., None], axis=-1)      # (b, t, 1)
    crossa = attn * x[:, None, :]                          # (b, t, D)
    # self attention (1 head)
    qkv = jnp.dot(x, p["wqkv"], precision=hp) + p["bqkv"]
    q, k, v = qkv[:, :D_HID], qkv[:, D_HID:2 * D_HID], qkv[:, 2 * D_HID:]
    sc = jnp.dot(q, k.T, precision=hp) / math.sqrt(D_HID)
    a = jax.nn.softmax(sc, axis=-1)
    o = jnp.dot(a, v, precision=hp)
    selfa = jnp.dot(o, p["wo"], precision=hp) + p["bo"]
    return selfa[:, None, :] + crossa


if __name__ == "__main__":
    key = jax.random.PRNGKey(0)
    ks = jax.random.split(key, 12)
    b, t = 2, 8

    img = jax.random.normal(ks[0], (b, 50, 448), jnp.float32)
    text = jax.random.normal(ks[1], (t, D_HID), jnp.float32)

    params = {
        # projector
        "w1": jax.random.normal(ks[2], (D_IN, D_HID), jnp.float32) * 0.02,
        "b1": jax.random.normal(ks[3], (1, D_HID), jnp.float32) * 0.02,
        "gamma": 1.0 + 0.1 * jax.random.normal(ks[4], (1, D_HID), jnp.float32),
        "beta": 0.1 * jax.random.normal(ks[5], (1, D_HID), jnp.float32),
        "w2": jax.random.normal(ks[6], (D_HID, D_HID), jnp.float32) * 0.05,
        "b2": jax.random.normal(ks[7], (1, D_HID), jnp.float32) * 0.02,
        # self attention: fused in-proj (like nn.MultiheadAttention's
        # in_proj_weight), stored pre-transposed so y = x @ W + b.
        "wqkv": jax.random.normal(ks[8], (D_HID, 3 * D_HID), jnp.float32) * 0.05,
        "bqkv": jax.random.normal(ks[9], (1, 3 * D_HID), jnp.float32) * 0.02,
        "wo": jax.random.normal(ks[10], (D_HID, D_HID), jnp.float32) * 0.05,
        "bo": jax.random.normal(ks[11], (1, D_HID), jnp.float32) * 0.02,
    }

    # --- exact-semantics path (f32 W1) vs f32 reference -----------------------
    out32 = jax.block_until_ready(
        img_net_forward(img, text, params, compute_dtype=jnp.float32))
    assert out32.shape == (b, t, D_HID), out32.shape
    ref32 = reference(img, text, params, compute_dtype=jnp.float32)
    err32 = float(jnp.max(jnp.abs(out32 - ref32)))
    # Tolerance covers MXU accumulation-order differences plus the EUP
    # approximate-reciprocal in the softmax (bounded well below 1e-2 here);
    # structural errors would show up at O(0.1).
    assert err32 < 1e-2, f"f32 path: max abs error {err32}"

    # --- perf-default path (bf16-streamed W1/x) vs matched-precision reference.
    # BatchNorm over a batch of 2 can amplify genuine bf16 quantization of W1
    # (sign flips in the normalized features), so the quantized path is checked
    # against a reference that applies the identical quantization: this
    # validates the kernel implementation; the quantization itself is a
    # deliberate bandwidth optimization.
    out16 = jax.block_until_ready(
        img_net_forward(img, text, params, compute_dtype=jnp.bfloat16))
    ref16 = reference(img, text, params, compute_dtype=jnp.bfloat16)
    err16 = float(jnp.max(jnp.abs(out16 - ref16)))
    assert err16 < 1e-2, f"bf16 path: max abs error {err16}"

    print("KERNEL_OK")
</pallas_src>

<mosaic_0001>
module attributes {stable_mosaic.version = 11 : i64} {
  func.func @_w1_matmul_kernel(%arg0: i32, %arg1: i32, %arg2: memref<2x4480xf32, #tpu.memory_space<vmem>>, %arg3: memref<4480x256xf32, #tpu.memory_space<vmem>>, %arg4: memref<2x256xf32, #tpu.memory_space<vmem>>) attributes {dimension_semantics = [#tpu.dimension_semantics<parallel>, #tpu.dimension_semantics<arbitrary>], iteration_bounds = array<i64: 2, 5>, scalar_prefetch = 0 : i64, scratch_operands = 0 : i64, tpu.core_type = #tpu.core_type<tc>, window_params = [{transform_indices = @transform_0, window_bounds = array<i64: 2, 4480>}, {transform_indices = @transform_1, window_bounds = array<i64: 4480, 256>}, {transform_indices = @transform_2, window_bounds = array<i64: 2, 256>}]} {
    %c0_i32 = arith.constant 0 : i32
    %0 = arith.cmpi eq, %arg1, %c0_i32 : i32
    %1 = arith.extui %0 : i1 to i32
    %c0_i32_0 = arith.constant 0 : i32
    %2 = arith.cmpi ne, %1, %c0_i32_0 : i32
    scf.if %2 {
      %cst_8 = arith.constant 0.000000e+00 : f32
      %9 = vector.broadcast %cst_8 : f32 to vector<2x256xf32>
      %c0_9 = arith.constant 0 : index
      %c0_10 = arith.constant 0 : index
      %10 = vector.load %arg4[%c0_9, %c0_10] : memref<2x256xf32, #tpu.memory_space<vmem>>, vector<2x256xf32>
      tpu.vector_store %arg4[%c0_9, %c0_10], %9 {strides = array<i32>} : memref<2x256xf32, #tpu.memory_space<vmem>>, vector<2x256xf32>,
    } else {
    }
    %c0 = arith.constant 0 : index
    %c0_1 = arith.constant 0 : index
    %3 = vector.load %arg4[%c0, %c0_1] : memref<2x256xf32, #tpu.memory_space<vmem>>, vector<2x256xf32>
    %c0_2 = arith.constant 0 : index
    %c0_3 = arith.constant 0 : index
    %4 = vector.load %arg2[%c0_2, %c0_3] : memref<2x4480xf32, #tpu.memory_space<vmem>>, vector<2x4480xf32>
    %c0_4 = arith.constant 0 : index
    %c0_5 = arith.constant 0 : index
    %5 = vector.load %arg3[%c0_4, %c0_5] : memref<4480x256xf32, #tpu.memory_space<vmem>>, vector<4480x256xf32>
    %cst = arith.constant dense<0.000000e+00> : vector<2x256xf32>
    %6 = tpu.matmul %4, %5, %cst {dimension_numbers = #tpu.dot_dimension_numbers<[1], [0], [0], [1], [0, 0, 1, 1], [], []>} : vector<2x4480xf32>, vector<4480x256xf32>, vector<2x256xf32> -> vector<2x256xf32>
    %7 = arith.addf %3, %6 : vector<2x256xf32>
    %c0_6 = arith.constant 0 : index
    %c0_7 = arith.constant 0 : index
    %8 = vector.load %arg4[%c0_6, %c0_7] : memref<2x256xf32, #tpu.memory_space<vmem>>, vector<2x256xf32>
    tpu.vector_store %arg4[%c0_6, %c0_7], %7 {strides = array<i32>} : memref<2x256xf32, #tpu.memory_space<vmem>>, vector<2x256xf32>,
    return
  }
  func.func @transform_0(%arg0: i32, %arg1: i32) -> (i32, i32) {
    %c0_i32 = arith.constant 0 : i32
    %c0_i32_0 = arith.constant 0 : i32
    return %c0_i32, %arg1 : i32, i32
  }
  func.func @transform_1(%arg0: i32, %arg1: i32) -> (i32, i32) {
    %c0_i32 = arith.constant 0 : i32
    return %arg1, %arg0 : i32, i32
  }
  func.func @transform_2(%arg0: i32, %arg1: i32) -> (i32, i32) {
    %c0_i32 = arith.constant 0 : i32
    %c0_i32_0 = arith.constant 0 : i32
    return %c0_i32, %arg0 : i32, i32
  }
}

</mosaic_0001>

<bundles_post_ra>
// kernel: tpu_custom_call.1
= control target key start
LH: loop header
LB: loop body
LE: loop exit
PB: predicated region body
PF: predicated region fallthrough
CT: control target
= control target key end

     0   :  { %s4915_s0 = inlined_call_operand.hbm [shape: f32[2,22400], index: 0, kind: input, shape index: {}]   ;;  %s4916_s1 = inlined_call_operand.hbm [shape: f32[22400,512], index: 1, kind: input, shape index: {}]   ;;  %s4917_s2 = inlined_call_operand.hbm [shape: f32[2,512], index: 2, kind: output, shape index: {}]  }
   0x1   :  { %4925 = sst [smem:[#allocation21_spill]] %s4915_s0 }
   0x2   :  { %7 = vsyncpa [#allocation3], 0 }
   0x3   :  { %9 = vsyncpa [#allocation3 + $0x1], 0 }
   0x4   :  { %10 = vsyncpa [#allocation6], 0 }
   0x5   :  { %12 = vsyncpa [#allocation6 + $0x1], 0 }
   0x6   :  { %13 = vsyncpa [#allocation4], 0 }
   0x7   :  { %15 = vsyncpa [#allocation4 + $0x1], 0  ;;  %s3377_s9 = smov 0   ;;  %s3379_s10 = smov 0  }
   0x8   :  { %s3381_s11 = smov 0   ;;  %s3383_s12 = smov 0  }
   0x9   :  { %s3385_s13 = smov 0   ;;  %s3387_s14 = smov 0  }
   0xa   :  { %s3389_s15 = smov 0   ;;  %s3391_s16 = smov 0  }
   0xb   :  { %s3393_s17 = smov 0   ;;  %s3395_s18 = smov 0  }
   0xc   :  { %s3397_s19 = smov 0   ;;  %s3399_s20 = smov 0  }
   0xd   :  { %s3401_s21 = smov 0   ;;  %s3403_s22 = smov 0  }
   0xe LB: > { %4926 = sst [smem:[#allocation11_spill]] %s3312_s11  ;;  %s2981_s23 = sadd.s32 4294967295, %s3356_s22   ;;  %s3356_s22 = sphi %s3403_s22, %s21_s22   ;;  %s3352_s21 = sphi %s3401_s21, %s4966_s21   ;;  %s3348_s20 = sphi %s3399_s20, %s4965_s20   ;;  %s3344_s19 = sphi %s3397_s19, %s4964_s19   ;;  %s3340_s18 = sphi %s3395_s18, %s4954_s18   ;;  %s3336_s17 = sphi %s3393_s17, %s4953_s17   ;;  %s3332_s16 = sphi %s3391_s16, %s4963_s16   ;;  %s3328_s15 = sphi %s3389_s15, %s4962_s15   ;;  %s3324_s14 = sphi %s3387_s14, %s4961_s14   ;;  %s3320_s13 = sphi %s3385_s13, %s4960_s13   ;;  %s3316_s12 = sphi %s3383_s12, %s4959_s12   ;;  %s3312_s11 = sphi %s3381_s11, %s4949_s11   ;;  %s3308_s10 = sphi %s3379_s10, %s4958_s10   ;;  %s3304_s9 = sphi %s3377_s9, %s4957_s9  }
   0xf   : > { %4927 = sst [smem:[#allocation12_spill]] %s3324_s14  ;;  %s2982_s24 = sadd.s32 4294967294, %s3356_s22  }
  0x10   : > { %4928 = sst [smem:[#allocation13_spill]] %s3336_s17  ;;  %s30_s25 = sadd.s32 1, %s3348_s20 }
  0x11   : > { %4929 = sst [smem:[#allocation14_spill]] %s3348_s20  ;;  %s33_s26 = sadd.s32 1, %s3352_s21 }
  0x12   : > { %p31_p0 = scmp.ge.s32.totalorder %s30_s25, 5  ;;  %s40_s27 = sadd.s32 1, %s3336_s17 }
  0x13   : > { %p47_p1 = scmp.ne.s32.totalorder %s3336_s17, %s3332_s16  ;;  %p48_p2 = scmp.eq.s32.totalorder %s3356_s22, 0 }
  0x14   : > { %s4968_s25 = smov (%p31_p0, %s30_s25), 0  ;;  %s4970_s26 = smov (!%p31_p0, %s33_s26), %s3352_s21 }
  0x15   : > { %4930 = sst [smem:[#allocation15_spill]] %s4968_s25  ;;  %s37_s28 = ssub.s32 %s3348_s20, %s4968_s25 }
  0x16   : > { %p3460_p3 = por %p48_p2, %p47_p1  ;;  %p35_p4 = scmp.ge.s32.totalorder %s4970_s26, 2 }
  0x17   : > { %p38_p5 = scmp.eq.s32.totalorder %s37_s28, 0  ;;  %p53_p6 = scmp.ne.s32.totalorder %s3332_s16, %s3328_s15 }
  0x18   : > { %p3467_p7 = scmp.eq.s32.totalorder %s2981_s23, 0  ;;  %s4972_s26 = smov (%p35_p4, %s4970_s26), 0 }
  0x19   : > { %4933 = sst [smem:[#allocation16_spill]] %s4972_s26  ;;  %s64_s5 = ssub.s32 %s3352_s21, %s4972_s26 }
  0x1a   : > { %s3474_s3 = scalar_select %p38_p5, %s3336_s17, %s40_s27  }
  0x1b   : > { %p3478_p8 = por %p3467_p7, %p53_p6  ;;  %s65_s6 = sor.u32 %s64_s5, %s37_s28 }
  0x1c   : > { %4934 = sst [smem:[#allocation17_spill]] %s3474_s3  ;;  %s68_s7 = sadd.s32 1, %s3324_s14 }
  0x1d   : > { %p66_p9 = scmp.eq.s32.totalorder %s65_s6, 0  ;;  %p75_p10 = scmp.ne.s32.totalorder %s3324_s14, %s3320_s13 }
  0x1e   : > { %p81_p11 = scmp.ne.s32.totalorder %s3320_s13, %s3316_s12  ;;  %p92_p12 = scmp.eq.s32.totalorder %s64_s5, 0 }
  0x1f   : > { %s3490_s8 = scalar_select %p66_p9, %s3324_s14, %s68_s7  }
  0x20   : > { %p3494_p13 = por %p75_p10, %p48_p2  ;;  %p3500_p0 = por %p81_p11, %p3467_p7 }
  0x21   : > { %4936 = sst [smem:[#allocation18_spill]] %s3490_s8  ;;  %s94_s28 = sadd.s32 1, %s3312_s11 }
  0x22   : > { %p104_p1 = scmp.ne.s32.totalorder %s3312_s11, %s3308_s10  ;;  %p105_p4 = scmp.eq.s32.totalorder %s2981_s23, 9 }
  0x23   : > { %s3508_s12 = scalar_select %p92_p12, %s3312_s11, %s94_s28  }
  0x24   : > { %p110_p5 = scmp.ne.s32.totalorder %s3308_s10, %s3304_s9  ;;  %p111_p6 = scmp.eq.s32.totalorder %s2982_s24, 9 }
  0x25   : > { %4939 = sst [smem:[#allocation19_spill]] %s3508_s12  ;;  %p3516_p9 = por %p105_p4, %p104_p1 }
  0x26   : > { %p3021_p2 = scmp.lt.s32.totalorder %s3356_s22, 10  ;;  %p3521_p7 = por %p111_p6, %p110_p5 }
  0x27   : > { %s131_s6 = sand.u32 1, %s3336_s17   ;;  %s2997_s23 = smul.u32 70, %s3348_s20 }
  0x28   : > { %s4941_s30 = scalar_select %p3521_p7, 1, 0 }
  0x29   : > { %s3000_s7 = smul.u32 70, %s131_s6  ;;  %p3011_p10 = pnand %p3021_p2, %p3460_p3 }
  0x2a   : > { %4942 = sst [smem:[#allocation20_spill]] %s4941_s30  ;;  %s2998_s24 = smul.u32 2240, %s3348_s20 }
  0x2b   : > { %s4943_s0 = sld [smem:[#allocation21_spill]]  ;;  %s135_s3 = scalar_lea.vmem [#allocation2], %s3000_s7 }
  0x2c   : > { %s144_s8 = sshll.u32 %s135_s3, 4  ;;  %s132_s11 = scalar_lea.sflag [#allocation3], %s131_s6  ;;  %s145_s8 = int_to_ptr.vmem [resolvable:$true] %s144_s8 }
  0x2d   : > { %p3539_p11 = pnand %p3021_p2, %p3494_p13  ;;  %p2989_p3 = scmp.ge.s32.totalorder %s3356_s22, 1 }
  0x2e   : > { %p174_p12 = scmp.lt.s32.totalorder %s3356_s22, 11  ;;  %s151_s29 = sand.u32 1, %s3324_s14  }
  0x2f   : > { %s3001_s3 = smul.u32 8960, %s151_s29  ;;  %s3358_s20 = smov 512  }
  0x30   : > { %p3546_p1 = pnand %p2989_p3, %p174_p12  ;;  %s3359_s14 = smov 256  }
  0x31   : > { %s140_s25 = scalar_lea.hbm %s4943_s0, %s2997_s23  ;;  %s155_s6 = scalar_lea.vmem [#allocation5], %s3001_s3 }
  0x32   : > { %s142_s12 = sshll.u32 %s140_s25, 4  ;;  %s2986_s25 = sshll.u32 %s3352_s21, 1  ;;  %s143_s12 = int_to_ptr.hbm [resolvable:$true] %s142_s12 }
  0x33   : > { %3013 = dma.hbm_to_vmem [thread:$0]  (!%p3011_p10), %s143_s12, 1120, %s145_s8, %s132_s11  }
  0x34   : > { %s161_s7 = sadd.s32 %s2998_s24, %s2986_s25  ;;  %s166_s11 = sshll.u32 %s155_s6, 4  ;;  %s167_s11 = int_to_ptr.vmem [resolvable:$true] %s166_s11 }
  0x35   : > { %s2988_s23 = sshll.u32 %s161_s7, 3  ;;  %s152_s0 = scalar_lea.sflag [#allocation6], %s151_s29 }
  0x36   : > { %s163_s12 = scalar_lea.hbm %s4916_s1, %s2988_s23  ;;  %s3360_s30 = smov 16  }
  0x37   : > { %s164_s28 = sshll.u32 %s163_s12, 4  ;;  %178 = sbr.rel (%p3546_p1) target bundleno = 828 (0x33c), region = 28  ;;  %s165_s28 = int_to_ptr.hbm [resolvable:$true] %s164_s28 }
  0x38   : > { %3016 = dma.hbm_to_vmem [thread:$0]  (!%p3539_p11), %s165_s28, 143360, %s167_s11, %s152_s0, %s3358_s20, %s3359_s14, %s3360_s30  }
  0x39   : > { %s180_s24 = sand.u32 (!%p3546_p1), 1, %s3332_s16  }
  0x3a   : > { %s3002_s3 = smul.u32 (!%p3546_p1), 70, %s180_s24  ;;  %s181_s25 = scalar_lea.sflag (!%p3546_p1), [#allocation3], %s180_s24 }
  0x3c   : > { %s3559_s7 = scalar_lea.vmem [#allocation2], %s3002_s3 }
  0x3d   : > { %3291 = dma.done.wait (%p3478_p8), %s181_s25, 1120  }
  0x3e   : > { %3293 = vsyncadd (%p3478_p8), %s181_s25, 4294966176  ;;  %s190_s29 = sand.u32 1, %s3320_s13  }
  0x3f   : > { %s3003_s17 = smul.u32 8960, %s190_s29  ;;  %s191_s0 = scalar_lea.sflag [#allocation6], %s190_s29 }
  0x41   : > { %s3566_s14 = scalar_lea.vmem [#allocation5], %s3003_s17 }
  0x42   : > { %3295 = dma.done.wait (%p3500_p0), %s191_s0, 143360  }
  0x43   : > { %3297 = vsyncadd (%p3500_p0), %s191_s0, 4294823936  ;;  %s218_s20 = sand.u32 1, %s3308_s10   ;;  %p2991_p8 = scmp.ne.s32.totalorder %s3340_s18, 0 }
  0x44   : > { %s2990_s30 = sshll.u32 %s218_s20, 2 }
  0x45   : > { %s3575_s26 = scalar_lea.vmem [#allocation7], %s2990_s30  ;;  %228 = sbr.rel (%p2991_p8) target bundleno = 76 (0x4c), region = 40 }
  0x4a   : > { %v3361_v0 = vmov 0.0  }
  0x4b   : > { %229 = vst [vmem:[%s3575_s26] sm:$0xf] %v3361_v0 }
  0x4c PF: > { %v270_v1 = vld [vmem:[%s3566_s14 + $0xf0] sm:$0xff]  ;;  %v268_v3 = vld [vmem:[%s3566_s14 + $0xe0] sm:$0xff]  ;;  %s2999_s18 = sshll.u32 %s3344_s19, 2  ;;  %vm2852_vm0 = vcmask 1041408   ;;  %s2871_s6 = sshll.u32 %s3575_s26, 4  ;;  %s2872_s6 = int_to_ptr.vmem [resolvable:$true] %s2871_s6 }
  0x4d   : > { %v334_v2 = vld [vmem:[%s3566_s14 + $0x2f0] sm:$0xff]  ;;  %1449 = vmatpush.msra.mxu0 %v270_v1  ;;  %v332_v5 = vld [vmem:[%s3566_s14 + $0x2e0] sm:$0xff]  ;;  %s2869_s23 = scalar_lea.hbm %s4917_s2, %s2999_s18  ;;  %s2858_s19 = scalar_lea.sflag [#allocation4], %s218_s20 }
  0x4e   : > { %1489 = vmatpush.msra.mxu2 %v334_v2  ;;  %v302_v4 = vld [vmem:[%s3566_s14 + $0x1f0] sm:$0xff]  ;;  %v300_v8 = vld [vmem:[%s3566_s14 + $0x1e0] sm:$0xff]  ;;  %s2873_s11 = sshll.u32 %s2869_s23, 4  ;;  %s3226_s24 = scalar_lea.hbm %s4917_s2, 8  ;;  %s2874_s11 = int_to_ptr.hbm [resolvable:$true] %s2873_s11 }
  0x4f   : > { %v366_v6 = vld [vmem:[%s3566_s14 + $0x3f0] sm:$0xff]  ;;  %1469 = vmatpush.msra.mxu1 %v302_v4  ;;  %1450 = vmatpush.msra.mxu0 %v268_v3  ;;  %v364_v10 = vld [vmem:[%s3566_s14 + $0x3e0] sm:$0xff]  ;;  %s3220_s8 = sshra.s32 %s2874_s11, 4  ;;  %s3221_s8 = int_to_ptr.hbm [resolvable:$true] %s3220_s8 }
  0x50   : > { %1509 = vmatpush.msra.mxu3 %v366_v6  ;;  %v266_v7 = vld [vmem:[%s3566_s14 + $0xd0] sm:$0xff]  ;;  %1490 = vmatpush.msra.mxu2 %v332_v5  ;;  %v264_v12 = vld [vmem:[%s3566_s14 + $0xc0] sm:$0xff]  ;;  %s3222_s15 = scalar_lea.hbm %s3221_s8, 4  ;;  %p3227_p5 = scmp.lt.s32.totalorder %s3221_s8, %s4917_s2 }
  0x51   : > { %v330_v9 = vld [vmem:[%s3566_s14 + $0x2d0] sm:$0xff]  ;;  %1470 = vmatpush.msra.mxu1 %v300_v8  ;;  %v328_v13 = vld [vmem:[%s3566_s14 + $0x2c0] sm:$0xff]  ;;  %1451 = vmatpush.msra.mxu0 %v266_v7  ;;  %p3223_p13 = scmp.ne.s32.totalorder %s3221_s8, %s3222_s15  ;;  %p3228_p6 = scmp.lt.s32.totalorder %s3226_s24, %s3222_s15 }
  0x52   : > { %v298_v11 = vld [vmem:[%s3566_s14 + $0x1d0] sm:$0xff]  ;;  %1510 = vmatpush.msra.mxu3 %v364_v10  ;;  %1491 = vmatpush.msra.mxu2 %v330_v9  ;;  %v296_v15 = vld [vmem:[%s3566_s14 + $0x1c0] sm:$0xff] }
  0x53   : > { %v362_v14 = vld [vmem:[%s3566_s14 + $0x3d0] sm:$0xff]  ;;  %v360_v16 = vld [vmem:[%s3566_s14 + $0x3c0] sm:$0xff]  ;;  %1471 = vmatpush.msra.mxu1 %v298_v11  ;;  %1452 = vmatpush.msra.mxu0 %v264_v12  ;;  %p3224_p0 = pnand %p3223_p13, %p3516_p9  ;;  %p3229_p2 = por %p3228_p6, %p3227_p5 }
  0x54   : > { %1511 = vmatpush.msra.mxu3 %v362_v14  ;;  %v262_v17 = vld [vmem:[%s3566_s14 + $0xb0] sm:$0xff]  ;;  %1492 = vmatpush.msra.mxu2 %v328_v13  ;;  %v260_v21 = vld [vmem:[%s3566_s14 + $0xa0] sm:$0xff] }
  0x55   : > { %v326_v18 = vld [vmem:[%s3566_s14 + $0x2b0] sm:$0xff]  ;;  %1472 = vmatpush.msra.mxu1 %v296_v15  ;;  %v324_v22 = vld [vmem:[%s3566_s14 + $0x2a0] sm:$0xff]  ;;  %1453 = vmatpush.msra.mxu0 %v262_v17  ;;  %p3225_p4 = pneg %p3224_p0 }
  0x56   : > { %v294_v19 = vld [vmem:[%s3566_s14 + $0x1b0] sm:$0xff]  ;;  %1512 = vmatpush.msra.mxu3 %v360_v16  ;;  %1493 = vmatpush.msra.mxu2 %v326_v18  ;;  %v292_v23 = vld [vmem:[%s3566_s14 + $0x1a0] sm:$0xff] }
  0x57   : > { %v358_v20 = vld [vmem:[%s3566_s14 + $0x3b0] sm:$0xff]  ;;  %v356_v24 = vld [vmem:[%s3566_s14 + $0x3a0] sm:$0xff]  ;;  %1473 = vmatpush.msra.mxu1 %v294_v19  ;;  %1454 = vmatpush.msra.mxu0 %v260_v21  ;;  %p3230_p10 = pnand %p3229_p2, %p3225_p4 }
  0x58   : > { %1513 = vmatpush.msra.mxu3 %v358_v20  ;;  %v258_v25 = vld [vmem:[%s3566_s14 + $0x90] sm:$0xff]  ;;  %1494 = vmatpush.msra.mxu2 %v324_v22  ;;  %v256_v29 = vld [vmem:[%s3566_s14 + $0x80] sm:$0xff] }
  0x59   : > { %v322_v26 = vld [vmem:[%s3566_s14 + $0x290] sm:$0xff]  ;;  %1474 = vmatpush.msra.mxu1 %v292_v23  ;;  %v320_v30 = vld [vmem:[%s3566_s14 + $0x280] sm:$0xff]  ;;  %1455 = vmatpush.msra.mxu0 %v258_v25 }
  0x5a   : > { %v290_v27 = vld [vmem:[%s3566_s14 + $0x190] sm:$0xff]  ;;  %1514 = vmatpush.msra.mxu3 %v356_v24  ;;  %1495 = vmatpush.msra.mxu2 %v322_v26  ;;  %v288_v31 = vld [vmem:[%s3566_s14 + $0x180] sm:$0xff] }
  0x5b   : > { %v354_v28 = vld [vmem:[%s3566_s14 + $0x390] sm:$0xff]  ;;  %v352_v32 = vld [vmem:[%s3566_s14 + $0x380] sm:$0xff]  ;;  %1475 = vmatpush.msra.mxu1 %v290_v27  ;;  %1456 = vmatpush.msra.mxu0 %v256_v29 }
  0x5c   : > { %1515 = vmatpush.msra.mxu3 %v354_v28  ;;  %v254_v33 = vld [vmem:[%s3566_s14 + $0x70] sm:$0xff]  ;;  %1496 = vmatpush.msra.mxu2 %v320_v30  ;;  %v252_v37 = vld [vmem:[%s3566_s14 + $0x60] sm:$0xff] }
  0x5d   : > { %v318_v34 = vld [vmem:[%s3566_s14 + $0x270] sm:$0xff]  ;;  %1476 = vmatpush.msra.mxu1 %v288_v31  ;;  %v316_v38 = vld [vmem:[%s3566_s14 + $0x260] sm:$0xff]  ;;  %1457 = vmatpush.msra.mxu0 %v254_v33 }
  0x5e   : > { %v286_v35 = vld [vmem:[%s3566_s14 + $0x170] sm:$0xff]  ;;  %1516 = vmatpush.msra.mxu3 %v352_v32  ;;  %1497 = vmatpush.msra.mxu2 %v318_v34  ;;  %v284_v39 = vld [vmem:[%s3566_s14 + $0x160] sm:$0xff] }
  0x5f   : > { %v350_v36 = vld [vmem:[%s3566_s14 + $0x370] sm:$0xff]  ;;  %v348_v40 = vld [vmem:[%s3566_s14 + $0x360] sm:$0xff]  ;;  %1477 = vmatpush.msra.mxu1 %v286_v35  ;;  %1458 = vmatpush.msra.mxu0 %v252_v37 }
  0x60   : > { %1517 = vmatpush.msra.mxu3 %v350_v36  ;;  %v250_v41 = vld [vmem:[%s3566_s14 + $0x50] sm:$0xff]  ;;  %1498 = vmatpush.msra.mxu2 %v316_v38  ;;  %v248_v45 = vld [vmem:[%s3566_s14 + $0x40] sm:$0xff] }
  0x61   : > { %v314_v42 = vld [vmem:[%s3566_s14 + $0x250] sm:$0xff]  ;;  %1478 = vmatpush.msra.mxu1 %v284_v39  ;;  %v312_v46 = vld [vmem:[%s3566_s14 + $0x240] sm:$0xff]  ;;  %1459 = vmatpush.msra.mxu0 %v250_v41 }
  0x62   : > { %v282_v43 = vld [vmem:[%s3566_s14 + $0x150] sm:$0xff]  ;;  %1518 = vmatpush.msra.mxu3 %v348_v40  ;;  %1499 = vmatpush.msra.mxu2 %v314_v42  ;;  %v280_v47 = vld [vmem:[%s3566_s14 + $0x140] sm:$0xff] }
  0x63   : > { %v346_v44 = vld [vmem:[%s3566_s14 + $0x350] sm:$0xff]  ;;  %v344_v48 = vld [vmem:[%s3566_s14 + $0x340] sm:$0xff]  ;;  %1479 = vmatpush.msra.mxu1 %v282_v43  ;;  %1460 = vmatpush.msra.mxu0 %v248_v45 }
  0x64   : > { %1519 = vmatpush.msra.mxu3 %v346_v44  ;;  %v246_v49 = vld [vmem:[%s3566_s14 + $0x30] sm:$0xff]  ;;  %1500 = vmatpush.msra.mxu2 %v312_v46  ;;  %v244_v53 = vld [vmem:[%s3566_s14 + $0x20] sm:$0xff] }
  0x65   : > { %v310_v50 = vld [vmem:[%s3566_s14 + $0x230] sm:$0xff]  ;;  %1480 = vmatpush.msra.mxu1 %v280_v47  ;;  %v308_v54 = vld [vmem:[%s3566_s14 + $0x220] sm:$0xff]  ;;  %1461 = vmatpush.msra.mxu0 %v246_v49 }
  0x66   : > { %v278_v51 = vld [vmem:[%s3566_s14 + $0x130] sm:$0xff]  ;;  %1520 = vmatpush.msra.mxu3 %v344_v48  ;;  %1501 = vmatpush.msra.mxu2 %v310_v50  ;;  %v276_v55 = vld [vmem:[%s3566_s14 + $0x120] sm:$0xff] }
  0x67   : > { %v342_v52 = vld [vmem:[%s3566_s14 + $0x330] sm:$0xff]  ;;  %v340_v56 = vld [vmem:[%s3566_s14 + $0x320] sm:$0xff]  ;;  %1481 = vmatpush.msra.mxu1 %v278_v51  ;;  %1462 = vmatpush.msra.mxu0 %v244_v53 }
  0x68   : > { %1521 = vmatpush.msra.mxu3 %v342_v52  ;;  %v242_v57 = vld [vmem:[%s3566_s14 + $0x10] sm:$0xff]  ;;  %1502 = vmatpush.msra.mxu2 %v308_v54  ;;  %v240_v61 = vld [vmem:[%s3566_s14] sm:$0xff] }
  0x69   : > { %v306_v58 = vld [vmem:[%s3566_s14 + $0x210] sm:$0xff]  ;;  %1482 = vmatpush.msra.mxu1 %v276_v55  ;;  %v304_v62 = vld [vmem:[%s3566_s14 + $0x200] sm:$0xff]  ;;  %1463 = vmatpush.msra.mxu0 %v242_v57 }
  0x6a   : > { %v274_v59 = vld [vmem:[%s3566_s14 + $0x110] sm:$0xff]  ;;  %1522 = vmatpush.msra.mxu3 %v340_v56  ;;  %1503 = vmatpush.msra.mxu2 %v306_v58  ;;  %v272_v1 = vld [vmem:[%s3566_s14 + $0x100] sm:$0xff] }
  0x6b   : > { %v338_v60 = vld [vmem:[%s3566_s14 + $0x310] sm:$0xff]  ;;  %1483 = vmatpush.msra.mxu1 %v274_v59  ;;  %v336_v2 = vld [vmem:[%s3566_s14 + $0x300] sm:$0xff]  ;;  %1464 = vmatpush.msra.mxu0 %v240_v61 }
  0x6c   : > { %v398_v63 = vld [vmem:[%s3566_s14 + $0x4f0] sm:$0xff]  ;;  %1523 = vmatpush.msra.mxu3 %v338_v60  ;;  %1504 = vmatpush.msra.mxu2 %v304_v62  ;;  %v396_v3 = vld [vmem:[%s3566_s14 + $0x4e0] sm:$0xff] }
  0x6d   : > { %v462_v0 = vld [vmem:[%s3566_s14 + $0x6f0] sm:$0xff]  ;;  %1529 = vmatpush.msrb.mxu0 %v398_v63  ;;  %v460_v5 = vld [vmem:[%s3566_s14 + $0x6e0] sm:$0xff]  ;;  %1484 = vmatpush.msra.mxu1 %v272_v1 }
  0x6e   : > { %v430_v4 = vld [vmem:[%s3566_s14 + $0x5f0] sm:$0xff]  ;;  %1569 = vmatpush.msrb.mxu2 %v462_v0  ;;  %1524 = vmatpush.msra.mxu3 %v336_v2  ;;  %v428_v8 = vld [vmem:[%s3566_s14 + $0x5e0] sm:$0xff] }
  0x6f   : > { %v494_v6 = vld [vmem:[%s3566_s14 + $0x7f0] sm:$0xff]  ;;  %1530 = vmatpush.msrb.mxu0 %v396_v3  ;;  %1549 = vmatpush.msrb.mxu1 %v430_v4  ;;  %v492_v10 = vld [vmem:[%s3566_s14 + $0x7e0] sm:$0xff] }
  0x70   : > { %v394_v7 = vld [vmem:[%s3566_s14 + $0x4d0] sm:$0xff]  ;;  %1570 = vmatpush.msrb.mxu2 %v460_v5  ;;  %1589 = vmatpush.msrb.mxu3 %v494_v6  ;;  %v392_v11 = vld [vmem:[%s3566_s14 + $0x4c0] sm:$0xff] }
  0x71   : > { %v458_v9 = vld [vmem:[%s3566_s14 + $0x6d0] sm:$0xff]  ;;  %1531 = vmatpush.msrb.mxu0 %v394_v7  ;;  %1550 = vmatpush.msrb.mxu1 %v428_v8  ;;  %v456_v13 = vld [vmem:[%s3566_s14 + $0x6c0] sm:$0xff] }
  0x72   : > { %v426_v12 = vld [vmem:[%s3566_s14 + $0x5d0] sm:$0xff]  ;;  %1571 = vmatpush.msrb.mxu2 %v458_v9  ;;  %1590 = vmatpush.msrb.mxu3 %v492_v10  ;;  %v424_v16 = vld [vmem:[%s3566_s14 + $0x5c0] sm:$0xff] }
  0x73   : > { %v490_v14 = vld [vmem:[%s3566_s14 + $0x7d0] sm:$0xff]  ;;  %1532 = vmatpush.msrb.mxu0 %v392_v11  ;;  %1551 = vmatpush.msrb.mxu1 %v426_v12  ;;  %v488_v18 = vld [vmem:[%s3566_s14 + $0x7c0] sm:$0xff] }
  0x74   : > { %v390_v15 = vld [vmem:[%s3566_s14 + $0x4b0] sm:$0xff]  ;;  %1572 = vmatpush.msrb.mxu2 %v456_v13  ;;  %1591 = vmatpush.msrb.mxu3 %v490_v14  ;;  %v388_v19 = vld [vmem:[%s3566_s14 + $0x4a0] sm:$0xff] }
  0x75   : > { %v454_v17 = vld [vmem:[%s3566_s14 + $0x6b0] sm:$0xff]  ;;  %1533 = vmatpush.msrb.mxu0 %v390_v15  ;;  %1552 = vmatpush.msrb.mxu1 %v424_v16  ;;  %v452_v22 = vld [vmem:[%s3566_s14 + $0x6a0] sm:$0xff] }
  0x76   : > { %v422_v20 = vld [vmem:[%s3566_s14 + $0x5b0] sm:$0xff]  ;;  %1573 = vmatpush.msrb.mxu2 %v454_v17  ;;  %1592 = vmatpush.msrb.mxu3 %v488_v18  ;;  %v420_v25 = vld [vmem:[%s3566_s14 + $0x5a0] sm:$0xff] }
  0x77   : > { %v231_v21 = vld [vmem:[%s3559_s7] sm:$0xff]  ;;  %1534 = vmatpush.msrb.mxu0 %v388_v19  ;;  %1553 = vmatpush.msrb.mxu1 %v422_v20  ;;  %v232_v38 = vld [vmem:[%s3559_s7 + $0x8] sm:$0xff]  ;;  %v233_v41 = vld [vmem:[%s3559_s7 + $0x10] sm:$0xff] }
  0x78   : > { %v486_v23 = vld [vmem:[%s3566_s14 + $0x7b0] sm:$0xff]  ;;  %1369 = vst [vmem:[#allocation1] ss:$4 sm:$0xff] %v231_v21  ;;  %v484_v27 = vld [vmem:[%s3566_s14 + $0x7a0] sm:$0xff]  ;;  %1574 = vmatpush.msrb.mxu2 %v452_v22 }
  0x79   : > { %v386_v24 = vld [vmem:[%s3566_s14 + $0x490] sm:$0xff]  ;;  %v384_v28 = vld [vmem:[%s3566_s14 + $0x480] sm:$0xff]  ;;  %1593 = vmatpush.msrb.mxu3 %v486_v23  ;;  %1554 = vmatpush.msrb.mxu1 %v420_v25  ;;  %1371 = vst [vmem:[#allocation1 + $0x20] ss:$4 sm:$0xff] %v232_v38 }
  0x7a   : > { %v450_v26 = vld [vmem:[%s3566_s14 + $0x690] sm:$0xff]  ;;  %v448_v30 = vld [vmem:[%s3566_s14 + $0x680] sm:$0xff]  ;;  %1535 = vmatpush.msrb.mxu0 %v386_v24 }
  0x7b   : > { %v418_v29 = vld [vmem:[%s3566_s14 + $0x590] sm:$0xff]  ;;  %v416_v33 = vld [vmem:[%s3566_s14 + $0x580] sm:$0xff]  ;;  %1575 = vmatpush.msrb.mxu2 %v450_v26  ;;  %1594 = vmatpush.msrb.mxu3 %v484_v27 }
  0x7c   : > { %v482_v31 = vld [vmem:[%s3566_s14 + $0x790] sm:$0xff]  ;;  %v480_v35 = vld [vmem:[%s3566_s14 + $0x780] sm:$0xff]  ;;  %1536 = vmatpush.msrb.mxu0 %v384_v28  ;;  %1555 = vmatpush.msrb.mxu1 %v418_v29 }
  0x7d   : > { %v382_v32 = vld [vmem:[%s3566_s14 + $0x470] sm:$0xff]  ;;  %v380_v36 = vld [vmem:[%s3566_s14 + $0x460] sm:$0xff]  ;;  %1576 = vmatpush.msrb.mxu2 %v448_v30  ;;  %1595 = vmatpush.msrb.mxu3 %v482_v31 }
  0x7e   : > { %v446_v34 = vld [vmem:[%s3566_s14 + $0x670] sm:$0xff]  ;;  %v444_v39 = vld [vmem:[%s3566_s14 + $0x660] sm:$0xff]  ;;  %1537 = vmatpush.msrb.mxu0 %v382_v32  ;;  %1556 = vmatpush.msrb.mxu1 %v416_v33 }
  0x7f   : > { %v414_v37 = vld [vmem:[%s3566_s14 + $0x570] sm:$0xff]  ;;  %v3685_v43 = vld.sshfl [vmem:[#allocation1 + $0x10] sm:$0xff pattern:$0x73625140]  ;;  %1577 = vmatpush.msrb.mxu2 %v446_v34  ;;  %1596 = vmatpush.msrb.mxu3 %v480_v35 }
  0x80   : > { %v478_v40 = vld [vmem:[%s3566_s14 + $0x770] sm:$0xff]  ;;  %v3689_v45 = vld.sshfl [vmem:[#allocation1 + $0x18] sm:$0xff pattern:$0x73625140]  ;;  %1538 = vmatpush.msrb.mxu0 %v380_v36  ;;  %1557 = vmatpush.msrb.mxu1 %v414_v37 }
  0x81   : > { %v378_v42 = vld [vmem:[%s3566_s14 + $0x450] sm:$0xff]  ;;  %v412_v47 = vld [vmem:[%s3566_s14 + $0x560] sm:$0xff]  ;;  %1578 = vmatpush.msrb.mxu2 %v444_v39  ;;  %1597 = vmatpush.msrb.mxu3 %v478_v40 }
  0x82   : > { %v3687_v44 = vld.sshfl [vmem:[#allocation1] sm:$0xff pattern:$0x73625140]  ;;  %v3691_v46 = vld.sshfl [vmem:[#allocation1 + $0x8] sm:$0xff pattern:$0x73625140]  ;;  %1539 = vmatpush.msrb.mxu0 %v378_v42  ;;  %1558 = vmatpush.msrb.mxu1 %v412_v47 }
  0x83   : > { %v442_v48 = vld [vmem:[%s3566_s14 + $0x650] sm:$0xff]  ;;  %v476_v49 = vld [vmem:[%s3566_s14 + $0x760] sm:$0xff]  ;;  %1380 = vst [vmem:[#allocation1] ss:$4 sm:$0xff] %v233_v41  ;;  %1505 = vmatmul.f32.vlgmr.msra.gmra.mxu2 %v3685_v43  ;;  %1465 = vmatmul.f32.vlgmr.msra.gmra.mxu0 %v3687_v44 }
  0x84   : > { %v376_v50 = vld [vmem:[%s3566_s14 + $0x440] sm:$0xff]  ;;  %v410_v51 = vld [vmem:[%s3566_s14 + $0x550] sm:$0xff]  ;;  %1579 = vmatpush.msrb.mxu2 %v442_v48  ;;  %1598 = vmatpush.msrb.mxu3 %v476_v49 }
  0x85   : > { %v440_v52 = vld [vmem:[%s3566_s14 + $0x640] sm:$0xff]  ;;  %v474_v53 = vld [vmem:[%s3566_s14 + $0x750] sm:$0xff]  ;;  %1540 = vmatpush.msrb.mxu0 %v376_v50  ;;  %1559 = vmatpush.msrb.mxu1 %v410_v51 }
  0x86   : > { %v374_v54 = vld [vmem:[%s3566_s14 + $0x430] sm:$0xff]  ;;  %v408_v55 = vld [vmem:[%s3566_s14 + $0x540] sm:$0xff]  ;;  %1580 = vmatpush.msrb.mxu2 %v440_v52  ;;  %1599 = vmatpush.msrb.mxu3 %v474_v53 }
  0x87   : > { %v438_v56 = vld [vmem:[%s3566_s14 + $0x630] sm:$0xff]  ;;  %v472_v57 = vld [vmem:[%s3566_s14 + $0x740] sm:$0xff]  ;;  %1541 = vmatpush.msrb.mxu0 %v374_v54  ;;  %1560 = vmatpush.msrb.mxu1 %v408_v55 }
  0x88   : > { %v234_v58 = vld [vmem:[%s3559_s7 + $0x18] sm:$0xff]  ;;  %v3705_v59 = vld.sshfl [vmem:[#allocation1 + $0x30] sm:$0xff pattern:$0x73625140]  ;;  %1581 = vmatpush.msrb.mxu2 %v438_v56  ;;  %1600 = vmatpush.msrb.mxu3 %v472_v57 }
  0x89   : > { %v3707_v60 = vld.sshfl [vmem:[#allocation1 + $0x20] sm:$0xff pattern:$0x73625140]  ;;  %v3709_v61 = vld.sshfl [vmem:[#allocation1 + $0x38] sm:$0xff pattern:$0x73625140]  ;;  %1525 = vmatmul.f32.vlgmr.msra.gmra.mxu3 %v3689_v45  ;;  %1485 = vmatmul.f32.vlgmr.msra.gmra.mxu1 %v3691_v46 }
  0x8a   : > { %v3711_v62 = vld.sshfl [vmem:[#allocation1 + $0x28] sm:$0xff pattern:$0x73625140]  ;;  %v372_v63 = vld [vmem:[%s3566_s14 + $0x420] sm:$0xff] }
  0x8b   : > { %v406_v0 = vld [vmem:[%s3566_s14 + $0x530] sm:$0xff]  ;;  %1381 = vst [vmem:[#allocation1 + $0x20] ss:$4 sm:$0xff] %v234_v58  ;;  %v436_v1 = vld [vmem:[%s3566_s14 + $0x620] sm:$0xff]  ;;  %1542 = vmatpush.msrb.mxu0 %v372_v63 }
  0x8c   : > { %v470_v2 = vld [vmem:[%s3566_s14 + $0x730] sm:$0xff]  ;;  %1561 = vmatpush.msrb.mxu1 %v406_v0  ;;  %v404_v4 = vld [vmem:[%s3566_s14 + $0x520] sm:$0xff]  ;;  %1582 = vmatpush.msrb.mxu2 %v436_v1 }
  0x8d   : > { %v370_v3 = vld [vmem:[%s3566_s14 + $0x410] sm:$0xff]  ;;  %1601 = vmatpush.msrb.mxu3 %v470_v2  ;;  %v468_v6 = vld [vmem:[%s3566_s14 + $0x720] sm:$0xff] }
  0x8e   : > { %v434_v5 = vld [vmem:[%s3566_s14 + $0x610] sm:$0xff]  ;;  %1543 = vmatpush.msrb.mxu0 %v370_v3  ;;  %v368_v7 = vld [vmem:[%s3566_s14 + $0x400] sm:$0xff]  ;;  %1562 = vmatpush.msrb.mxu1 %v404_v4 }
  0x8f   : > { %1583 = vmatpush.msrb.mxu2 %v434_v5  ;;  %v402_v8 = vld [vmem:[%s3566_s14 + $0x510] sm:$0xff]  ;;  %v432_v9 = vld [vmem:[%s3566_s14 + $0x600] sm:$0xff]  ;;  %1602 = vmatpush.msrb.mxu3 %v468_v6 }
  0x90   : > { %v466_v10 = vld [vmem:[%s3566_s14 + $0x710] sm:$0xff]  ;;  %1544 = vmatpush.msrb.mxu0 %v368_v7  ;;  %1563 = vmatpush.msrb.mxu1 %v402_v8  ;;  %v400_v13 = vld [vmem:[%s3566_s14 + $0x500] sm:$0xff] }
  0x91   : > { %v526_v11 = vld [vmem:[%s3566_s14 + $0x8f0] sm:$0xff]  ;;  %1584 = vmatpush.msrb.mxu2 %v432_v9  ;;  %v464_v14 = vld [vmem:[%s3566_s14 + $0x700] sm:$0xff]  ;;  %1603 = vmatpush.msrb.mxu3 %v466_v10 }
  0x92   : > { %v590_v12 = vld [vmem:[%s3566_s14 + $0xaf0] sm:$0xff]  ;;  %v524_v15 = vld [vmem:[%s3566_s14 + $0x8e0] sm:$0xff]  ;;  %1609 = vmatpush.msra.mxu0 %v526_v11  ;;  %1564 = vmatpush.msrb.mxu1 %v400_v13 }
  0x93   : > { %v558_v16 = vld [vmem:[%s3566_s14 + $0x9f0] sm:$0xff]  ;;  %1649 = vmatpush.msra.mxu2 %v590_v12  ;;  %v588_v17 = vld [vmem:[%s3566_s14 + $0xae0] sm:$0xff]  ;;  %1604 = vmatpush.msrb.mxu3 %v464_v14 }
  0x94   : > { %v622_v18 = vld [vmem:[%s3566_s14 + $0xbf0] sm:$0xff]  ;;  %1610 = vmatpush.msra.mxu0 %v524_v15  ;;  %1629 = vmatpush.msra.mxu1 %v558_v16  ;;  %v556_v20 = vld [vmem:[%s3566_s14 + $0x9e0] sm:$0xff] }
  0x95   : > { %v522_v19 = vld [vmem:[%s3566_s14 + $0x8d0] sm:$0xff]  ;;  %v620_v22 = vld [vmem:[%s3566_s14 + $0xbe0] sm:$0xff]  ;;  %1650 = vmatpush.msra.mxu2 %v588_v17  ;;  %1669 = vmatpush.msra.mxu3 %v622_v18 }
  0x96   : > { %v586_v21 = vld [vmem:[%s3566_s14 + $0xad0] sm:$0xff]  ;;  %v520_v23 = vld [vmem:[%s3566_s14 + $0x8c0] sm:$0xff]  ;;  %1585 = vmatmul.f32.vlgmr.msrb.gmra.mxu2 %v3705_v59  ;;  %1611 = vmatpush.msra.mxu0 %v522_v19 }
  0x97   : > { %v554_v24 = vld [vmem:[%s3566_s14 + $0x9d0] sm:$0xff]  ;;  %v3746_v26 = vld.sshfl [vmem:[#allocation1 + $0x10] sm:$0xff pattern:$0x73625140]  ;;  %1630 = vmatpush.msra.mxu1 %v556_v20  ;;  %1651 = vmatpush.msra.mxu2 %v586_v21 }
  0x98   : > { %v3743_v25 = vld.sshfl [vmem:[#allocation1] sm:$0xff pattern:$0x73625140]  ;;  %v3748_v27 = vld.sshfl [vmem:[#allocation1 + $0x8] sm:$0xff pattern:$0x73625140]  ;;  %1670 = vmatpush.msra.mxu3 %v620_v22  ;;  %1545 = vmatmul.f32.vlgmr.msrb.gmra.mxu0 %v3707_v60 }
  0x99   : > { %v584_v28 = vld [vmem:[%s3566_s14 + $0xac0] sm:$0xff]  ;;  %v618_v31 = vld [vmem:[%s3566_s14 + $0xbd0] sm:$0xff]  ;;  %1605 = vmatmul.f32.vlgmr.msrb.gmra.mxu3 %v3709_v61  ;;  %1612 = vmatpush.msra.mxu0 %v520_v23 }
  0x9a   : > { %v235_v29 = vld [vmem:[%s3559_s7 + $0x20] sm:$0xff]  ;;  %v3752_v30 = vld.sshfl [vmem:[#allocation1 + $0x18] sm:$0xff pattern:$0x73625140]  ;;  %1631 = vmatpush.msra.mxu1 %v554_v24  ;;  %1652 = vmatpush.msra.mxu2 %v584_v28 }
  0x9b   : > { %1390 = vst [vmem:[#allocation1] ss:$4 sm:$0xff] %v235_v29  ;;  %v518_v32 = vld [vmem:[%s3566_s14 + $0x8b0] sm:$0xff]  ;;  %v552_v33 = vld [vmem:[%s3566_s14 + $0x9c0] sm:$0xff]  ;;  %1671 = vmatpush.msra.mxu3 %v618_v31  ;;  %1565 = vmatmul.f32.vlgmr.msrb.gmra.mxu1 %v3711_v62 }
  0x9c   : > { %v582_v34 = vld [vmem:[%s3566_s14 + $0xab0] sm:$0xff]  ;;  %v616_v35 = vld [vmem:[%s3566_s14 + $0xbc0] sm:$0xff]  ;;  %1613 = vmatpush.msra.mxu0 %v518_v32  ;;  %1632 = vmatpush.msra.mxu1 %v552_v33 }
  0x9d   : > { %v516_v36 = vld [vmem:[%s3566_s14 + $0x8a0] sm:$0xff]  ;;  %v550_v37 = vld [vmem:[%s3566_s14 + $0x9b0] sm:$0xff]  ;;  %1653 = vmatpush.msra.mxu2 %v582_v34  ;;  %1672 = vmatpush.msra.mxu3 %v616_v35 }
  0x9e   : > { %v580_v38 = vld [vmem:[%s3566_s14 + $0xaa0] sm:$0xff]  ;;  %v614_v39 = vld [vmem:[%s3566_s14 + $0xbb0] sm:$0xff]  ;;  %1614 = vmatpush.msra.mxu0 %v516_v36  ;;  %1633 = vmatpush.msra.mxu1 %v550_v37 }
  0x9f   : > { %v514_v40 = vld [vmem:[%s3566_s14 + $0x890] sm:$0xff]  ;;  %v548_v41 = vld [vmem:[%s3566_s14 + $0x9a0] sm:$0xff]  ;;  %1654 = vmatpush.msra.mxu2 %v580_v38  ;;  %1673 = vmatpush.msra.mxu3 %v614_v39 }
  0xa0   : > { %v578_v42 = vld [vmem:[%s3566_s14 + $0xa90] sm:$0xff]  ;;  %v612_v47 = vld [vmem:[%s3566_s14 + $0xba0] sm:$0xff]  ;;  %1615 = vmatpush.msra.mxu0 %v514_v40  ;;  %1634 = vmatpush.msra.mxu1 %v548_v41 }
  0xa1   : > { %v512_v48 = vld [vmem:[%s3566_s14 + $0x880] sm:$0xff]  ;;  %v546_v49 = vld [vmem:[%s3566_s14 + $0x990] sm:$0xff]  ;;  %1655 = vmatpush.msra.mxu2 %v578_v42  ;;  %1674 = vmatpush.msra.mxu3 %v612_v47 }
  0xa2   : > { %v576_v50 = vld [vmem:[%s3566_s14 + $0xa80] sm:$0xff]  ;;  %v610_v51 = vld [vmem:[%s3566_s14 + $0xb90] sm:$0xff]  ;;  %1616 = vmatpush.msra.mxu0 %v512_v48  ;;  %1635 = vmatpush.msra.mxu1 %v546_v49 }
  0xa3   : > { %v510_v52 = vld [vmem:[%s3566_s14 + $0x870] sm:$0xff]  ;;  %v544_v53 = vld [vmem:[%s3566_s14 + $0x980] sm:$0xff]  ;;  %1656 = vmatpush.msra.mxu2 %v576_v50  ;;  %1675 = vmatpush.msra.mxu3 %v610_v51 }
  0xa4   : > { %v574_v54 = vld [vmem:[%s3566_s14 + $0xa70] sm:$0xff]  ;;  %v608_v55 = vld [vmem:[%s3566_s14 + $0xb80] sm:$0xff]  ;;  %1617 = vmatpush.msra.mxu0 %v510_v52  ;;  %1636 = vmatpush.msra.mxu1 %v544_v53 }
  0xa5   : > { %v508_v56 = vld [vmem:[%s3566_s14 + $0x860] sm:$0xff]  ;;  %v542_v57 = vld [vmem:[%s3566_s14 + $0x970] sm:$0xff]  ;;  %1657 = vmatpush.msra.mxu2 %v574_v54  ;;  %1676 = vmatpush.msra.mxu3 %v608_v55 }
  0xa6   : > { %v572_v58 = vld [vmem:[%s3566_s14 + $0xa60] sm:$0xff]  ;;  %v606_v63 = vld [vmem:[%s3566_s14 + $0xb70] sm:$0xff]  ;;  %1618 = vmatpush.msra.mxu0 %v508_v56  ;;  %1637 = vmatpush.msra.mxu1 %v542_v57 }
  0xa7   : > { %v506_v0 = vld [vmem:[%s3566_s14 + $0x850] sm:$0xff]  ;;  %v540_v1 = vld [vmem:[%s3566_s14 + $0x960] sm:$0xff]  ;;  %1658 = vmatpush.msra.mxu2 %v572_v58  ;;  %1677 = vmatpush.msra.mxu3 %v606_v63 }
  0xa8   : > { %v570_v2 = vld [vmem:[%s3566_s14 + $0xa50] sm:$0xff]  ;;  %v604_v3 = vld [vmem:[%s3566_s14 + $0xb60] sm:$0xff]  ;;  %1619 = vmatpush.msra.mxu0 %v506_v0  ;;  %1638 = vmatpush.msra.mxu1 %v540_v1 }
  0xa9   : > { %v504_v4 = vld [vmem:[%s3566_s14 + $0x840] sm:$0xff]  ;;  %v538_v5 = vld [vmem:[%s3566_s14 + $0x950] sm:$0xff]  ;;  %1659 = vmatpush.msra.mxu2 %v570_v2  ;;  %1678 = vmatpush.msra.mxu3 %v604_v3 }
  0xaa   : > { %v568_v6 = vld [vmem:[%s3566_s14 + $0xa40] sm:$0xff]  ;;  %v602_v7 = vld [vmem:[%s3566_s14 + $0xb50] sm:$0xff]  ;;  %1620 = vmatpush.msra.mxu0 %v504_v4  ;;  %1639 = vmatpush.msra.mxu1 %v538_v5 }
  0xab   : > { %v502_v8 = vld [vmem:[%s3566_s14 + $0x830] sm:$0xff]  ;;  %v536_v9 = vld [vmem:[%s3566_s14 + $0x940] sm:$0xff]  ;;  %1660 = vmatpush.msra.mxu2 %v568_v6  ;;  %1679 = vmatpush.msra.mxu3 %v602_v7 }
  0xac   : > { %v566_v10 = vld [vmem:[%s3566_s14 + $0xa30] sm:$0xff]  ;;  %v600_v11 = vld [vmem:[%s3566_s14 + $0xb40] sm:$0xff]  ;;  %1621 = vmatpush.msra.mxu0 %v502_v8  ;;  %1640 = vmatpush.msra.mxu1 %v536_v9 }
  0xad   : > { %v500_v12 = vld [vmem:[%s3566_s14 + $0x820] sm:$0xff]  ;;  %v534_v13 = vld [vmem:[%s3566_s14 + $0x930] sm:$0xff]  ;;  %1661 = vmatpush.msra.mxu2 %v566_v10  ;;  %1680 = vmatpush.msra.mxu3 %v600_v11 }
  0xae   : > { %v564_v14 = vld [vmem:[%s3566_s14 + $0xa20] sm:$0xff]  ;;  %v598_v15 = vld [vmem:[%s3566_s14 + $0xb30] sm:$0xff]  ;;  %1622 = vmatpush.msra.mxu0 %v500_v12  ;;  %1641 = vmatpush.msra.mxu1 %v534_v13 }
  0xaf   : > { %v498_v16 = vld [vmem:[%s3566_s14 + $0x810] sm:$0xff]  ;;  %v532_v17 = vld [vmem:[%s3566_s14 + $0x920] sm:$0xff]  ;;  %1662 = vmatpush.msra.mxu2 %v564_v14  ;;  %1681 = vmatpush.msra.mxu3 %v598_v15 }
  0xb0   : > { %v562_v18 = vld [vmem:[%s3566_s14 + $0xa10] sm:$0xff]  ;;  %v596_v19 = vld [vmem:[%s3566_s14 + $0xb20] sm:$0xff]  ;;  %1623 = vmatpush.msra.mxu0 %v498_v16  ;;  %1642 = vmatpush.msra.mxu1 %v532_v17 }
  0xb1   : > { %v496_v20 = vld [vmem:[%s3566_s14 + $0x800] sm:$0xff]  ;;  %v530_v21 = vld [vmem:[%s3566_s14 + $0x910] sm:$0xff]  ;;  %1663 = vmatpush.msra.mxu2 %v562_v18  ;;  %1682 = vmatpush.msra.mxu3 %v596_v19 }
  0xb2   : > { %v560_v22 = vld [vmem:[%s3566_s14 + $0xa00] sm:$0xff]  ;;  %v594_v23 = vld [vmem:[%s3566_s14 + $0xb10] sm:$0xff]  ;;  %1624 = vmatpush.msra.mxu0 %v496_v20  ;;  %1643 = vmatpush.msra.mxu1 %v530_v21 }
  0xb3   : > { %v654_v24 = vld [vmem:[%s3566_s14 + $0xcf0] sm:$0xff]  ;;  %1664 = vmatpush.msra.mxu2 %v560_v22  ;;  %1683 = vmatpush.msra.mxu3 %v594_v23  ;;  %v528_v29 = vld [vmem:[%s3566_s14 + $0x900] sm:$0xff] }
  0xb4   : > { %v718_v28 = vld [vmem:[%s3566_s14 + $0xef0] sm:$0xff]  ;;  %v592_v31 = vld [vmem:[%s3566_s14 + $0xb00] sm:$0xff]  ;;  %1625 = vmatmul.f32.vlgmr.msra.gmra.mxu0 %v3743_v25  ;;  %1665 = vmatmul.f32.vlgmr.msra.gmra.mxu2 %v3746_v26 }
  0xb5   : > { %v652_v32 = vld [vmem:[%s3566_s14 + $0xce0] sm:$0xff]  ;;  %1689 = vmatpush.msrb.mxu0 %v654_v24  ;;  %1729 = vmatpush.msrb.mxu2 %v718_v28  ;;  %v686_v33 = vld [vmem:[%s3566_s14 + $0xdf0] sm:$0xff] }
  0xb6   : > { %v716_v34 = vld [vmem:[%s3566_s14 + $0xee0] sm:$0xff]  ;;  %v750_v35 = vld [vmem:[%s3566_s14 + $0xff0] sm:$0xff]  ;;  %1644 = vmatpush.msra.mxu1 %v528_v29  ;;  %1684 = vmatpush.msra.mxu3 %v592_v31 }
  0xb7   : > { %v650_v36 = vld [vmem:[%s3566_s14 + $0xcd0] sm:$0xff]  ;;  %v684_v37 = vld [vmem:[%s3566_s14 + $0xde0] sm:$0xff]  ;;  %1645 = vmatmul.f32.vlgmr.msra.gmra.mxu1 %v3748_v27  ;;  %1685 = vmatmul.f32.vlgmr.msra.gmra.mxu3 %v3752_v30 }
  0xb8   : > { %v714_v38 = vld [vmem:[%s3566_s14 + $0xed0] sm:$0xff]  ;;  %v748_v39 = vld [vmem:[%s3566_s14 + $0xfe0] sm:$0xff]  ;;  %1690 = vmatpush.msrb.mxu0 %v652_v32  ;;  %1709 = vmatpush.msrb.mxu1 %v686_v33 }
  0xb9   : > { %v648_v40 = vld [vmem:[%s3566_s14 + $0xcc0] sm:$0xff]  ;;  %v3823_v41 = vld.sshfl [vmem:[#allocation1 + $0x20] sm:$0xff pattern:$0x73625140]  ;;  %1730 = vmatpush.msrb.mxu2 %v716_v34  ;;  %1749 = vmatpush.msrb.mxu3 %v750_v35 }
  0xba   : > { %v3825_v42 = vld.sshfl [vmem:[#allocation1 + $0x30] sm:$0xff pattern:$0x73625140]  ;;  %v3827_v47 = vld.sshfl [vmem:[#allocation1 + $0x28] sm:$0xff pattern:$0x73625140]  ;;  %1691 = vmatpush.msrb.mxu0 %v650_v36  ;;  %1710 = vmatpush.msrb.mxu1 %v684_v37 }
  0xbb   : > { %v682_v48 = vld [vmem:[%s3566_s14 + $0xdd0] sm:$0xff]  ;;  %v236_v49 = vld [vmem:[%s3559_s7 + $0x28] sm:$0xff]  ;;  %1731 = vmatpush.msrb.mxu2 %v714_v38  ;;  %1750 = vmatpush.msrb.mxu3 %v748_v39 }
  0xbc   : > { %v3831_v50 = vld.sshfl [vmem:[#allocation1 + $0x38] sm:$0xff pattern:$0x73625140]  ;;  %v746_v52 = vld [vmem:[%s3566_s14 + $0xfd0] sm:$0xff]  ;;  %1692 = vmatpush.msrb.mxu0 %v648_v40  ;;  %1711 = vmatpush.msrb.mxu1 %v682_v48 }
  0xbd   : > { %v712_v51 = vld [vmem:[%s3566_s14 + $0xec0] sm:$0xff]  ;;  %1391 = vst [vmem:[#allocation1 + $0x20] ss:$4 sm:$0xff] %v236_v49  ;;  %v646_v53 = vld [vmem:[%s3566_s14 + $0xcb0] sm:$0xff]  ;;  %1751 = vmatpush.msrb.mxu3 %v746_v52 }
  0xbe   : > { %v680_v54 = vld [vmem:[%s3566_s14 + $0xdc0] sm:$0xff]  ;;  %v710_v55 = vld [vmem:[%s3566_s14 + $0xeb0] sm:$0xff]  ;;  %1732 = vmatpush.msrb.mxu2 %v712_v51  ;;  %1693 = vmatpush.msrb.mxu0 %v646_v53 }
  0xbf   : > { %v744_v56 = vld [vmem:[%s3566_s14 + $0xfc0] sm:$0xff]  ;;  %v678_v58 = vld [vmem:[%s3566_s14 + $0xdb0] sm:$0xff]  ;;  %1712 = vmatpush.msrb.mxu1 %v680_v54 }
  0xc0   : > { %v644_v57 = vld [vmem:[%s3566_s14 + $0xca0] sm:$0xff]  ;;  %v742_v0 = vld [vmem:[%s3566_s14 + $0xfb0] sm:$0xff]  ;;  %1733 = vmatpush.msrb.mxu2 %v710_v55  ;;  %1752 = vmatpush.msrb.mxu3 %v744_v56 }
  0xc1   : > { %v708_v63 = vld [vmem:[%s3566_s14 + $0xea0] sm:$0xff]  ;;  %v642_v1 = vld [vmem:[%s3566_s14 + $0xc90] sm:$0xff]  ;;  %1694 = vmatpush.msrb.mxu0 %v644_v57  ;;  %1713 = vmatpush.msrb.mxu1 %v678_v58 }
  0xc2   : > { %v676_v2 = vld [vmem:[%s3566_s14 + $0xda0] sm:$0xff]  ;;  %v706_v3 = vld [vmem:[%s3566_s14 + $0xe90] sm:$0xff]  ;;  %1734 = vmatpush.msrb.mxu2 %v708_v63  ;;  %1753 = vmatpush.msrb.mxu3 %v742_v0 }
  0xc3   : > { %v740_v4 = vld [vmem:[%s3566_s14 + $0xfa0] sm:$0xff]  ;;  %v674_v6 = vld [vmem:[%s3566_s14 + $0xd90] sm:$0xff]  ;;  %1695 = vmatpush.msrb.mxu0 %v642_v1  ;;  %1714 = vmatpush.msrb.mxu1 %v676_v2 }
  0xc4   : > { %v640_v5 = vld [vmem:[%s3566_s14 + $0xc80] sm:$0xff]  ;;  %v738_v8 = vld [vmem:[%s3566_s14 + $0xf90] sm:$0xff]  ;;  %1735 = vmatpush.msrb.mxu2 %v706_v3  ;;  %1754 = vmatpush.msrb.mxu3 %v740_v4 }
  0xc5   : > { %v704_v7 = vld [vmem:[%s3566_s14 + $0xe80] sm:$0xff]  ;;  %v638_v9 = vld [vmem:[%s3566_s14 + $0xc70] sm:$0xff]  ;;  %1696 = vmatpush.msrb.mxu0 %v640_v5  ;;  %1715 = vmatpush.msrb.mxu1 %v674_v6 }
  0xc6   : > { %v672_v10 = vld [vmem:[%s3566_s14 + $0xd80] sm:$0xff]  ;;  %v702_v11 = vld [vmem:[%s3566_s14 + $0xe70] sm:$0xff]  ;;  %1736 = vmatpush.msrb.mxu2 %v704_v7  ;;  %1755 = vmatpush.msrb.mxu3 %v738_v8 }
  0xc7   : > { %v736_v12 = vld [vmem:[%s3566_s14 + $0xf80] sm:$0xff]  ;;  %v670_v14 = vld [vmem:[%s3566_s14 + $0xd70] sm:$0xff]  ;;  %1697 = vmatpush.msrb.mxu0 %v638_v9  ;;  %1716 = vmatpush.msrb.mxu1 %v672_v10 }
  0xc8   : > { %v636_v13 = vld [vmem:[%s3566_s14 + $0xc60] sm:$0xff]  ;;  %v734_v16 = vld [vmem:[%s3566_s14 + $0xf70] sm:$0xff]  ;;  %1737 = vmatpush.msrb.mxu2 %v702_v11  ;;  %1756 = vmatpush.msrb.mxu3 %v736_v12 }
  0xc9   : > { %v700_v15 = vld [vmem:[%s3566_s14 + $0xe60] sm:$0xff]  ;;  %v634_v17 = vld [vmem:[%s3566_s14 + $0xc50] sm:$0xff]  ;;  %1698 = vmatpush.msrb.mxu0 %v636_v13  ;;  %1717 = vmatpush.msrb.mxu1 %v670_v14 }
  0xca   : > { %v668_v18 = vld [vmem:[%s3566_s14 + $0xd60] sm:$0xff]  ;;  %v698_v19 = vld [vmem:[%s3566_s14 + $0xe50] sm:$0xff]  ;;  %1738 = vmatpush.msrb.mxu2 %v700_v15  ;;  %1757 = vmatpush.msrb.mxu3 %v734_v16 }
  0xcb   : > { %v732_v20 = vld [vmem:[%s3566_s14 + $0xf60] sm:$0xff]  ;;  %v666_v22 = vld [vmem:[%s3566_s14 + $0xd50] sm:$0xff]  ;;  %1699 = vmatpush.msrb.mxu0 %v634_v17  ;;  %1718 = vmatpush.msrb.mxu1 %v668_v18 }
  0xcc   : > { %v632_v21 = vld [vmem:[%s3566_s14 + $0xc40] sm:$0xff]  ;;  %v730_v24 = vld [vmem:[%s3566_s14 + $0xf50] sm:$0xff]  ;;  %1739 = vmatpush.msrb.mxu2 %v698_v19  ;;  %1758 = vmatpush.msrb.mxu3 %v732_v20 }
  0xcd   : > { %v696_v23 = vld [vmem:[%s3566_s14 + $0xe40] sm:$0xff]  ;;  %v630_v28 = vld [vmem:[%s3566_s14 + $0xc30] sm:$0xff]  ;;  %1700 = vmatpush.msrb.mxu0 %v632_v21  ;;  %1719 = vmatpush.msrb.mxu1 %v666_v22 }
  0xce   : > { %v664_v29 = vld [vmem:[%s3566_s14 + $0xd40] sm:$0xff]  ;;  %v694_v31 = vld [vmem:[%s3566_s14 + $0xe30] sm:$0xff]  ;;  %1740 = vmatpush.msrb.mxu2 %v696_v23  ;;  %1759 = vmatpush.msrb.mxu3 %v730_v24 }
  0xcf   : > { %v728_v32 = vld [vmem:[%s3566_s14 + $0xf40] sm:$0xff]  ;;  %v662_v34 = vld [vmem:[%s3566_s14 + $0xd30] sm:$0xff]  ;;  %1701 = vmatpush.msrb.mxu0 %v630_v28  ;;  %1720 = vmatpush.msrb.mxu1 %v664_v29 }
  0xd0   : > { %v628_v33 = vld [vmem:[%s3566_s14 + $0xc20] sm:$0xff]  ;;  %v726_v36 = vld [vmem:[%s3566_s14 + $0xf30] sm:$0xff]  ;;  %1741 = vmatpush.msrb.mxu2 %v694_v31  ;;  %1760 = vmatpush.msrb.mxu3 %v728_v32 }
  0xd1   : > { %v692_v35 = vld [vmem:[%s3566_s14 + $0xe20] sm:$0xff]  ;;  %v626_v37 = vld [vmem:[%s3566_s14 + $0xc10] sm:$0xff]  ;;  %1702 = vmatpush.msrb.mxu0 %v628_v33  ;;  %1721 = vmatpush.msrb.mxu1 %v662_v34 }
  0xd2   : > { %v660_v38 = vld [vmem:[%s3566_s14 + $0xd20] sm:$0xff]  ;;  %v690_v39 = vld [vmem:[%s3566_s14 + $0xe10] sm:$0xff]  ;;  %1742 = vmatpush.msrb.mxu2 %v692_v35  ;;  %1761 = vmatpush.msrb.mxu3 %v726_v36 }
  0xd3   : > { %v724_v40 = vld [vmem:[%s3566_s14 + $0xf20] sm:$0xff]  ;;  %v658_v49 = vld [vmem:[%s3566_s14 + $0xd10] sm:$0xff]  ;;  %1703 = vmatpush.msrb.mxu0 %v626_v37  ;;  %1722 = vmatpush.msrb.mxu1 %v660_v38 }
  0xd4   : > { %v624_v48 = vld [vmem:[%s3566_s14 + $0xc00] sm:$0xff]  ;;  %v722_v52 = vld [vmem:[%s3566_s14 + $0xf10] sm:$0xff]  ;;  %1743 = vmatpush.msrb.mxu2 %v690_v39  ;;  %1762 = vmatpush.msrb.mxu3 %v724_v40 }
  0xd5   : > { %v688_v51 = vld [vmem:[%s3566_s14 + $0xe00] sm:$0xff]  ;;  %1704 = vmatpush.msrb.mxu0 %v624_v48  ;;  %1723 = vmatpush.msrb.mxu1 %v658_v49  ;;  %v782_v53 = vld [vmem:[%s3566_s14 + $0x10f0] sm:$0xff] }
  0xd6   : > { %v846_v54 = vld [vmem:[%s3566_s14 + $0x12f0] sm:$0xff]  ;;  %1744 = vmatpush.msrb.mxu2 %v688_v51  ;;  %1763 = vmatpush.msrb.mxu3 %v722_v52  ;;  %v656_v55 = vld [vmem:[%s3566_s14 + $0xd00] sm:$0xff] }
  0xd7   : > { %v720_v56 = vld [vmem:[%s3566_s14 + $0xf00] sm:$0xff]  ;;  %1705 = vmatmul.f32.vlgmr.msrb.gmra.mxu0 %v3823_v41  ;;  %1745 = vmatmul.f32.vlgmr.msrb.gmra.mxu2 %v3825_v42  ;;  %v814_v58 = vld [vmem:[%s3566_s14 + $0x11f0] sm:$0xff] }
  0xd8   : > { %1769 = vmatpush.msra.mxu0 %v782_v53  ;;  %1809 = vmatpush.msra.mxu2 %v846_v54  ;;  %v780_v57 = vld [vmem:[%s3566_s14 + $0x10e0] sm:$0xff]  ;;  %v878_v0 = vld [vmem:[%s3566_s14 + $0x13f0] sm:$0xff] }
  0xd9   : > { %1724 = vmatpush.msrb.mxu1 %v656_v55  ;;  %1764 = vmatpush.msrb.mxu3 %v720_v56  ;;  %v844_v63 = vld [vmem:[%s3566_s14 + $0x12e0] sm:$0xff]  ;;  %v778_v1 = vld [vmem:[%s3566_s14 + $0x10d0] sm:$0xff] }
  0xda   : > { %1725 = vmatmul.f32.vlgmr.msrb.gmra.mxu1 %v3827_v47  ;;  %1765 = vmatmul.f32.vlgmr.msrb.gmra.mxu3 %v3831_v50  ;;  %v812_v2 = vld [vmem:[%s3566_s14 + $0x11e0] sm:$0xff]  ;;  %v842_v3 = vld [vmem:[%s3566_s14 + $0x12d0] sm:$0xff] }
  0xdb   : > { %1770 = vmatpush.msra.mxu0 %v780_v57  ;;  %1789 = vmatpush.msra.mxu1 %v814_v58  ;;  %v876_v4 = vld [vmem:[%s3566_s14 + $0x13e0] sm:$0xff]  ;;  %v810_v6 = vld [vmem:[%s3566_s14 + $0x11d0] sm:$0xff] }
  0xdc   : > { %1810 = vmatpush.msra.mxu2 %v844_v63  ;;  %1829 = vmatpush.msra.mxu3 %v878_v0  ;;  %v776_v5 = vld [vmem:[%s3566_s14 + $0x10c0] sm:$0xff]  ;;  %v874_v8 = vld [vmem:[%s3566_s14 + $0x13d0] sm:$0xff] }
  0xdd   : > { %1771 = vmatpush.msra.mxu0 %v778_v1  ;;  %1790 = vmatpush.msra.mxu1 %v812_v2  ;;  %v840_v7 = vld [vmem:[%s3566_s14 + $0x12c0] sm:$0xff]  ;;  %v774_v9 = vld [vmem:[%s3566_s14 + $0x10b0] sm:$0xff] }
  0xde   : > { %1811 = vmatpush.msra.mxu2 %v842_v3  ;;  %1830 = vmatpush.msra.mxu3 %v876_v4  ;;  %v808_v10 = vld [vmem:[%s3566_s14 + $0x11c0] sm:$0xff]  ;;  %v838_v11 = vld [vmem:[%s3566_s14 + $0x12b0] sm:$0xff] }
  0xdf   : > { %1772 = vmatpush.msra.mxu0 %v776_v5  ;;  %1791 = vmatpush.msra.mxu1 %v810_v6  ;;  %v872_v12 = vld [vmem:[%s3566_s14 + $0x13c0] sm:$0xff]  ;;  %v806_v14 = vld [vmem:[%s3566_s14 + $0x11b0] sm:$0xff] }
  0xe0   : > { %1812 = vmatpush.msra.mxu2 %v840_v7  ;;  %1831 = vmatpush.msra.mxu3 %v874_v8  ;;  %v772_v13 = vld [vmem:[%s3566_s14 + $0x10a0] sm:$0xff]  ;;  %v870_v16 = vld [vmem:[%s3566_s14 + $0x13b0] sm:$0xff] }
  0xe1   : > { %1773 = vmatpush.msra.mxu0 %v774_v9  ;;  %1792 = vmatpush.msra.mxu1 %v808_v10  ;;  %v836_v15 = vld [vmem:[%s3566_s14 + $0x12a0] sm:$0xff]  ;;  %v770_v17 = vld [vmem:[%s3566_s14 + $0x1090] sm:$0xff] }
  0xe2   : > { %1813 = vmatpush.msra.mxu2 %v838_v11  ;;  %1832 = vmatpush.msra.mxu3 %v872_v12  ;;  %v804_v18 = vld [vmem:[%s3566_s14 + $0x11a0] sm:$0xff]  ;;  %v834_v19 = vld [vmem:[%s3566_s14 + $0x1290] sm:$0xff] }
  0xe3   : > { %1774 = vmatpush.msra.mxu0 %v772_v13  ;;  %1793 = vmatpush.msra.mxu1 %v806_v14  ;;  %v868_v20 = vld [vmem:[%s3566_s14 + $0x13a0] sm:$0xff]  ;;  %v802_v22 = vld [vmem:[%s3566_s14 + $0x1190] sm:$0xff] }
  0xe4   : > { %1814 = vmatpush.msra.mxu2 %v836_v15  ;;  %1833 = vmatpush.msra.mxu3 %v870_v16  ;;  %v768_v21 = vld [vmem:[%s3566_s14 + $0x1080] sm:$0xff]  ;;  %v866_v24 = vld [vmem:[%s3566_s14 + $0x1390] sm:$0xff] }
  0xe5   : > { %1775 = vmatpush.msra.mxu0 %v770_v17  ;;  %1794 = vmatpush.msra.mxu1 %v804_v18  ;;  %v832_v23 = vld [vmem:[%s3566_s14 + $0x1280] sm:$0xff]  ;;  %v766_v28 = vld [vmem:[%s3566_s14 + $0x1070] sm:$0xff] }
  0xe6   : > { %1815 = vmatpush.msra.mxu2 %v834_v19  ;;  %1834 = vmatpush.msra.mxu3 %v868_v20  ;;  %v800_v29 = vld [vmem:[%s3566_s14 + $0x1180] sm:$0xff]  ;;  %v830_v31 = vld [vmem:[%s3566_s14 + $0x1270] sm:$0xff] }
  0xe7   : > { %1776 = vmatpush.msra.mxu0 %v768_v21  ;;  %1795 = vmatpush.msra.mxu1 %v802_v22  ;;  %v864_v32 = vld [vmem:[%s3566_s14 + $0x1380] sm:$0xff]  ;;  %v798_v34 = vld [vmem:[%s3566_s14 + $0x1170] sm:$0xff] }
  0xe8   : > { %1816 = vmatpush.msra.mxu2 %v832_v23  ;;  %1835 = vmatpush.msra.mxu3 %v866_v24  ;;  %v764_v33 = vld [vmem:[%s3566_s14 + $0x1060] sm:$0xff]  ;;  %v862_v36 = vld [vmem:[%s3566_s14 + $0x1370] sm:$0xff] }
  0xe9   : > { %1777 = vmatpush.msra.mxu0 %v766_v28  ;;  %1796 = vmatpush.msra.mxu1 %v800_v29  ;;  %v828_v35 = vld [vmem:[%s3566_s14 + $0x1260] sm:$0xff]  ;;  %v762_v37 = vld [vmem:[%s3566_s14 + $0x1050] sm:$0xff] }
  0xea   : > { %1817 = vmatpush.msra.mxu2 %v830_v31  ;;  %1836 = vmatpush.msra.mxu3 %v864_v32  ;;  %v796_v38 = vld [vmem:[%s3566_s14 + $0x1160] sm:$0xff]  ;;  %v826_v39 = vld [vmem:[%s3566_s14 + $0x1250] sm:$0xff] }
  0xeb   : > { %1778 = vmatpush.msra.mxu0 %v764_v33  ;;  %1797 = vmatpush.msra.mxu1 %v798_v34  ;;  %v860_v40 = vld [vmem:[%s3566_s14 + $0x1360] sm:$0xff]  ;;  %v794_v49 = vld [vmem:[%s3566_s14 + $0x1150] sm:$0xff] }
  0xec   : > { %1818 = vmatpush.msra.mxu2 %v828_v35  ;;  %1837 = vmatpush.msra.mxu3 %v862_v36  ;;  %v760_v48 = vld [vmem:[%s3566_s14 + $0x1040] sm:$0xff]  ;;  %v858_v52 = vld [vmem:[%s3566_s14 + $0x1350] sm:$0xff] }
  0xed   : > { %1779 = vmatpush.msra.mxu0 %v762_v37  ;;  %1798 = vmatpush.msra.mxu1 %v796_v38  ;;  %v824_v51 = vld [vmem:[%s3566_s14 + $0x1240] sm:$0xff]  ;;  %v758_v53 = vld [vmem:[%s3566_s14 + $0x1030] sm:$0xff] }
  0xee   : > { %1819 = vmatpush.msra.mxu2 %v826_v39  ;;  %1838 = vmatpush.msra.mxu3 %v860_v40  ;;  %v792_v54 = vld [vmem:[%s3566_s14 + $0x1140] sm:$0xff]  ;;  %v822_v55 = vld [vmem:[%s3566_s14 + $0x1230] sm:$0xff] }
  0xef   : > { %1780 = vmatpush.msra.mxu0 %v760_v48  ;;  %1799 = vmatpush.msra.mxu1 %v794_v49  ;;  %v856_v56 = vld [vmem:[%s3566_s14 + $0x1340] sm:$0xff]  ;;  %v790_v58 = vld [vmem:[%s3566_s14 + $0x1130] sm:$0xff] }
  0xf0   : > { %1820 = vmatpush.msra.mxu2 %v824_v51  ;;  %1839 = vmatpush.msra.mxu3 %v858_v52  ;;  %v756_v57 = vld [vmem:[%s3566_s14 + $0x1020] sm:$0xff]  ;;  %v854_v0 = vld [vmem:[%s3566_s14 + $0x1330] sm:$0xff] }
  0xf1   : > { %1781 = vmatpush.msra.mxu0 %v758_v53  ;;  %1800 = vmatpush.msra.mxu1 %v792_v54  ;;  %v820_v63 = vld [vmem:[%s3566_s14 + $0x1220] sm:$0xff]  ;;  %v754_v1 = vld [vmem:[%s3566_s14 + $0x1010] sm:$0xff] }
  0xf2   : > { %1821 = vmatpush.msra.mxu2 %v822_v55  ;;  %1840 = vmatpush.msra.mxu3 %v856_v56  ;;  %v788_v2 = vld [vmem:[%s3566_s14 + $0x1120] sm:$0xff]  ;;  %v818_v3 = vld [vmem:[%s3566_s14 + $0x1210] sm:$0xff] }
  0xf3   : > { %1782 = vmatpush.msra.mxu0 %v756_v57  ;;  %1801 = vmatpush.msra.mxu1 %v790_v58  ;;  %v852_v4 = vld [vmem:[%s3566_s14 + $0x1320] sm:$0xff]  ;;  %v786_v6 = vld [vmem:[%s3566_s14 + $0x1110] sm:$0xff] }
  0xf4   : > { %1822 = vmatpush.msra.mxu2 %v820_v63  ;;  %1841 = vmatpush.msra.mxu3 %v854_v0  ;;  %v752_v5 = vld [vmem:[%s3566_s14 + $0x1000] sm:$0xff]  ;;  %v850_v8 = vld [vmem:[%s3566_s14 + $0x1310] sm:$0xff] }
  0xf5   : > { %1783 = vmatpush.msra.mxu0 %v754_v1  ;;  %1802 = vmatpush.msra.mxu1 %v788_v2  ;;  %v816_v7 = vld [vmem:[%s3566_s14 + $0x1200] sm:$0xff]  ;;  %v3951_v9 = vld.sshfl [vmem:[#allocation1] sm:$0xff pattern:$0x73625140] }
  0xf6   : > { %1823 = vmatpush.msra.mxu2 %v818_v3  ;;  %1842 = vmatpush.msra.mxu3 %v852_v4  ;;  %v3953_v10 = vld.sshfl [vmem:[#allocation1 + $0x10] sm:$0xff pattern:$0x73625140]  ;;  %v910_v11 = vld [vmem:[%s3566_s14 + $0x14f0] sm:$0xff] }
  0xf7   : > { %1784 = vmatpush.msra.mxu0 %v752_v5  ;;  %1803 = vmatpush.msra.mxu1 %v786_v6  ;;  %v974_v12 = vld [vmem:[%s3566_s14 + $0x16f0] sm:$0xff]  ;;  %v784_v13 = vld [vmem:[%s3566_s14 + $0x1100] sm:$0xff] }
  0xf8   : > { %1824 = vmatpush.msra.mxu2 %v816_v7  ;;  %1843 = vmatpush.msra.mxu3 %v850_v8  ;;  %v848_v14 = vld [vmem:[%s3566_s14 + $0x1300] sm:$0xff]  ;;  %v3961_v15 = vld.sshfl [vmem:[#allocation1 + $0x8] sm:$0xff pattern:$0x73625140] }
  0xf9   : > { %1785 = vmatmul.f32.vlgmr.msra.gmra.mxu0 %v3951_v9  ;;  %1825 = vmatmul.f32.vlgmr.msra.gmra.mxu2 %v3953_v10  ;;  %v3963_v16 = vld.sshfl [vmem:[#allocation1 + $0x18] sm:$0xff pattern:$0x73625140]  ;;  %v942_v18 = vld [vmem:[%s3566_s14 + $0x15f0] sm:$0xff] }
  0xfa   : > { %1849 = vmatpush.msrb.mxu0 %v910_v11  ;;  %1889 = vmatpush.msrb.mxu2 %v974_v12  ;;  %v908_v17 = vld [vmem:[%s3566_s14 + $0x14e0] sm:$0xff]  ;;  %v1006_v20 = vld [vmem:[%s3566_s14 + $0x17f0] sm:$0xff] }
  0xfb   : > { %1804 = vmatpush.msra.mxu1 %v784_v13  ;;  %1844 = vmatpush.msra.mxu3 %v848_v14  ;;  %v972_v19 = vld [vmem:[%s3566_s14 + $0x16e0] sm:$0xff]  ;;  %v906_v21 = vld [vmem:[%s3566_s14 + $0x14d0] sm:$0xff] }
  0xfc   : > { %1805 = vmatmul.f32.vlgmr.msra.gmra.mxu1 %v3961_v15  ;;  %1845 = vmatmul.f32.vlgmr.msra.gmra.mxu3 %v3963_v16  ;;  %v940_v22 = vld [vmem:[%s3566_s14 + $0x15e0] sm:$0xff]  ;;  %v970_v23 = vld [vmem:[%s3566_s14 + $0x16d0] sm:$0xff] }
  0xfd   : > { %1850 = vmatpush.msrb.mxu0 %v908_v17  ;;  %1869 = vmatpush.msrb.mxu1 %v942_v18  ;;  %v1004_v24 = vld [vmem:[%s3566_s14 + $0x17e0] sm:$0xff]  ;;  %v938_v29 = vld [vmem:[%s3566_s14 + $0x15d0] sm:$0xff] }
  0xfe   : > { %1890 = vmatpush.msrb.mxu2 %v972_v19  ;;  %1909 = vmatpush.msrb.mxu3 %v1006_v20  ;;  %v904_v28 = vld [vmem:[%s3566_s14 + $0x14c0] sm:$0xff]  ;;  %v1002_v32 = vld [vmem:[%s3566_s14 + $0x17d0] sm:$0xff] }
  0xff   : > { %1851 = vmatpush.msrb.mxu0 %v906_v21  ;;  %1870 = vmatpush.msrb.mxu1 %v940_v22  ;;  %v968_v31 = vld [vmem:[%s3566_s14 + $0x16c0] sm:$0xff]  ;;  %v902_v33 = vld [vmem:[%s3566_s14 + $0x14b0] sm:$0xff] }
 0x100   : > { %1891 = vmatpush.msrb.mxu2 %v970_v23  ;;  %1910 = vmatpush.msrb.mxu3 %v1004_v24  ;;  %v936_v34 = vld [vmem:[%s3566_s14 + $0x15c0] sm:$0xff]  ;;  %v966_v35 = vld [vmem:[%s3566_s14 + $0x16b0] sm:$0xff]  ;;  %v1466_v7 = vpop.f32.mrf.mxu0 }
 0x101   : > { %1852 = vmatpush.msrb.mxu0 %v904_v28  ;;  %1871 = vmatpush.msrb.mxu1 %v938_v29  ;;  %v1000_v36 = vld [vmem:[%s3566_s14 + $0x17c0] sm:$0xff]  ;;  %v934_v38 = vld [vmem:[%s3566_s14 + $0x15b0] sm:$0xff] }
 0x102   : > { %1892 = vmatpush.msrb.mxu2 %v968_v31  ;;  %1911 = vmatpush.msrb.mxu3 %v1002_v32  ;;  %v900_v37 = vld [vmem:[%s3566_s14 + $0x14a0] sm:$0xff]  ;;  %v998_v40 = vld [vmem:[%s3566_s14 + $0x17b0] sm:$0xff] }
 0x103   : > { %1853 = vmatpush.msrb.mxu0 %v902_v33  ;;  %1872 = vmatpush.msrb.mxu1 %v936_v34  ;;  %v964_v39 = vld [vmem:[%s3566_s14 + $0x16a0] sm:$0xff]  ;;  %v898_v48 = vld [vmem:[%s3566_s14 + $0x1490] sm:$0xff] }
 0x104   : > { %1893 = vmatpush.msrb.mxu2 %v966_v35  ;;  %1912 = vmatpush.msrb.mxu3 %v1000_v36  ;;  %v932_v49 = vld [vmem:[%s3566_s14 + $0x15a0] sm:$0xff]  ;;  %v962_v51 = vld [vmem:[%s3566_s14 + $0x1690] sm:$0xff] }
 0x105   : > { %1854 = vmatpush.msrb.mxu0 %v900_v37  ;;  %1873 = vmatpush.msrb.mxu1 %v934_v38  ;;  %v996_v52 = vld [vmem:[%s3566_s14 + $0x17a0] sm:$0xff]  ;;  %v930_v54 = vld [vmem:[%s3566_s14 + $0x1590] sm:$0xff] }
 0x106   : > { %1894 = vmatpush.msrb.mxu2 %v964_v39  ;;  %1913 = vmatpush.msrb.mxu3 %v998_v40  ;;  %v896_v53 = vld [vmem:[%s3566_s14 + $0x1480] sm:$0xff]  ;;  %v994_v56 = vld [vmem:[%s3566_s14 + $0x1790] sm:$0xff]  ;;  %v1486_v18 = vpop.f32.mrf.mxu1  ;;  %v1506_v22 = vpop.f32.mrf.mxu2 }
 0x107   : > { %1855 = vmatpush.msrb.mxu0 %v898_v48  ;;  %1874 = vmatpush.msrb.mxu1 %v932_v49  ;;  %v960_v55 = vld [vmem:[%s3566_s14 + $0x1680] sm:$0xff]  ;;  %v894_v57 = vld [vmem:[%s3566_s14 + $0x1470] sm:$0xff]  ;;  %v1487_v21 = vadd.f32 %v1486_v18, %v1466_v7 }
 0x108   : > { %1895 = vmatpush.msrb.mxu2 %v962_v51  ;;  %1914 = vmatpush.msrb.mxu3 %v996_v52  ;;  %v928_v58 = vld [vmem:[%s3566_s14 + $0x1580] sm:$0xff]  ;;  %v958_v63 = vld [vmem:[%s3566_s14 + $0x1670] sm:$0xff] }
 0x109   : > { %1856 = vmatpush.msrb.mxu0 %v896_v53  ;;  %1875 = vmatpush.msrb.mxu1 %v930_v54  ;;  %v992_v0 = vld [vmem:[%s3566_s14 + $0x1780] sm:$0xff]  ;;  %v926_v2 = vld [vmem:[%s3566_s14 + $0x1570] sm:$0xff]  ;;  %v1507_v31 = vadd.f32 %v1506_v22, %v1487_v21 }
 0x10a   : > { %1896 = vmatpush.msrb.mxu2 %v960_v55  ;;  %1915 = vmatpush.msrb.mxu3 %v994_v56  ;;  %v892_v1 = vld [vmem:[%s3566_s14 + $0x1460] sm:$0xff]  ;;  %v990_v4 = vld [vmem:[%s3566_s14 + $0x1770] sm:$0xff] }
 0x10b   : > { %1857 = vmatpush.msrb.mxu0 %v894_v57  ;;  %1876 = vmatpush.msrb.mxu1 %v928_v58  ;;  %v956_v3 = vld [vmem:[%s3566_s14 + $0x1660] sm:$0xff]  ;;  %v890_v5 = vld [vmem:[%s3566_s14 + $0x1450] sm:$0xff] }
 0x10c   : > { %1897 = vmatpush.msrb.mxu2 %v958_v63  ;;  %1916 = vmatpush.msrb.mxu3 %v992_v0  ;;  %v924_v6 = vld [vmem:[%s3566_s14 + $0x1560] sm:$0xff]  ;;  %v954_v8 = vld [vmem:[%s3566_s14 + $0x1650] sm:$0xff]  ;;  %v1526_v34 = vpop.f32.mrf.mxu3 }
 0x10d   : > { %1858 = vmatpush.msrb.mxu0 %v892_v1  ;;  %1877 = vmatpush.msrb.mxu1 %v926_v2  ;;  %v988_v11 = vld [vmem:[%s3566_s14 + $0x1760] sm:$0xff]  ;;  %v922_v13 = vld [vmem:[%s3566_s14 + $0x1550] sm:$0xff]  ;;  %v1527_v37 = vadd.f32 %v1526_v34, %v1507_v31 }
 0x10e   : > { %1898 = vmatpush.msrb.mxu2 %v956_v3  ;;  %1917 = vmatpush.msrb.mxu3 %v990_v4  ;;  %v888_v12 = vld [vmem:[%s3566_s14 + $0x1440] sm:$0xff]  ;;  %v986_v17 = vld [vmem:[%s3566_s14 + $0x1750] sm:$0xff] }
 0x10f   : > { %1859 = vmatpush.msrb.mxu0 %v890_v5  ;;  %1878 = vmatpush.msrb.mxu1 %v924_v6  ;;  %v952_v14 = vld [vmem:[%s3566_s14 + $0x1640] sm:$0xff]  ;;  %v886_v19 = vld [vmem:[%s3566_s14 + $0x1430] sm:$0xff] }
 0x110   : > { %1899 = vmatpush.msrb.mxu2 %v954_v8  ;;  %1918 = vmatpush.msrb.mxu3 %v988_v11  ;;  %v920_v20 = vld [vmem:[%s3566_s14 + $0x1540] sm:$0xff]  ;;  %v950_v23 = vld [vmem:[%s3566_s14 + $0x1630] sm:$0xff] }
 0x111   : > { %1860 = vmatpush.msrb.mxu0 %v888_v12  ;;  %1879 = vmatpush.msrb.mxu1 %v922_v13  ;;  %v984_v24 = vld [vmem:[%s3566_s14 + $0x1740] sm:$0xff]  ;;  %v918_v29 = vld [vmem:[%s3566_s14 + $0x1530] sm:$0xff] }
 0x112   : > { %1900 = vmatpush.msrb.mxu2 %v952_v14  ;;  %1919 = vmatpush.msrb.mxu3 %v986_v17  ;;  %v884_v28 = vld [vmem:[%s3566_s14 + $0x1420] sm:$0xff]  ;;  %v982_v33 = vld [vmem:[%s3566_s14 + $0x1730] sm:$0xff] }
 0x113   : > { %1861 = vmatpush.msrb.mxu0 %v886_v19  ;;  %1880 = vmatpush.msrb.mxu1 %v920_v20  ;;  %v948_v32 = vld [vmem:[%s3566_s14 + $0x1620] sm:$0xff]  ;;  %v882_v35 = vld [vmem:[%s3566_s14 + $0x1410] sm:$0xff] }
 0x114   : > { %1901 = vmatpush.msrb.mxu2 %v950_v23  ;;  %1920 = vmatpush.msrb.mxu3 %v984_v24  ;;  %v916_v36 = vld [vmem:[%s3566_s14 + $0x1520] sm:$0xff]  ;;  %v946_v39 = vld [vmem:[%s3566_s14 + $0x1610] sm:$0xff] }
 0x115   : > { %v237_v38 = vld [vmem:[%s3559_s7 + $0x30] sm:$0xff]  ;;  %1862 = vmatpush.msrb.mxu0 %v884_v28  ;;  %1881 = vmatpush.msrb.mxu1 %v918_v29  ;;  %v1546_v51 = vpop.f32.mrf.mxu0  ;;  %v4030_v56 = vld.sshfl [vmem:[#allocation1 + $0x30] sm:$0xff pattern:$0x73625140] }
 0x116   : > { %v980_v40 = vld [vmem:[%s3566_s14 + $0x1720] sm:$0xff]  ;;  %1400 = vst [vmem:[#allocation1] ss:$4 sm:$0xff] %v237_v38  ;;  %1902 = vmatpush.msrb.mxu2 %v948_v32  ;;  %1921 = vmatpush.msrb.mxu3 %v982_v33  ;;  %v914_v49 = vld [vmem:[%s3566_s14 + $0x1510] sm:$0xff]  ;;  %v1547_v54 = vadd.f32 %v1546_v51, %v1527_v37 }
 0x117   : > { %v880_v48 = vld [vmem:[%s3566_s14 + $0x1400] sm:$0xff]  ;;  %1863 = vmatpush.msrb.mxu0 %v882_v35  ;;  %1882 = vmatpush.msrb.mxu1 %v916_v36  ;;  %v978_v53 = vld [vmem:[%s3566_s14 + $0x1710] sm:$0xff] }
 0x118   : > { %v944_v52 = vld [vmem:[%s3566_s14 + $0x1600] sm:$0xff]  ;;  %1903 = vmatpush.msrb.mxu2 %v946_v39  ;;  %1922 = vmatpush.msrb.mxu3 %v980_v40  ;;  %v4028_v55 = vld.sshfl [vmem:[#allocation1 + $0x20] sm:$0xff pattern:$0x73625140]  ;;  %v1566_v63 = vpop.f32.mrf.mxu1 }
 0x119   : > { %1864 = vmatpush.msrb.mxu0 %v880_v48  ;;  %1883 = vmatpush.msrb.mxu1 %v914_v49  ;;  %v1038_v57 = vld [vmem:[%s3566_s14 + $0x18f0] sm:$0xff]  ;;  %v912_v0 = vld [vmem:[%s3566_s14 + $0x1500] sm:$0xff]  ;;  %v1567_v2 = vadd.f32 %v1566_v63, %v1547_v54  ;;  %v1586_v3 = vpop.f32.mrf.mxu2 }
 0x11a   : > { %v1102_v58 = vld [vmem:[%s3566_s14 + $0x1af0] sm:$0xff]  ;;  %1904 = vmatpush.msrb.mxu2 %v944_v52  ;;  %1923 = vmatpush.msrb.mxu3 %v978_v53  ;;  %v976_v1 = vld [vmem:[%s3566_s14 + $0x1700] sm:$0xff] }
 0x11b   : > { %1865 = vmatmul.f32.vlgmr.msrb.gmra.mxu0 %v4028_v55  ;;  %1905 = vmatmul.f32.vlgmr.msrb.gmra.mxu2 %v4030_v56  ;;  %v4038_v4 = vld.sshfl [vmem:[#allocation1 + $0x28] sm:$0xff pattern:$0x73625140]  ;;  %v4040_v5 = vld.sshfl [vmem:[#allocation1 + $0x38] sm:$0xff pattern:$0x73625140]  ;;  %v1587_v8 = vadd.f32 %v1586_v3, %v1567_v2 }
 0x11c   : > { %1929 = vmatpush.msra.mxu0 %v1038_v57  ;;  %1969 = vmatpush.msra.mxu2 %v1102_v58  ;;  %v1036_v6 = vld [vmem:[%s3566_s14 + $0x18e0] sm:$0xff]  ;;  %v1070_v7 = vld [vmem:[%s3566_s14 + $0x19f0] sm:$0xff]  ;;  %v1606_v13 = vpop.f32.mrf.mxu3 }
 0x11d   : > { %1884 = vmatpush.msrb.mxu1 %v912_v0  ;;  %1924 = vmatpush.msrb.mxu3 %v976_v1  ;;  %v1100_v11 = vld [vmem:[%s3566_s14 + $0x1ae0] sm:$0xff]  ;;  %v1134_v12 = vld [vmem:[%s3566_s14 + $0x1bf0] sm:$0xff]  ;;  %v4050_v18 = vadd.f32 %v1606_v13, %v1587_v8 }
 0x11e   : > { %1885 = vmatmul.f32.vlgmr.msrb.gmra.mxu1 %v4038_v4  ;;  %1925 = vmatmul.f32.vlgmr.msrb.gmra.mxu3 %v4040_v5  ;;  %v1034_v14 = vld [vmem:[%s3566_s14 + $0x18d0] sm:$0xff]  ;;  %v1068_v17 = vld [vmem:[%s3566_s14 + $0x19e0] sm:$0xff] }
 0x11f   : > { %1930 = vmatpush.msra.mxu0 %v1036_v6  ;;  %1949 = vmatpush.msra.mxu1 %v1070_v7  ;;  %v1098_v19 = vld [vmem:[%s3566_s14 + $0x1ad0] sm:$0xff]  ;;  %v1132_v20 = vld [vmem:[%s3566_s14 + $0x1be0] sm:$0xff] }
 0x120   : > { %1970 = vmatpush.msra.mxu2 %v1100_v11  ;;  %1989 = vmatpush.msra.mxu3 %v1134_v12  ;;  %v1032_v21 = vld [vmem:[%s3566_s14 + $0x18c0] sm:$0xff]  ;;  %v1066_v22 = vld [vmem:[%s3566_s14 + $0x19d0] sm:$0xff] }
 0x121   : > { %1931 = vmatpush.msra.mxu0 %v1034_v14  ;;  %1950 = vmatpush.msra.mxu1 %v1068_v17  ;;  %v1096_v23 = vld [vmem:[%s3566_s14 + $0x1ac0] sm:$0xff]  ;;  %v1130_v24 = vld [vmem:[%s3566_s14 + $0x1bd0] sm:$0xff] }
 0x122   : > { %1971 = vmatpush.msra.mxu2 %v1098_v19  ;;  %1990 = vmatpush.msra.mxu3 %v1132_v20  ;;  %v1030_v28 = vld [vmem:[%s3566_s14 + $0x18b0] sm:$0xff]  ;;  %v1064_v29 = vld [vmem:[%s3566_s14 + $0x19c0] sm:$0xff] }
 0x123   : > { %1932 = vmatpush.msra.mxu0 %v1032_v21  ;;  %1951 = vmatpush.msra.mxu1 %v1066_v22  ;;  %v1094_v31 = vld [vmem:[%s3566_s14 + $0x1ab0] sm:$0xff]  ;;  %v1128_v32 = vld [vmem:[%s3566_s14 + $0x1bc0] sm:$0xff] }
 0x124   : > { %1972 = vmatpush.msra.mxu2 %v1096_v23  ;;  %1991 = vmatpush.msra.mxu3 %v1130_v24  ;;  %v1028_v33 = vld [vmem:[%s3566_s14 + $0x18a0] sm:$0xff]  ;;  %v1062_v34 = vld [vmem:[%s3566_s14 + $0x19b0] sm:$0xff] }
 0x125   : > { %1933 = vmatpush.msra.mxu0 %v1030_v28  ;;  %1952 = vmatpush.msra.mxu1 %v1064_v29  ;;  %v1092_v35 = vld [vmem:[%s3566_s14 + $0x1aa0] sm:$0xff]  ;;  %v1126_v36 = vld [vmem:[%s3566_s14 + $0x1bb0] sm:$0xff] }
 0x126   : > { %1973 = vmatpush.msra.mxu2 %v1094_v31  ;;  %1992 = vmatpush.msra.mxu3 %v1128_v32  ;;  %v1026_v37 = vld [vmem:[%s3566_s14 + $0x1890] sm:$0xff]  ;;  %v1060_v38 = vld [vmem:[%s3566_s14 + $0x19a0] sm:$0xff] }
 0x127   : > { %1934 = vmatpush.msra.mxu0 %v1028_v33  ;;  %1953 = vmatpush.msra.mxu1 %v1062_v34  ;;  %v1090_v39 = vld [vmem:[%s3566_s14 + $0x1a90] sm:$0xff]  ;;  %v1124_v40 = vld [vmem:[%s3566_s14 + $0x1ba0] sm:$0xff] }
 0x128   : > { %1974 = vmatpush.msra.mxu2 %v1092_v35  ;;  %1993 = vmatpush.msra.mxu3 %v1126_v36  ;;  %v1024_v48 = vld [vmem:[%s3566_s14 + $0x1880] sm:$0xff]  ;;  %v1058_v49 = vld [vmem:[%s3566_s14 + $0x1990] sm:$0xff] }
 0x129   : > { %1935 = vmatpush.msra.mxu0 %v1026_v37  ;;  %1954 = vmatpush.msra.mxu1 %v1060_v38  ;;  %v1088_v51 = vld [vmem:[%s3566_s14 + $0x1a80] sm:$0xff]  ;;  %v1122_v52 = vld [vmem:[%s3566_s14 + $0x1b90] sm:$0xff] }
 0x12a   : > { %1975 = vmatpush.msra.mxu2 %v1090_v39  ;;  %1994 = vmatpush.msra.mxu3 %v1124_v40  ;;  %v1022_v53 = vld [vmem:[%s3566_s14 + $0x1870] sm:$0xff]  ;;  %v1056_v54 = vld [vmem:[%s3566_s14 + $0x1980] sm:$0xff] }
 0x12b   : > { %1936 = vmatpush.msra.mxu0 %v1024_v48  ;;  %1955 = vmatpush.msra.mxu1 %v1058_v49  ;;  %v1086_v57 = vld [vmem:[%s3566_s14 + $0x1a70] sm:$0xff]  ;;  %v1120_v58 = vld [vmem:[%s3566_s14 + $0x1b80] sm:$0xff] }
 0x12c   : > { %1976 = vmatpush.msra.mxu2 %v1088_v51  ;;  %1995 = vmatpush.msra.mxu3 %v1122_v52  ;;  %v1020_v63 = vld [vmem:[%s3566_s14 + $0x1860] sm:$0xff]  ;;  %v1054_v0 = vld [vmem:[%s3566_s14 + $0x1970] sm:$0xff] }
 0x12d   : > { %1937 = vmatpush.msra.mxu0 %v1022_v53  ;;  %1956 = vmatpush.msra.mxu1 %v1056_v54  ;;  %v1084_v1 = vld [vmem:[%s3566_s14 + $0x1a60] sm:$0xff]  ;;  %v1118_v2 = vld [vmem:[%s3566_s14 + $0x1b70] sm:$0xff] }
 0x12e   : > { %1977 = vmatpush.msra.mxu2 %v1086_v57  ;;  %1996 = vmatpush.msra.mxu3 %v1120_v58  ;;  %v1018_v3 = vld [vmem:[%s3566_s14 + $0x1850] sm:$0xff]  ;;  %v1052_v6 = vld [vmem:[%s3566_s14 + $0x1960] sm:$0xff] }
 0x12f   : > { %1938 = vmatpush.msra.mxu0 %v1020_v63  ;;  %1957 = vmatpush.msra.mxu1 %v1054_v0  ;;  %v1082_v7 = vld [vmem:[%s3566_s14 + $0x1a50] sm:$0xff]  ;;  %v1116_v8 = vld [vmem:[%s3566_s14 + $0x1b60] sm:$0xff] }
 0x130   : > { %1978 = vmatpush.msra.mxu2 %v1084_v1  ;;  %1997 = vmatpush.msra.mxu3 %v1118_v2  ;;  %v1016_v11 = vld [vmem:[%s3566_s14 + $0x1840] sm:$0xff]  ;;  %v1050_v12 = vld [vmem:[%s3566_s14 + $0x1950] sm:$0xff] }
 0x131   : > { %1939 = vmatpush.msra.mxu0 %v1018_v3  ;;  %1958 = vmatpush.msra.mxu1 %v1052_v6  ;;  %v1080_v13 = vld [vmem:[%s3566_s14 + $0x1a40] sm:$0xff]  ;;  %v1114_v14 = vld [vmem:[%s3566_s14 + $0x1b50] sm:$0xff]  ;;  %v1626_v20 = vpop.f32.mrf.mxu0 }
 0x132   : > { %1979 = vmatpush.msra.mxu2 %v1082_v7  ;;  %1998 = vmatpush.msra.mxu3 %v1116_v8  ;;  %v1014_v17 = vld [vmem:[%s3566_s14 + $0x1830] sm:$0xff]  ;;  %v1048_v19 = vld [vmem:[%s3566_s14 + $0x1940] sm:$0xff]  ;;  %v1627_v23 = vadd.f32 %v1626_v20, %v4050_v18 }
 0x133   : > { %1940 = vmatpush.msra.mxu0 %v1016_v11  ;;  %1959 = vmatpush.msra.mxu1 %v1050_v12  ;;  %v1078_v21 = vld [vmem:[%s3566_s14 + $0x1a30] sm:$0xff]  ;;  %v1112_v22 = vld [vmem:[%s3566_s14 + $0x1b40] sm:$0xff] }
 0x134   : > { %1980 = vmatpush.msra.mxu2 %v1080_v13  ;;  %1999 = vmatpush.msra.mxu3 %v1114_v14  ;;  %v1012_v24 = vld [vmem:[%s3566_s14 + $0x1820] sm:$0xff]  ;;  %v1046_v28 = vld [vmem:[%s3566_s14 + $0x1930] sm:$0xff]  ;;  %v1646_v32 = vpop.f32.mrf.mxu1 }
 0x135   : > { %1941 = vmatpush.msra.mxu0 %v1014_v17  ;;  %1960 = vmatpush.msra.mxu1 %v1048_v19  ;;  %v1076_v29 = vld [vmem:[%s3566_s14 + $0x1a20] sm:$0xff]  ;;  %v1110_v31 = vld [vmem:[%s3566_s14 + $0x1b30] sm:$0xff]  ;;  %v1647_v18 = vadd.f32 %v1646_v32, %v1627_v23 }
 0x136   : > { %1981 = vmatpush.msra.mxu2 %v1078_v21  ;;  %2000 = vmatpush.msra.mxu3 %v1112_v22  ;;  %v1010_v33 = vld [vmem:[%s3566_s14 + $0x1810] sm:$0xff]  ;;  %v1044_v34 = vld [vmem:[%s3566_s14 + $0x1920] sm:$0xff] }
 0x137   : > { %v238_v35 = vld [vmem:[%s3559_s7 + $0x38] sm:$0xff]  ;;  %1942 = vmatpush.msra.mxu0 %v1012_v24  ;;  %1961 = vmatpush.msra.mxu1 %v1046_v28  ;;  %v1108_v37 = vld [vmem:[%s3566_s14 + $0x1b20] sm:$0xff]  ;;  %v1666_v40 = vpop.f32.mrf.mxu2 }
 0x138   : > { %v1074_v36 = vld [vmem:[%s3566_s14 + $0x1a10] sm:$0xff]  ;;  %1401 = vst [vmem:[#allocation1 + $0x20] ss:$4 sm:$0xff] %v238_v35  ;;  %1982 = vmatpush.msra.mxu2 %v1076_v29  ;;  %2001 = vmatpush.msra.mxu3 %v1110_v31  ;;  %v1008_v38 = vld [vmem:[%s3566_s14 + $0x1800] sm:$0xff]  ;;  %v1667_v51 = vadd.f32 %v1666_v40, %v1647_v18 }
 0x139   : > { %v1042_v39 = vld [vmem:[%s3566_s14 + $0x1910] sm:$0xff]  ;;  %1943 = vmatpush.msra.mxu0 %v1010_v33  ;;  %1962 = vmatpush.msra.mxu1 %v1044_v34  ;;  %v1072_v48 = vld [vmem:[%s3566_s14 + $0x1a00] sm:$0xff] }
 0x13a   : > { %v1106_v49 = vld [vmem:[%s3566_s14 + $0x1b10] sm:$0xff]  ;;  %1983 = vmatpush.msra.mxu2 %v1074_v36  ;;  %2002 = vmatpush.msra.mxu3 %v1108_v37  ;;  %v4110_v53 = vld.sshfl [vmem:[#allocation1 + $0x10] sm:$0xff pattern:$0x73625140]  ;;  %v1686_v58 = vpop.f32.mrf.mxu3 }
 0x13b   : > { %v4108_v52 = vld.sshfl [vmem:[#allocation1] sm:$0xff pattern:$0x73625140]  ;;  %1944 = vmatpush.msra.mxu0 %v1008_v38  ;;  %1963 = vmatpush.msra.mxu1 %v1042_v39  ;;  %v1040_v63 = vld [vmem:[%s3566_s14 + $0x1900] sm:$0xff]  ;;  %v4116_v1 = vadd.f32 %v1686_v58, %v1667_v51 }
 0x13c   : > { %v1166_v54 = vld [vmem:[%s3566_s14 + $0x1cf0] sm:$0xff]  ;;  %1984 = vmatpush.msra.mxu2 %v1072_v48  ;;  %2003 = vmatpush.msra.mxu3 %v1106_v49  ;;  %v1104_v0 = vld [vmem:[%s3566_s14 + $0x1b00] sm:$0xff] }
 0x13d   : > { %v1230_v57 = vld [vmem:[%s3566_s14 + $0x1ef0] sm:$0xff]  ;;  %1945 = vmatmul.f32.vlgmr.msra.gmra.mxu0 %v4108_v52  ;;  %1985 = vmatmul.f32.vlgmr.msra.gmra.mxu2 %v4110_v53  ;;  %v4122_v3 = vld.sshfl [vmem:[#allocation1 + $0x18] sm:$0xff pattern:$0x73625140] }
 0x13e   : > { %v4120_v2 = vld.sshfl [vmem:[#allocation1 + $0x8] sm:$0xff pattern:$0x73625140]  ;;  %2009 = vmatpush.msrb.mxu0 %v1166_v54  ;;  %2049 = vmatpush.msrb.mxu2 %v1230_v57  ;;  %v1164_v6 = vld [vmem:[%s3566_s14 + $0x1ce0] sm:$0xff] }
 0x13f   : > { %v1198_v7 = vld [vmem:[%s3566_s14 + $0x1df0] sm:$0xff]  ;;  %1964 = vmatpush.msra.mxu1 %v1040_v63  ;;  %2004 = vmatpush.msra.mxu3 %v1104_v0  ;;  %v1228_v8 = vld [vmem:[%s3566_s14 + $0x1ee0] sm:$0xff] }
 0x140   : > { %v1262_v11 = vld [vmem:[%s3566_s14 + $0x1ff0] sm:$0xff]  ;;  %1965 = vmatmul.f32.vlgmr.msra.gmra.mxu1 %v4120_v2  ;;  %2005 = vmatmul.f32.vlgmr.msra.gmra.mxu3 %v4122_v3  ;;  %v1196_v13 = vld [vmem:[%s3566_s14 + $0x1de0] sm:$0xff] }
 0x141   : > { %v1162_v12 = vld [vmem:[%s3566_s14 + $0x1cd0] sm:$0xff]  ;;  %2010 = vmatpush.msrb.mxu0 %v1164_v6  ;;  %2029 = vmatpush.msrb.mxu1 %v1198_v7  ;;  %v1260_v17 = vld [vmem:[%s3566_s14 + $0x1fe0] sm:$0xff] }
 0x142   : > { %v1226_v14 = vld [vmem:[%s3566_s14 + $0x1ed0] sm:$0xff]  ;;  %2050 = vmatpush.msrb.mxu2 %v1228_v8  ;;  %2069 = vmatpush.msrb.mxu3 %v1262_v11  ;;  %v1160_v19 = vld [vmem:[%s3566_s14 + $0x1cc0] sm:$0xff] }
 0x143   : > { %v1194_v20 = vld [vmem:[%s3566_s14 + $0x1dd0] sm:$0xff]  ;;  %2011 = vmatpush.msrb.mxu0 %v1162_v12  ;;  %2030 = vmatpush.msrb.mxu1 %v1196_v13  ;;  %v1224_v21 = vld [vmem:[%s3566_s14 + $0x1ec0] sm:$0xff] }
 0x144   : > { %v1258_v22 = vld [vmem:[%s3566_s14 + $0x1fd0] sm:$0xff]  ;;  %2051 = vmatpush.msrb.mxu2 %v1226_v14  ;;  %2070 = vmatpush.msrb.mxu3 %v1260_v17  ;;  %v1192_v24 = vld [vmem:[%s3566_s14 + $0x1dc0] sm:$0xff] }
 0x145   : > { %v1158_v23 = vld [vmem:[%s3566_s14 + $0x1cb0] sm:$0xff]  ;;  %2012 = vmatpush.msrb.mxu0 %v1160_v19  ;;  %2031 = vmatpush.msrb.mxu1 %v1194_v20  ;;  %v1256_v29 = vld [vmem:[%s3566_s14 + $0x1fc0] sm:$0xff] }
 0x146   : > { %v1222_v28 = vld [vmem:[%s3566_s14 + $0x1eb0] sm:$0xff]  ;;  %2052 = vmatpush.msrb.mxu2 %v1224_v21  ;;  %2071 = vmatpush.msrb.mxu3 %v1258_v22  ;;  %v1156_v31 = vld [vmem:[%s3566_s14 + $0x1ca0] sm:$0xff] }
 0x147   : > { %v1190_v32 = vld [vmem:[%s3566_s14 + $0x1db0] sm:$0xff]  ;;  %2013 = vmatpush.msrb.mxu0 %v1158_v23  ;;  %2032 = vmatpush.msrb.mxu1 %v1192_v24  ;;  %v1220_v33 = vld [vmem:[%s3566_s14 + $0x1ea0] sm:$0xff] }
 0x148   : > { %v1254_v34 = vld [vmem:[%s3566_s14 + $0x1fb0] sm:$0xff]  ;;  %2053 = vmatpush.msrb.mxu2 %v1222_v28  ;;  %2072 = vmatpush.msrb.mxu3 %v1256_v29  ;;  %v1188_v35 = vld [vmem:[%s3566_s14 + $0x1da0] sm:$0xff] }
 0x149   : > { %v1154_v18 = vld [vmem:[%s3566_s14 + $0x1c90] sm:$0xff]  ;;  %2014 = vmatpush.msrb.mxu0 %v1156_v31  ;;  %2033 = vmatpush.msrb.mxu1 %v1190_v32  ;;  %v1252_v37 = vld [vmem:[%s3566_s14 + $0x1fa0] sm:$0xff] }
 0x14a   : > { %v1218_v36 = vld [vmem:[%s3566_s14 + $0x1e90] sm:$0xff]  ;;  %2054 = vmatpush.msrb.mxu2 %v1220_v33  ;;  %2073 = vmatpush.msrb.mxu3 %v1254_v34  ;;  %v1152_v38 = vld [vmem:[%s3566_s14 + $0x1c80] sm:$0xff] }
 0x14b   : > { %v1186_v39 = vld [vmem:[%s3566_s14 + $0x1d90] sm:$0xff]  ;;  %2015 = vmatpush.msrb.mxu0 %v1154_v18  ;;  %2034 = vmatpush.msrb.mxu1 %v1188_v35  ;;  %v1216_v40 = vld [vmem:[%s3566_s14 + $0x1e80] sm:$0xff] }
 0x14c   : > { %v1250_v48 = vld [vmem:[%s3566_s14 + $0x1f90] sm:$0xff]  ;;  %2055 = vmatpush.msrb.mxu2 %v1218_v36  ;;  %2074 = vmatpush.msrb.mxu3 %v1252_v37  ;;  %v1184_v51 = vld [vmem:[%s3566_s14 + $0x1d80] sm:$0xff] }
 0x14d   : > { %v1150_v49 = vld [vmem:[%s3566_s14 + $0x1c70] sm:$0xff]  ;;  %2016 = vmatpush.msrb.mxu0 %v1152_v38  ;;  %2035 = vmatpush.msrb.mxu1 %v1186_v39  ;;  %v1248_v57 = vld [vmem:[%s3566_s14 + $0x1f80] sm:$0xff] }
 0x14e   : > { %v1214_v54 = vld [vmem:[%s3566_s14 + $0x1e70] sm:$0xff]  ;;  %2056 = vmatpush.msrb.mxu2 %v1216_v40  ;;  %2075 = vmatpush.msrb.mxu3 %v1250_v48  ;;  %v1148_v58 = vld [vmem:[%s3566_s14 + $0x1c60] sm:$0xff] }
 0x14f   : > { %v1182_v63 = vld [vmem:[%s3566_s14 + $0x1d70] sm:$0xff]  ;;  %2017 = vmatpush.msrb.mxu0 %v1150_v49  ;;  %2036 = vmatpush.msrb.mxu1 %v1184_v51  ;;  %v1212_v0 = vld [vmem:[%s3566_s14 + $0x1e60] sm:$0xff] }
 0x150   : > { %v1246_v6 = vld [vmem:[%s3566_s14 + $0x1f70] sm:$0xff]  ;;  %2057 = vmatpush.msrb.mxu2 %v1214_v54  ;;  %2076 = vmatpush.msrb.mxu3 %v1248_v57  ;;  %v1180_v8 = vld [vmem:[%s3566_s14 + $0x1d60] sm:$0xff] }
 0x151   : > { %v1146_v7 = vld [vmem:[%s3566_s14 + $0x1c50] sm:$0xff]  ;;  %2018 = vmatpush.msrb.mxu0 %v1148_v58  ;;  %2037 = vmatpush.msrb.mxu1 %v1182_v63  ;;  %v1244_v12 = vld [vmem:[%s3566_s14 + $0x1f60] sm:$0xff] }
 0x152   : > { %v1210_v11 = vld [vmem:[%s3566_s14 + $0x1e50] sm:$0xff]  ;;  %2058 = vmatpush.msrb.mxu2 %v1212_v0  ;;  %2077 = vmatpush.msrb.mxu3 %v1246_v6  ;;  %v1144_v13 = vld [vmem:[%s3566_s14 + $0x1c40] sm:$0xff] }
 0x153   : > { %v1178_v14 = vld [vmem:[%s3566_s14 + $0x1d50] sm:$0xff]  ;;  %2019 = vmatpush.msrb.mxu0 %v1146_v7  ;;  %2038 = vmatpush.msrb.mxu1 %v1180_v8  ;;  %v1208_v17 = vld [vmem:[%s3566_s14 + $0x1e40] sm:$0xff] }
 0x154   : > { %v1242_v19 = vld [vmem:[%s3566_s14 + $0x1f50] sm:$0xff]  ;;  %2059 = vmatpush.msrb.mxu2 %v1210_v11  ;;  %2078 = vmatpush.msrb.mxu3 %v1244_v12  ;;  %v1176_v21 = vld [vmem:[%s3566_s14 + $0x1d40] sm:$0xff]  ;;  %v1706_v22 = vpop.f32.mrf.mxu0 }
 0x155   : > { %v1142_v20 = vld [vmem:[%s3566_s14 + $0x1c30] sm:$0xff]  ;;  %2020 = vmatpush.msrb.mxu0 %v1144_v13  ;;  %2039 = vmatpush.msrb.mxu1 %v1178_v14  ;;  %v1240_v24 = vld [vmem:[%s3566_s14 + $0x1f40] sm:$0xff]  ;;  %v1707_v28 = vadd.f32 %v1706_v22, %v4116_v1 }
 0x156   : > { %v1206_v23 = vld [vmem:[%s3566_s14 + $0x1e30] sm:$0xff]  ;;  %2060 = vmatpush.msrb.mxu2 %v1208_v17  ;;  %2079 = vmatpush.msrb.mxu3 %v1242_v19  ;;  %v1140_v29 = vld [vmem:[%s3566_s14 + $0x1c20] sm:$0xff] }
 0x157   : > { %v1174_v31 = vld [vmem:[%s3566_s14 + $0x1d30] sm:$0xff]  ;;  %2021 = vmatpush.msrb.mxu0 %v1142_v20  ;;  %2040 = vmatpush.msrb.mxu1 %v1176_v21  ;;  %v1204_v32 = vld [vmem:[%s3566_s14 + $0x1e20] sm:$0xff]  ;;  %v1726_v34 = vpop.f32.mrf.mxu1  ;;  %v271_v20 = vld [vmem:[%s3566_s14 + $0xf8] sm:$0xff] }
 0x158   : > { %v1238_v33 = vld [vmem:[%s3566_s14 + $0x1f30] sm:$0xff]  ;;  %2061 = vmatpush.msrb.mxu2 %v1206_v23  ;;  %2080 = vmatpush.msrb.mxu3 %v1240_v24  ;;  %v1172_v35 = vld [vmem:[%s3566_s14 + $0x1d20] sm:$0xff]  ;;  %v1727_v1 = vadd.f32 %v1726_v34, %v1707_v28  ;;  %v269_v24 = vld [vmem:[%s3566_s14 + $0xe8] sm:$0xff] }
 0x159   : > { %v1138_v18 = vld [vmem:[%s3566_s14 + $0x1c10] sm:$0xff]  ;;  %2022 = vmatpush.msrb.mxu0 %v1140_v29  ;;  %2041 = vmatpush.msrb.mxu1 %v1174_v31  ;;  %v1236_v38 = vld [vmem:[%s3566_s14 + $0x1f20] sm:$0xff] }
 0x15a   : > { %v239_v36 = vld [vmem:[%s3559_s7 + $0x40] sm:$0x3f]  ;;  %2062 = vmatpush.msrb.mxu2 %v1204_v32  ;;  %2081 = vmatpush.msrb.mxu3 %v1238_v33  ;;  %v1136_v39 = vld [vmem:[%s3566_s14 + $0x1c00] sm:$0xff]  ;;  %v1746_v48 = vpop.f32.mrf.mxu2  ;;  %v1406_v57 = vld.sshfl [vmem:[#allocation1 + $0x20] sm:$0xff pattern:$0x73625140] }
 0x15b   : > { %v1202_v37 = vld [vmem:[%s3566_s14 + $0x1e10] sm:$0xff]  ;;  %1410 = vst [vmem:[#allocation1] ss:$4 sm:$0xff] %v239_v36  ;;  %2023 = vmatpush.msrb.mxu0 %v1138_v18  ;;  %2042 = vmatpush.msrb.mxu1 %v1172_v35  ;;  %v1200_v49 = vld [vmem:[%s3566_s14 + $0x1e00] sm:$0xff]  ;;  %v1747_v54 = vadd.f32 %v1746_v48, %v1727_v1  ;;  %v267_v32 = vld [vmem:[%s3566_s14 + $0xd8] sm:$0xff] }
 0x15c   : > { %v1170_v40 = vld [vmem:[%s3566_s14 + $0x1d10] sm:$0xff]  ;;  %2063 = vmatpush.msrb.mxu2 %v1202_v37  ;;  %2082 = vmatpush.msrb.mxu3 %v1236_v38  ;;  %v1408_v58 = vld.sshfl [vmem:[#allocation1 + $0x30] sm:$0xff pattern:$0x73625140]  ;;  %v265_v35 = vld [vmem:[%s3566_s14 + $0xc8] sm:$0xff] }
 0x15d   : > { %v1234_v51 = vld [vmem:[%s3566_s14 + $0x1f10] sm:$0xff]  ;;  %2024 = vmatpush.msrb.mxu0 %v1136_v39  ;;  %2043 = vmatpush.msrb.mxu1 %v1170_v40  ;;  %v1766_v6 = vpop.f32.mrf.mxu3  ;;  %v1168_v7 = vld [vmem:[%s3566_s14 + $0x1d00] sm:$0xff]  ;;  %v263_v38 = vld [vmem:[%s3566_s14 + $0xb8] sm:$0xff] }
 0x15e   : > { %v1294_v63 = vld [vmem:[%s3566_s14 + $0x20f0] sm:$0xff]  ;;  %2064 = vmatpush.msrb.mxu2 %v1200_v49  ;;  %2083 = vmatpush.msrb.mxu3 %v1234_v51  ;;  %v1232_v8 = vld [vmem:[%s3566_s14 + $0x1f00] sm:$0xff]  ;;  %v4192_v11 = vadd.f32 %v1766_v6, %v1747_v54  ;;  %v261_v49 = vld [vmem:[%s3566_s14 + $0xa8] sm:$0xff] }
 0x15f   : > { %v1358_v0 = vld [vmem:[%s3566_s14 + $0x22f0] sm:$0xff]  ;;  %2025 = vmatmul.f32.vlgmr.msrb.gmra.mxu0 %v1406_v57  ;;  %2065 = vmatmul.f32.vlgmr.msrb.gmra.mxu2 %v1408_v58  ;;  %v1409_v13 = vld.sshfl [vmem:[#allocation1 + $0x38] sm:$0xff pattern:$0x73625140]  ;;  %v259_v58 = vld [vmem:[%s3566_s14 + $0x98] sm:$0xff] }
 0x160   : > { %v1407_v12 = vld.sshfl [vmem:[#allocation1 + $0x28] sm:$0xff pattern:$0x73625140]  ;;  %2089 = vmatpush.msra.mxu0 %v1294_v63  ;;  %2129 = vmatpush.msra.mxu2 %v1358_v0  ;;  %v1292_v14 = vld [vmem:[%s3566_s14 + $0x20e0] sm:$0xff] }
 0x161   : > { %v1326_v17 = vld [vmem:[%s3566_s14 + $0x21f0] sm:$0xff]  ;;  %2044 = vmatpush.msrb.mxu1 %v1168_v7  ;;  %2084 = vmatpush.msrb.mxu3 %v1232_v8  ;;  %v1356_v19 = vld [vmem:[%s3566_s14 + $0x22e0] sm:$0xff]  ;;  %v257_v7 = vld [vmem:[%s3566_s14 + $0x88] sm:$0xff] }
 0x162   : > { %2045 = vmatmul.f32.vlgmr.msrb.gmra.mxu1 %v1407_v12  ;;  %2085 = vmatmul.f32.vlgmr.msrb.gmra.mxu3 %v1409_v13  ;;  %v1290_v21 = vld [vmem:[%s3566_s14 + $0x20d0] sm:$0xff]  ;;  %v1324_v22 = vld [vmem:[%s3566_s14 + $0x21e0] sm:$0xff] }
 0x163   : > { %2090 = vmatpush.msra.mxu0 %v1292_v14  ;;  %2109 = vmatpush.msra.mxu1 %v1326_v17  ;;  %v1354_v23 = vld [vmem:[%s3566_s14 + $0x22d0] sm:$0xff]  ;;  %v1288_v28 = vld [vmem:[%s3566_s14 + $0x20c0] sm:$0xff]  ;;  %v255_v14 = vld [vmem:[%s3566_s14 + $0x78] sm:$0xff] }
 0x164   : > { %2130 = vmatpush.msra.mxu2 %v1356_v19  ;;  %2149 = vmatpush.msra.mxu3 %v271_v20  ;;  %v1322_v29 = vld [vmem:[%s3566_s14 + $0x21d0] sm:$0xff]  ;;  %v1352_v31 = vld [vmem:[%s3566_s14 + $0x22c0] sm:$0xff] }
 0x165   : > { %2091 = vmatpush.msra.mxu0 %v1290_v21  ;;  %2110 = vmatpush.msra.mxu1 %v1324_v22  ;;  %v1286_v33 = vld [vmem:[%s3566_s14 + $0x20b0] sm:$0xff]  ;;  %v1320_v34 = vld [vmem:[%s3566_s14 + $0x21c0] sm:$0xff]  ;;  %v253_v21 = vld [vmem:[%s3566_s14 + $0x68] sm:$0xff] }
 0x166   : > { %2131 = vmatpush.msra.mxu2 %v1354_v23  ;;  %2150 = vmatpush.msra.mxu3 %v269_v24  ;;  %v1350_v18 = vld [vmem:[%s3566_s14 + $0x22b0] sm:$0xff]  ;;  %v1284_v1 = vld [vmem:[%s3566_s14 + $0x20a0] sm:$0xff] }
 0x167   : > { %2092 = vmatpush.msra.mxu0 %v1288_v28  ;;  %2111 = vmatpush.msra.mxu1 %v1322_v29  ;;  %v1318_v36 = vld [vmem:[%s3566_s14 + $0x21b0] sm:$0xff]  ;;  %v1348_v37 = vld [vmem:[%s3566_s14 + $0x22a0] sm:$0xff]  ;;  %v251_v28 = vld [vmem:[%s3566_s14 + $0x58] sm:$0xff] }
 0x168   : > { %2132 = vmatpush.msra.mxu2 %v1352_v31  ;;  %2151 = vmatpush.msra.mxu3 %v267_v32  ;;  %v1282_v39 = vld [vmem:[%s3566_s14 + $0x2090] sm:$0xff]  ;;  %v1316_v40 = vld [vmem:[%s3566_s14 + $0x21a0] sm:$0xff] }
 0x169   : > { %2093 = vmatpush.msra.mxu0 %v1286_v33  ;;  %2112 = vmatpush.msra.mxu1 %v1320_v34  ;;  %v1346_v48 = vld [vmem:[%s3566_s14 + $0x2290] sm:$0xff]  ;;  %v1280_v51 = vld [vmem:[%s3566_s14 + $0x2080] sm:$0xff]  ;;  %v249_v34 = vld [vmem:[%s3566_s14 + $0x48] sm:$0xff] }
 0x16a   : > { %2133 = vmatpush.msra.mxu2 %v1350_v18  ;;  %2152 = vmatpush.msra.mxu3 %v265_v35  ;;  %v1314_v54 = vld [vmem:[%s3566_s14 + $0x2190] sm:$0xff]  ;;  %v1344_v57 = vld [vmem:[%s3566_s14 + $0x2280] sm:$0xff] }
 0x16b   : > { %2094 = vmatpush.msra.mxu0 %v1284_v1  ;;  %2113 = vmatpush.msra.mxu1 %v1318_v36  ;;  %v1278_v63 = vld [vmem:[%s3566_s14 + $0x2070] sm:$0xff]  ;;  %v1312_v0 = vld [vmem:[%s3566_s14 + $0x2180] sm:$0xff] }
 0x16c   : > { %2134 = vmatpush.msra.mxu2 %v1348_v37  ;;  %2153 = vmatpush.msra.mxu3 %v263_v38  ;;  %v1342_v6 = vld [vmem:[%s3566_s14 + $0x2270] sm:$0xff]  ;;  %v1276_v8 = vld [vmem:[%s3566_s14 + $0x2060] sm:$0xff]  ;;  %v247_v37 = vld [vmem:[%s3566_s14 + $0x38] sm:$0xff] }
 0x16d   : > { %2095 = vmatpush.msra.mxu0 %v1282_v39  ;;  %2114 = vmatpush.msra.mxu1 %v1316_v40  ;;  %v1310_v12 = vld [vmem:[%s3566_s14 + $0x2170] sm:$0xff]  ;;  %v1340_v13 = vld [vmem:[%s3566_s14 + $0x2260] sm:$0xff] }
 0x16e   : > { %2135 = vmatpush.msra.mxu2 %v1346_v48  ;;  %2154 = vmatpush.msra.mxu3 %v261_v49  ;;  %v1274_v17 = vld [vmem:[%s3566_s14 + $0x2050] sm:$0xff]  ;;  %v1308_v19 = vld [vmem:[%s3566_s14 + $0x2160] sm:$0xff]  ;;  %v245_v49 = vld [vmem:[%s3566_s14 + $0x28] sm:$0xff] }
 0x16f   : > { %2096 = vmatpush.msra.mxu0 %v1280_v51  ;;  %2115 = vmatpush.msra.mxu1 %v1314_v54  ;;  %v1338_v20 = vld [vmem:[%s3566_s14 + $0x2250] sm:$0xff]  ;;  %v1272_v22 = vld [vmem:[%s3566_s14 + $0x2040] sm:$0xff] }
 0x170   : > { %2136 = vmatpush.msra.mxu2 %v1344_v57  ;;  %2155 = vmatpush.msra.mxu3 %v259_v58  ;;  %v1306_v23 = vld [vmem:[%s3566_s14 + $0x2150] sm:$0xff]  ;;  %v1336_v24 = vld [vmem:[%s3566_s14 + $0x2240] sm:$0xff] }
 0x171   : > { %2097 = vmatpush.msra.mxu0 %v1278_v63  ;;  %2116 = vmatpush.msra.mxu1 %v1312_v0  ;;  %v1270_v29 = vld [vmem:[%s3566_s14 + $0x2030] sm:$0xff]  ;;  %v1304_v31 = vld [vmem:[%s3566_s14 + $0x2140] sm:$0xff]  ;;  %v243_v63 = vld [vmem:[%s3566_s14 + $0x18] sm:$0xff] }
 0x172   : > { %2137 = vmatpush.msra.mxu2 %v1342_v6  ;;  %2156 = vmatpush.msra.mxu3 %v257_v7  ;;  %v1334_v33 = vld [vmem:[%s3566_s14 + $0x2230] sm:$0xff]  ;;  %v1268_v35 = vld [vmem:[%s3566_s14 + $0x2020] sm:$0xff] }
 0x173   : > { %2098 = vmatpush.msra.mxu0 %v1276_v8  ;;  %2117 = vmatpush.msra.mxu1 %v1310_v12  ;;  %v1302_v1 = vld [vmem:[%s3566_s14 + $0x2130] sm:$0xff]  ;;  %v1332_v36 = vld [vmem:[%s3566_s14 + $0x2220] sm:$0xff]  ;;  %v303_v8 = vld [vmem:[%s3566_s14 + $0x1f8] sm:$0xff] }
 0x174   : > { %2138 = vmatpush.msra.mxu2 %v1340_v13  ;;  %2157 = vmatpush.msra.mxu3 %v255_v14  ;;  %v1266_v39 = vld [vmem:[%s3566_s14 + $0x2010] sm:$0xff]  ;;  %v1300_v40 = vld [vmem:[%s3566_s14 + $0x2120] sm:$0xff]  ;;  %v367_v12 = vld [vmem:[%s3566_s14 + $0x3f8] sm:$0xff] }
 0x175   : > { %2099 = vmatpush.msra.mxu0 %v1274_v17  ;;  %2118 = vmatpush.msra.mxu1 %v1308_v19  ;;  %v1330_v48 = vld [vmem:[%s3566_s14 + $0x2210] sm:$0xff]  ;;  %v1264_v51 = vld [vmem:[%s3566_s14 + $0x2000] sm:$0xff]  ;;  %v241_v17 = vld [vmem:[%s3566_s14 + $0x8] sm:$0xff] }
 0x176   : > { %2139 = vmatpush.msra.mxu2 %v1338_v20  ;;  %2158 = vmatpush.msra.mxu3 %v253_v21  ;;  %v1786_v32 = vpop.f32.mrf.mxu0  ;;  %v1298_v54 = vld [vmem:[%s3566_s14 + $0x2110] sm:$0xff]  ;;  %v1328_v58 = vld [vmem:[%s3566_s14 + $0x2200] sm:$0xff]  ;;  %v301_v21 = vld [vmem:[%s3566_s14 + $0x1e8] sm:$0xff] }
 0x177   : > { %2100 = vmatpush.msra.mxu0 %v1272_v22  ;;  %2119 = vmatpush.msra.mxu1 %v1306_v23  ;;  %v1787_v18 = vadd.f32 %v1786_v32, %v4192_v11  ;;  %v1411_v6 = vld.sshfl [vmem:[#allocation1] sm:$0xff pattern:$0x73625140]  ;;  %v1413_v7 = vld.sshfl [vmem:[#allocation1 + $0x10] sm:$0xff pattern:$0x73625140] }
 0x178   : > { %2140 = vmatpush.msra.mxu2 %v1336_v24  ;;  %2159 = vmatpush.msra.mxu3 %v251_v28  ;;  %v1296_v14 = vld [vmem:[%s3566_s14 + $0x2100] sm:$0xff]  ;;  %v1412_v20 = vld.sshfl [vmem:[#allocation1 + $0x8] sm:$0xff pattern:$0x73625140]  ;;  %v365_v23 = vld [vmem:[%s3566_s14 + $0x3e8] sm:$0xff] }
 0x179   : > { %2101 = vmatpush.msra.mxu0 %v1270_v29  ;;  %2120 = vmatpush.msra.mxu1 %v1304_v31  ;;  %v1806_v38 = vpop.f32.mrf.mxu1  ;;  %v335_v22 = vld [vmem:[%s3566_s14 + $0x2f8] sm:$0xff]  ;;  %v333_v29 = vld [vmem:[%s3566_s14 + $0x2e8] sm:$0xff] }
 0x17a   : > { %2141 = vmatpush.msra.mxu2 %v1334_v33  ;;  %2160 = vmatpush.msra.mxu3 %v249_v34  ;;  %v1807_v11 = vadd.f32 %v1806_v38, %v1787_v18  ;;  %v399_v24 = vld [vmem:[%s3566_s14 + $0x4f8] sm:$0xff]  ;;  %v397_v32 = vld [vmem:[%s3566_s14 + $0x4e8] sm:$0xff] }
 0x17b   : > { %2102 = vmatpush.msra.mxu0 %v1268_v35  ;;  %2121 = vmatpush.msra.mxu1 %v1302_v1  ;;  %v299_v28 = vld [vmem:[%s3566_s14 + $0x1d8] sm:$0xff]  ;;  %v297_v33 = vld [vmem:[%s3566_s14 + $0x1c8] sm:$0xff] }
 0x17c   : > { %2142 = vmatpush.msra.mxu2 %v1332_v36  ;;  %2161 = vmatpush.msra.mxu3 %v247_v37  ;;  %v1826_v57 = vpop.f32.mrf.mxu2  ;;  %v363_v31 = vld [vmem:[%s3566_s14 + $0x3d8] sm:$0xff]  ;;  %v361_v18 = vld [vmem:[%s3566_s14 + $0x3c8] sm:$0xff] }
 0x17d   : > { %2103 = vmatpush.msra.mxu0 %v1266_v39  ;;  %2122 = vmatpush.msra.mxu1 %v1300_v40  ;;  %v1827_v0 = vadd.f32 %v1826_v57, %v1807_v11  ;;  %v331_v34 = vld [vmem:[%s3566_s14 + $0x2d8] sm:$0xff]  ;;  %v329_v36 = vld [vmem:[%s3566_s14 + $0x2c8] sm:$0xff] }
 0x17e   : > { %2143 = vmatpush.msra.mxu2 %v1330_v48  ;;  %2162 = vmatpush.msra.mxu3 %v245_v49  ;;  %v395_v35 = vld [vmem:[%s3566_s14 + $0x4d8] sm:$0xff]  ;;  %v393_v38 = vld [vmem:[%s3566_s14 + $0x4c8] sm:$0xff] }
 0x17f   : > { %2104 = vmatpush.msra.mxu0 %v1264_v51  ;;  %2123 = vmatpush.msra.mxu1 %v1298_v54  ;;  %v1846_v13 = vpop.f32.mrf.mxu3  ;;  %v295_v1 = vld [vmem:[%s3566_s14 + $0x1b8] sm:$0xff]  ;;  %v293_v39 = vld [vmem:[%s3566_s14 + $0x1a8] sm:$0xff] }
 0x180   : > { %2144 = vmatpush.msra.mxu2 %v1328_v58  ;;  %2163 = vmatpush.msra.mxu3 %v243_v63  ;;  %v4259_v19 = vadd.f32 %v1846_v13, %v1827_v0  ;;  %v359_v37 = vld [vmem:[%s3566_s14 + $0x3b8] sm:$0xff]  ;;  %v357_v11 = vld [vmem:[%s3566_s14 + $0x3a8] sm:$0xff] }
 0x181   : > { %2105 = vmatmul.f32.vlgmr.msra.gmra.mxu0 %v1411_v6  ;;  %2145 = vmatmul.f32.vlgmr.msra.gmra.mxu2 %v1413_v7  ;;  %v327_v40 = vld [vmem:[%s3566_s14 + $0x2b8] sm:$0xff]  ;;  %v325_v51 = vld [vmem:[%s3566_s14 + $0x2a8] sm:$0xff] }
 0x182   : > { %2169 = vmatpush.msrb.mxu0 %v303_v8  ;;  %2209 = vmatpush.msrb.mxu2 %v367_v12  ;;  %v391_v48 = vld [vmem:[%s3566_s14 + $0x4b8] sm:$0xff]  ;;  %v389_v57 = vld [vmem:[%s3566_s14 + $0x4a8] sm:$0xff] }
 0x183   : > { %2124 = vmatpush.msra.mxu1 %v1296_v14  ;;  %2164 = vmatpush.msra.mxu3 %v241_v17  ;;  %v291_v49 = vld [vmem:[%s3566_s14 + $0x198] sm:$0xff]  ;;  %v289_v58 = vld [vmem:[%s3566_s14 + $0x188] sm:$0xff] }
 0x184   : > { %2125 = vmatmul.f32.vlgmr.msra.gmra.mxu1 %v1412_v20  ;;  %2170 = vmatpush.msrb.mxu0 %v301_v21  ;;  %v355_v54 = vld [vmem:[%s3566_s14 + $0x398] sm:$0xff]  ;;  %v353_v0 = vld [vmem:[%s3566_s14 + $0x388] sm:$0xff] }
 0x185   : > { %2189 = vmatpush.msrb.mxu1 %v335_v22  ;;  %2210 = vmatpush.msrb.mxu2 %v365_v23  ;;  %v323_v63 = vld [vmem:[%s3566_s14 + $0x298] sm:$0xff]  ;;  %v321_v8 = vld [vmem:[%s3566_s14 + $0x288] sm:$0xff] }
 0x186   : > { %2229 = vmatpush.msrb.mxu3 %v399_v24  ;;  %2171 = vmatpush.msrb.mxu0 %v299_v28  ;;  %v387_v6 = vld [vmem:[%s3566_s14 + $0x498] sm:$0xff]  ;;  %v385_v13 = vld [vmem:[%s3566_s14 + $0x488] sm:$0xff] }
 0x187   : > { %2190 = vmatpush.msrb.mxu1 %v333_v29  ;;  %2211 = vmatpush.msrb.mxu2 %v363_v31  ;;  %v287_v7 = vld [vmem:[%s3566_s14 + $0x178] sm:$0xff]  ;;  %v285_v14 = vld [vmem:[%s3566_s14 + $0x168] sm:$0xff] }
 0x188   : > { %2230 = vmatpush.msrb.mxu3 %v397_v32  ;;  %2172 = vmatpush.msrb.mxu0 %v297_v33  ;;  %v351_v12 = vld [vmem:[%s3566_s14 + $0x378] sm:$0xff]  ;;  %v349_v20 = vld [vmem:[%s3566_s14 + $0x368] sm:$0xff] }
 0x189   : > { %2191 = vmatpush.msrb.mxu1 %v331_v34  ;;  %2212 = vmatpush.msrb.mxu2 %v361_v18  ;;  %v319_v17 = vld [vmem:[%s3566_s14 + $0x278] sm:$0xff]  ;;  %v317_v23 = vld [vmem:[%s3566_s14 + $0x268] sm:$0xff] }
 0x18a   : > { %2231 = vmatpush.msrb.mxu3 %v395_v35  ;;  %2173 = vmatpush.msrb.mxu0 %v295_v1  ;;  %v383_v21 = vld [vmem:[%s3566_s14 + $0x478] sm:$0xff]  ;;  %v381_v28 = vld [vmem:[%s3566_s14 + $0x468] sm:$0xff] }
 0x18b   : > { %2192 = vmatpush.msrb.mxu1 %v329_v36  ;;  %2213 = vmatpush.msrb.mxu2 %v359_v37  ;;  %v283_v22 = vld [vmem:[%s3566_s14 + $0x158] sm:$0xff]  ;;  %v281_v29 = vld [vmem:[%s3566_s14 + $0x148] sm:$0xff] }
 0x18c   : > { %2232 = vmatpush.msrb.mxu3 %v393_v38  ;;  %2174 = vmatpush.msrb.mxu0 %v293_v39  ;;  %v347_v24 = vld [vmem:[%s3566_s14 + $0x358] sm:$0xff]  ;;  %v345_v32 = vld [vmem:[%s3566_s14 + $0x348] sm:$0xff] }
 0x18d   : > { %2193 = vmatpush.msrb.mxu1 %v327_v40  ;;  %2214 = vmatpush.msrb.mxu2 %v357_v11  ;;  %v315_v31 = vld [vmem:[%s3566_s14 + $0x258] sm:$0xff]  ;;  %v313_v18 = vld [vmem:[%s3566_s14 + $0x248] sm:$0xff] }
 0x18e   : > { %2233 = vmatpush.msrb.mxu3 %v391_v48  ;;  %2175 = vmatpush.msrb.mxu0 %v291_v49  ;;  %v379_v33 = vld [vmem:[%s3566_s14 + $0x458] sm:$0xff]  ;;  %v377_v36 = vld [vmem:[%s3566_s14 + $0x448] sm:$0xff] }
 0x18f   : > { %2194 = vmatpush.msrb.mxu1 %v325_v51  ;;  %2215 = vmatpush.msrb.mxu2 %v355_v54  ;;  %v279_v34 = vld [vmem:[%s3566_s14 + $0x138] sm:$0xff]  ;;  %v277_v37 = vld [vmem:[%s3566_s14 + $0x128] sm:$0xff] }
 0x190   : > { %2234 = vmatpush.msrb.mxu3 %v389_v57  ;;  %2176 = vmatpush.msrb.mxu0 %v289_v58  ;;  %v343_v35 = vld [vmem:[%s3566_s14 + $0x338] sm:$0xff]  ;;  %v341_v40 = vld [vmem:[%s3566_s14 + $0x328] sm:$0xff] }
 0x191   : > { %2195 = vmatpush.msrb.mxu1 %v323_v63  ;;  %2216 = vmatpush.msrb.mxu2 %v353_v0  ;;  %v311_v39 = vld [vmem:[%s3566_s14 + $0x238] sm:$0xff]  ;;  %v309_v51 = vld [vmem:[%s3566_s14 + $0x228] sm:$0xff] }
 0x192   : > { %2235 = vmatpush.msrb.mxu3 %v387_v6  ;;  %2177 = vmatpush.msrb.mxu0 %v287_v7  ;;  %v375_v11 = vld [vmem:[%s3566_s14 + $0x438] sm:$0xff]  ;;  %v373_v57 = vld [vmem:[%s3566_s14 + $0x428] sm:$0xff] }
 0x193   : > { %2196 = vmatpush.msrb.mxu1 %v321_v8  ;;  %2217 = vmatpush.msrb.mxu2 %v351_v12  ;;  %v275_v48 = vld [vmem:[%s3566_s14 + $0x118] sm:$0xff]  ;;  %v273_v58 = vld [vmem:[%s3566_s14 + $0x108] sm:$0xff] }
 0x194   : > { %2236 = vmatpush.msrb.mxu3 %v385_v13  ;;  %2178 = vmatpush.msrb.mxu0 %v285_v14  ;;  %v339_v54 = vld [vmem:[%s3566_s14 + $0x318] sm:$0xff]  ;;  %v337_v0 = vld [vmem:[%s3566_s14 + $0x308] sm:$0xff] }
 0x195   : > { %2197 = vmatpush.msrb.mxu1 %v319_v17  ;;  %2218 = vmatpush.msrb.mxu2 %v349_v20  ;;  %v307_v63 = vld [vmem:[%s3566_s14 + $0x218] sm:$0xff]  ;;  %v305_v14 = vld [vmem:[%s3566_s14 + $0x208] sm:$0xff] }
 0x196   : > { %2237 = vmatpush.msrb.mxu3 %v383_v21  ;;  %2179 = vmatpush.msrb.mxu0 %v283_v22  ;;  %v371_v7 = vld [vmem:[%s3566_s14 + $0x418] sm:$0xff]  ;;  %v369_v17 = vld [vmem:[%s3566_s14 + $0x408] sm:$0xff] }
 0x197   : > { %2198 = vmatpush.msrb.mxu1 %v317_v23  ;;  %2219 = vmatpush.msrb.mxu2 %v347_v24  ;;  %v431_v8 = vld [vmem:[%s3566_s14 + $0x5f8] sm:$0xff]  ;;  %v429_v20 = vld [vmem:[%s3566_s14 + $0x5e8] sm:$0xff] }
 0x198   : > { %2238 = vmatpush.msrb.mxu3 %v381_v28  ;;  %2180 = vmatpush.msrb.mxu0 %v281_v29  ;;  %v1866_v1 = vpop.f32.mrf.mxu0  ;;  %v495_v13 = vld [vmem:[%s3566_s14 + $0x7f8] sm:$0xff]  ;;  %v493_v24 = vld [vmem:[%s3566_s14 + $0x7e8] sm:$0xff] }
 0x199   : > { %2199 = vmatpush.msrb.mxu1 %v315_v31  ;;  %2220 = vmatpush.msrb.mxu2 %v345_v32  ;;  %v1867_v38 = vadd.f32 %v1866_v1, %v4259_v19  ;;  %v463_v22 = vld [vmem:[%s3566_s14 + $0x6f8] sm:$0xff]  ;;  %v461_v31 = vld [vmem:[%s3566_s14 + $0x6e8] sm:$0xff] }
 0x19a   : > { %2239 = vmatpush.msrb.mxu3 %v379_v33  ;;  %2181 = vmatpush.msrb.mxu0 %v279_v34  ;;  %v527_v28 = vld [vmem:[%s3566_s14 + $0x8f8] sm:$0xff]  ;;  %v525_v33 = vld [vmem:[%s3566_s14 + $0x8e8] sm:$0xff] }
 0x19b   : > { %2200 = vmatpush.msrb.mxu1 %v313_v18  ;;  %2221 = vmatpush.msrb.mxu2 %v343_v35  ;;  %v1886_v49 = vpop.f32.mrf.mxu1  ;;  %v427_v29 = vld [vmem:[%s3566_s14 + $0x5d8] sm:$0xff]  ;;  %v425_v34 = vld [vmem:[%s3566_s14 + $0x5c8] sm:$0xff] }
 0x19c   : > { %2240 = vmatpush.msrb.mxu3 %v377_v36  ;;  %2182 = vmatpush.msrb.mxu0 %v277_v37  ;;  %v1887_v19 = vadd.f32 %v1886_v49, %v1867_v38  ;;  %v491_v32 = vld [vmem:[%s3566_s14 + $0x7d8] sm:$0xff]  ;;  %v489_v35 = vld [vmem:[%s3566_s14 + $0x7c8] sm:$0xff] }
 0x19d   : > { %2201 = vmatpush.msrb.mxu1 %v311_v39  ;;  %2222 = vmatpush.msrb.mxu2 %v341_v40  ;;  %v459_v18 = vld [vmem:[%s3566_s14 + $0x6d8] sm:$0xff]  ;;  %v457_v36 = vld [vmem:[%s3566_s14 + $0x6c8] sm:$0xff] }
 0x19e   : > { %2241 = vmatpush.msrb.mxu3 %v375_v11  ;;  %2183 = vmatpush.msrb.mxu0 %v275_v48  ;;  %v1906_v6 = vpop.f32.mrf.mxu2  ;;  %v523_v1 = vld [vmem:[%s3566_s14 + $0x8d8] sm:$0xff]  ;;  %v521_v38 = vld [vmem:[%s3566_s14 + $0x8c8] sm:$0xff] }
 0x19f   : > { %2202 = vmatpush.msrb.mxu1 %v309_v51  ;;  %2223 = vmatpush.msrb.mxu2 %v339_v54  ;;  %v1907_v12 = vadd.f32 %v1906_v6, %v1887_v19  ;;  %v487_v37 = vld [vmem:[%s3566_s14 + $0x7b8] sm:$0xff]  ;;  %v421_v39 = vld [vmem:[%s3566_s14 + $0x5a8] sm:$0xff] }
 0x1a0   : > { %2242 = vmatpush.msrb.mxu3 %v373_v57  ;;  %2184 = vmatpush.msrb.mxu0 %v273_v58  ;;  %v455_v40 = vld [vmem:[%s3566_s14 + $0x6b8] sm:$0xff]  ;;  %v485_v11 = vld [vmem:[%s3566_s14 + $0x7a8] sm:$0xff] }
 0x1a1   : > { %2203 = vmatpush.msrb.mxu1 %v307_v63  ;;  %2224 = vmatpush.msrb.mxu2 %v337_v0  ;;  %v1926_v21 = vpop.f32.mrf.mxu3  ;;  %v519_v48 = vld [vmem:[%s3566_s14 + $0x8b8] sm:$0xff]  ;;  %v453_v51 = vld [vmem:[%s3566_s14 + $0x6a8] sm:$0xff] }
 0x1a2   : > { %2243 = vmatpush.msrb.mxu3 %v371_v7  ;;  %2249 = vmatpush.msra.mxu0 %v431_v8  ;;  %v4328_v23 = vadd.f32 %v1926_v21, %v1907_v12  ;;  %v419_v49 = vld [vmem:[%s3566_s14 + $0x598] sm:$0xff]  ;;  %v517_v19 = vld [vmem:[%s3566_s14 + $0x8a8] sm:$0xff] }
 0x1a3   : > { %2289 = vmatpush.msra.mxu2 %v495_v13  ;;  %2204 = vmatpush.msrb.mxu1 %v305_v14  ;;  %v483_v54 = vld [vmem:[%s3566_s14 + $0x798] sm:$0xff]  ;;  %v417_v57 = vld [vmem:[%s3566_s14 + $0x588] sm:$0xff] }
 0x1a4   : > { %2244 = vmatpush.msrb.mxu3 %v369_v17  ;;  %2250 = vmatpush.msra.mxu0 %v429_v20  ;;  %v451_v58 = vld [vmem:[%s3566_s14 + $0x698] sm:$0xff]  ;;  %v481_v63 = vld [vmem:[%s3566_s14 + $0x788] sm:$0xff] }
 0x1a5   : > { %2165 = vmatmul.f32.vlgmr.msra.gmra.mxu3 %v3687_v44  ;;  %2269 = vmatpush.msra.mxu1 %v463_v22  ;;  %v423_v44 = vld [vmem:[%s3566_s14 + $0x5b8] sm:$0xff]  ;;  %v449_v7 = vld [vmem:[%s3566_s14 + $0x688] sm:$0xff] }
 0x1a6   : > { %2290 = vmatpush.msra.mxu2 %v493_v24  ;;  %2309 = vmatpush.msra.mxu3 %v527_v28  ;;  %v515_v0 = vld [vmem:[%s3566_s14 + $0x898] sm:$0xff]  ;;  %v513_v12 = vld [vmem:[%s3566_s14 + $0x888] sm:$0xff] }
 0x1a7   : > { %2251 = vmatpush.msra.mxu0 %v427_v29  ;;  %2270 = vmatpush.msra.mxu1 %v461_v31  ;;  %v415_v6 = vld [vmem:[%s3566_s14 + $0x578] sm:$0xff]  ;;  %v413_v13 = vld [vmem:[%s3566_s14 + $0x568] sm:$0xff] }
 0x1a8   : > { %2291 = vmatpush.msra.mxu2 %v491_v32  ;;  %2310 = vmatpush.msra.mxu3 %v525_v33  ;;  %v479_v8 = vld [vmem:[%s3566_s14 + $0x778] sm:$0xff]  ;;  %v477_v17 = vld [vmem:[%s3566_s14 + $0x768] sm:$0xff] }
 0x1a9   : > { %2252 = vmatpush.msra.mxu0 %v425_v34  ;;  %2271 = vmatpush.msra.mxu1 %v459_v18  ;;  %v447_v14 = vld [vmem:[%s3566_s14 + $0x678] sm:$0xff]  ;;  %v445_v22 = vld [vmem:[%s3566_s14 + $0x668] sm:$0xff] }
 0x1aa   : > { %2292 = vmatpush.msra.mxu2 %v489_v35  ;;  %2311 = vmatpush.msra.mxu3 %v523_v1  ;;  %v511_v20 = vld [vmem:[%s3566_s14 + $0x878] sm:$0xff]  ;;  %v509_v28 = vld [vmem:[%s3566_s14 + $0x868] sm:$0xff] }
 0x1ab   : > { %2253 = vmatpush.msra.mxu0 %v423_v44  ;;  %2272 = vmatpush.msra.mxu1 %v457_v36  ;;  %v411_v21 = vld [vmem:[%s3566_s14 + $0x558] sm:$0xff]  ;;  %v409_v29 = vld [vmem:[%s3566_s14 + $0x548] sm:$0xff] }
 0x1ac   : > { %2293 = vmatpush.msra.mxu2 %v487_v37  ;;  %2312 = vmatpush.msra.mxu3 %v521_v38  ;;  %v475_v24 = vld [vmem:[%s3566_s14 + $0x758] sm:$0xff]  ;;  %v473_v32 = vld [vmem:[%s3566_s14 + $0x748] sm:$0xff] }
 0x1ad   : > { %2254 = vmatpush.msra.mxu0 %v421_v39  ;;  %2273 = vmatpush.msra.mxu1 %v455_v40  ;;  %v443_v31 = vld [vmem:[%s3566_s14 + $0x658] sm:$0xff]  ;;  %v441_v18 = vld [vmem:[%s3566_s14 + $0x648] sm:$0xff] }
 0x1ae   : > { %2294 = vmatpush.msra.mxu2 %v485_v11  ;;  %2313 = vmatpush.msra.mxu3 %v519_v48  ;;  %v507_v33 = vld [vmem:[%s3566_s14 + $0x858] sm:$0xff]  ;;  %v505_v1 = vld [vmem:[%s3566_s14 + $0x848] sm:$0xff] }
 0x1af   : > { %2255 = vmatpush.msra.mxu0 %v419_v49  ;;  %2274 = vmatpush.msra.mxu1 %v453_v51  ;;  %v407_v34 = vld [vmem:[%s3566_s14 + $0x538] sm:$0xff]  ;;  %v405_v44 = vld [vmem:[%s3566_s14 + $0x528] sm:$0xff] }
 0x1b0   : > { %2295 = vmatpush.msra.mxu2 %v483_v54  ;;  %2314 = vmatpush.msra.mxu3 %v517_v19  ;;  %v471_v35 = vld [vmem:[%s3566_s14 + $0x738] sm:$0xff]  ;;  %v469_v38 = vld [vmem:[%s3566_s14 + $0x728] sm:$0xff] }
 0x1b1   : > { %2256 = vmatpush.msra.mxu0 %v417_v57  ;;  %2275 = vmatpush.msra.mxu1 %v451_v58  ;;  %v439_v36 = vld [vmem:[%s3566_s14 + $0x638] sm:$0xff]  ;;  %v437_v48 = vld [vmem:[%s3566_s14 + $0x628] sm:$0xff] }
 0x1b2   : > { %2296 = vmatpush.msra.mxu2 %v481_v63  ;;  %2315 = vmatpush.msra.mxu3 %v515_v0  ;;  %v503_v39 = vld [vmem:[%s3566_s14 + $0x838] sm:$0xff]  ;;  %v501_v54 = vld [vmem:[%s3566_s14 + $0x828] sm:$0xff] }
 0x1b3   : > { %2257 = vmatpush.msra.mxu0 %v415_v6  ;;  %2276 = vmatpush.msra.mxu1 %v449_v7  ;;  %v403_v11 = vld [vmem:[%s3566_s14 + $0x518] sm:$0xff]  ;;  %v465_v58 = vld [vmem:[%s3566_s14 + $0x708] sm:$0xff] }
 0x1b4   : > { %2297 = vmatpush.msra.mxu2 %v479_v8  ;;  %2316 = vmatpush.msra.mxu3 %v513_v12  ;;  %v467_v49 = vld [vmem:[%s3566_s14 + $0x718] sm:$0xff]  ;;  %v433_v8 = vld [vmem:[%s3566_s14 + $0x608] sm:$0xff] }
 0x1b5   : > { %2258 = vmatpush.msra.mxu0 %v413_v13  ;;  %2277 = vmatpush.msra.mxu1 %v447_v14  ;;  %v435_v57 = vld [vmem:[%s3566_s14 + $0x618] sm:$0xff]  ;;  %v497_v12 = vld [vmem:[%s3566_s14 + $0x808] sm:$0xff] }
 0x1b6   : > { %2298 = vmatpush.msra.mxu2 %v477_v17  ;;  %2317 = vmatpush.msra.mxu3 %v511_v20  ;;  %v499_v0 = vld [vmem:[%s3566_s14 + $0x818] sm:$0xff]  ;;  %v621_v17 = vld [vmem:[%s3566_s14 + $0xbe8] sm:$0xff] }
 0x1b7   : > { %2259 = vmatpush.msra.mxu0 %v411_v21  ;;  %2278 = vmatpush.msra.mxu1 %v445_v22  ;;  %v623_v7 = vld [vmem:[%s3566_s14 + $0xbf8] sm:$0xff]  ;;  %v589_v22 = vld [vmem:[%s3566_s14 + $0xae8] sm:$0xff] }
 0x1b8   : > { %2299 = vmatpush.msra.mxu2 %v475_v24  ;;  %2318 = vmatpush.msra.mxu3 %v509_v28  ;;  %v591_v14 = vld [vmem:[%s3566_s14 + $0xaf8] sm:$0xff]  ;;  %v653_v24 = vld [vmem:[%s3566_s14 + $0xce8] sm:$0xff] }
 0x1b9   : > { %2260 = vmatpush.msra.mxu0 %v409_v29  ;;  %2279 = vmatpush.msra.mxu1 %v443_v31  ;;  %v655_v20 = vld [vmem:[%s3566_s14 + $0xcf8] sm:$0xff]  ;;  %v553_v28 = vld [vmem:[%s3566_s14 + $0x9c8] sm:$0xff] }
 0x1ba   : > { %2300 = vmatpush.msra.mxu2 %v473_v32  ;;  %2319 = vmatpush.msra.mxu3 %v507_v33  ;;  %v1946_v37 = vpop.f32.mrf.mxu0  ;;  %v555_v21 = vld [vmem:[%s3566_s14 + $0x9d8] sm:$0xff]  ;;  %v617_v31 = vld [vmem:[%s3566_s14 + $0xbc8] sm:$0xff] }
 0x1bb   : > { %2261 = vmatpush.msra.mxu0 %v407_v34  ;;  %2280 = vmatpush.msra.mxu1 %v441_v18  ;;  %v1947_v40 = vadd.f32 %v1946_v37, %v4328_v23  ;;  %v401_v23 = vld [vmem:[%s3566_s14 + $0x508] sm:$0xff]  ;;  %v587_v29 = vld [vmem:[%s3566_s14 + $0xad8] sm:$0xff] }
 0x1bc   : > { %2301 = vmatpush.msra.mxu2 %v471_v35  ;;  %2320 = vmatpush.msra.mxu3 %v505_v1  ;;  %v651_v32 = vld [vmem:[%s3566_s14 + $0xcd8] sm:$0xff]  ;;  %v585_v33 = vld [vmem:[%s3566_s14 + $0xac8] sm:$0xff] }
 0x1bd   : > { %2262 = vmatpush.msra.mxu0 %v405_v44  ;;  %2281 = vmatpush.msra.mxu1 %v439_v36  ;;  %v1966_v51 = vpop.f32.mrf.mxu1  ;;  %v615_v34 = vld [vmem:[%s3566_s14 + $0xbb8] sm:$0xff]  ;;  %v649_v18 = vld [vmem:[%s3566_s14 + $0xcc8] sm:$0xff] }
 0x1be   : > { %2302 = vmatpush.msra.mxu2 %v469_v38  ;;  %2321 = vmatpush.msra.mxu3 %v503_v39  ;;  %v1967_v19 = vadd.f32 %v1966_v51, %v1947_v40  ;;  %v583_v35 = vld [vmem:[%s3566_s14 + $0xab8] sm:$0xff]  ;;  %v581_v36 = vld [vmem:[%s3566_s14 + $0xaa8] sm:$0xff] }
 0x1bf   : > { %2225 = vmatmul.f32.vlgmr.msrb.gmra.mxu2 %v3689_v45  ;;  %2263 = vmatpush.msra.mxu0 %v403_v11  ;;  %v559_v45 = vld [vmem:[%s3566_s14 + $0x9f8] sm:$0xff]  ;;  %v545_v38 = vld [vmem:[%s3566_s14 + $0x988] sm:$0xff] }
 0x1c0   : > { %2282 = vmatpush.msra.mxu1 %v437_v48  ;;  %2303 = vmatpush.msra.mxu2 %v467_v49  ;;  %v1986_v63 = vpop.f32.mrf.mxu2  ;;  %v647_v1 = vld [vmem:[%s3566_s14 + $0xcb8] sm:$0xff]  ;;  %v609_v40 = vld [vmem:[%s3566_s14 + $0xb88] sm:$0xff] }
 0x1c1   : > { %2322 = vmatpush.msra.mxu3 %v501_v54  ;;  %2185 = vmatmul.f32.vlgmr.msrb.gmra.mxu0 %v3691_v46  ;;  %v1987_v6 = vadd.f32 %v1986_v63, %v1967_v19  ;;  %v557_v46 = vld [vmem:[%s3566_s14 + $0x9e8] sm:$0xff]  ;;  %v547_v44 = vld [vmem:[%s3566_s14 + $0x998] sm:$0xff] }
 0x1c2   : > { %2245 = vmatmul.f32.vlgmr.msrb.gmra.mxu3 %v3707_v60  ;;  %2264 = vmatpush.msra.mxu0 %v401_v23  ;;  %v611_v37 = vld [vmem:[%s3566_s14 + $0xb98] sm:$0xff]  ;;  %v577_v49 = vld [vmem:[%s3566_s14 + $0xa88] sm:$0xff] }
 0x1c3   : > { %2283 = vmatpush.msra.mxu1 %v435_v57  ;;  %2304 = vmatpush.msra.mxu2 %v465_v58  ;;  %v2006_v13 = vpop.f32.mrf.mxu3  ;;  %v579_v39 = vld [vmem:[%s3566_s14 + $0xa98] sm:$0xff]  ;;  %v641_v54 = vld [vmem:[%s3566_s14 + $0xc88] sm:$0xff] }
 0x1c4   : > { %2323 = vmatpush.msra.mxu3 %v499_v0  ;;  %2205 = vmatmul.f32.vlgmr.msrb.gmra.mxu1 %v3685_v43  ;;  %v4400_v60 = vadd.f32 %v2006_v13, %v1987_v6  ;;  %v619_v43 = vld [vmem:[%s3566_s14 + $0xbd8] sm:$0xff]  ;;  %v541_v19 = vld [vmem:[%s3566_s14 + $0x968] sm:$0xff] }
 0x1c5   : > { %2329 = vmatpush.msrb.mxu0 %v559_v45  ;;  %2369 = vmatpush.msrb.mxu2 %v623_v7  ;;  %v643_v11 = vld [vmem:[%s3566_s14 + $0xc98] sm:$0xff]  ;;  %v605_v57 = vld [vmem:[%s3566_s14 + $0xb68] sm:$0xff] }
 0x1c6   : > { %2284 = vmatpush.msra.mxu1 %v433_v8  ;;  %2324 = vmatpush.msra.mxu3 %v497_v12  ;;  %v543_v48 = vld [vmem:[%s3566_s14 + $0x978] sm:$0xff]  ;;  %v573_v0 = vld [vmem:[%s3566_s14 + $0xa68] sm:$0xff] }
 0x1c7   : > { %2330 = vmatpush.msrb.mxu0 %v557_v46  ;;  %2370 = vmatpush.msrb.mxu2 %v621_v17  ;;  %v607_v51 = vld [vmem:[%s3566_s14 + $0xb78] sm:$0xff]  ;;  %v637_v45 = vld [vmem:[%s3566_s14 + $0xc68] sm:$0xff] }
 0x1c8   : > { %2349 = vmatpush.msrb.mxu1 %v591_v14  ;;  %2389 = vmatpush.msrb.mxu3 %v655_v20  ;;  %v575_v23 = vld [vmem:[%s3566_s14 + $0xa78] sm:$0xff]  ;;  %v537_v7 = vld [vmem:[%s3566_s14 + $0x948] sm:$0xff] }
 0x1c9   : > { %2305 = vmatmul.f32.vlgmr.msra.gmra.mxu2 %v3709_v61  ;;  %2331 = vmatpush.msrb.mxu0 %v555_v21  ;;  %v551_v61 = vld [vmem:[%s3566_s14 + $0x9b8] sm:$0xff]  ;;  %v601_v12 = vld [vmem:[%s3566_s14 + $0xb48] sm:$0xff] }
 0x1ca   : > { %2350 = vmatpush.msrb.mxu1 %v589_v22  ;;  %2371 = vmatpush.msrb.mxu2 %v619_v43  ;;  %v639_v58 = vld [vmem:[%s3566_s14 + $0xc78] sm:$0xff]  ;;  %v569_v14 = vld [vmem:[%s3566_s14 + $0xa48] sm:$0xff] }
 0x1cb   : > { %2390 = vmatpush.msrb.mxu3 %v653_v24  ;;  %2265 = vmatmul.f32.vlgmr.msra.gmra.mxu0 %v3711_v62  ;;  %v549_v62 = vld [vmem:[%s3566_s14 + $0x9a8] sm:$0xff]  ;;  %v539_v63 = vld [vmem:[%s3566_s14 + $0x958] sm:$0xff] }
 0x1cc   : > { %2325 = vmatmul.f32.vlgmr.msra.gmra.mxu3 %v3743_v25  ;;  %2332 = vmatpush.msrb.mxu0 %v553_v28  ;;  %v613_v25 = vld [vmem:[%s3566_s14 + $0xba8] sm:$0xff]  ;;  %v603_v6 = vld [vmem:[%s3566_s14 + $0xb58] sm:$0xff] }
 0x1cd   : > { %2351 = vmatpush.msrb.mxu1 %v587_v29  ;;  %2372 = vmatpush.msrb.mxu2 %v617_v31  ;;  %v571_v8 = vld [vmem:[%s3566_s14 + $0xa58] sm:$0xff]  ;;  %v633_v21 = vld [vmem:[%s3566_s14 + $0xc48] sm:$0xff] }
 0x1ce   : > { %2391 = vmatpush.msrb.mxu3 %v651_v32  ;;  %2285 = vmatmul.f32.vlgmr.msra.gmra.mxu1 %v3705_v59  ;;  %v645_v59 = vld [vmem:[%s3566_s14 + $0xca8] sm:$0xff]  ;;  %v635_v13 = vld [vmem:[%s3566_s14 + $0xc58] sm:$0xff] }
 0x1cf   : > { %2333 = vmatpush.msrb.mxu0 %v551_v61  ;;  %2352 = vmatpush.msrb.mxu1 %v585_v33  ;;  %v535_v46 = vld [vmem:[%s3566_s14 + $0x938] sm:$0xff]  ;;  %v533_v43 = vld [vmem:[%s3566_s14 + $0x928] sm:$0xff] }
 0x1d0   : > { %2373 = vmatpush.msrb.mxu2 %v615_v34  ;;  %2392 = vmatpush.msrb.mxu3 %v649_v18  ;;  %v599_v20 = vld [vmem:[%s3566_s14 + $0xb38] sm:$0xff]  ;;  %v597_v28 = vld [vmem:[%s3566_s14 + $0xb28] sm:$0xff] }
 0x1d1   : > { %2334 = vmatpush.msrb.mxu0 %v549_v62  ;;  %2353 = vmatpush.msrb.mxu1 %v583_v35  ;;  %v567_v24 = vld [vmem:[%s3566_s14 + $0xa38] sm:$0xff]  ;;  %v565_v61 = vld [vmem:[%s3566_s14 + $0xa28] sm:$0xff] }
 0x1d2   : > { %2374 = vmatpush.msrb.mxu2 %v613_v25  ;;  %2393 = vmatpush.msrb.mxu3 %v647_v1  ;;  %v631_v29 = vld [vmem:[%s3566_s14 + $0xc38] sm:$0xff]  ;;  %v629_v34 = vld [vmem:[%s3566_s14 + $0xc28] sm:$0xff] }
 0x1d3   : > { %2335 = vmatpush.msrb.mxu0 %v547_v44  ;;  %2354 = vmatpush.msrb.mxu1 %v581_v36  ;;  %v531_v32 = vld [vmem:[%s3566_s14 + $0x918] sm:$0xff]  ;;  %v529_v18 = vld [vmem:[%s3566_s14 + $0x908] sm:$0xff] }
 0x1d4   : > { %2375 = vmatpush.msrb.mxu2 %v611_v37  ;;  %2394 = vmatpush.msrb.mxu3 %v645_v59  ;;  %v595_v33 = vld [vmem:[%s3566_s14 + $0xb18] sm:$0xff]  ;;  %v593_v25 = vld [vmem:[%s3566_s14 + $0xb08] sm:$0xff] }
 0x1d5   : > { %2336 = vmatpush.msrb.mxu0 %v545_v38  ;;  %2355 = vmatpush.msrb.mxu1 %v579_v39  ;;  %v563_v62 = vld [vmem:[%s3566_s14 + $0xa18] sm:$0xff]  ;;  %v561_v59 = vld [vmem:[%s3566_s14 + $0xa08] sm:$0xff] }
 0x1d6   : > { %2376 = vmatpush.msrb.mxu2 %v609_v40  ;;  %2395 = vmatpush.msrb.mxu3 %v643_v11  ;;  %v627_v1 = vld [vmem:[%s3566_s14 + $0xc18] sm:$0xff]  ;;  %v625_v38 = vld [vmem:[%s3566_s14 + $0xc08] sm:$0xff] }
 0x1d7   : > { %2337 = vmatpush.msrb.mxu0 %v543_v48  ;;  %2356 = vmatpush.msrb.mxu1 %v577_v49  ;;  %v687_v36 = vld [vmem:[%s3566_s14 + $0xdf8] sm:$0xff]  ;;  %v685_v39 = vld [vmem:[%s3566_s14 + $0xde8] sm:$0xff] }
 0x1d8   : > { %2377 = vmatpush.msrb.mxu2 %v607_v51  ;;  %2396 = vmatpush.msrb.mxu3 %v641_v54  ;;  %v751_v37 = vld [vmem:[%s3566_s14 + $0xff8] sm:$0xff]  ;;  %v749_v11 = vld [vmem:[%s3566_s14 + $0xfe8] sm:$0xff] }
 0x1d9   : > { %2338 = vmatpush.msrb.mxu0 %v541_v19  ;;  %2357 = vmatpush.msrb.mxu1 %v575_v23  ;;  %v719_v40 = vld [vmem:[%s3566_s14 + $0xef8] sm:$0xff]  ;;  %v781_v51 = vld [vmem:[%s3566_s14 + $0x10e8] sm:$0xff] }
 0x1da   : > { %2378 = vmatpush.msrb.mxu2 %v605_v57  ;;  %2397 = vmatpush.msrb.mxu3 %v639_v58  ;;  %v783_v48 = vld [vmem:[%s3566_s14 + $0x10f8] sm:$0xff]  ;;  %v681_v54 = vld [vmem:[%s3566_s14 + $0xdc8] sm:$0xff] }
 0x1db   : > { %2339 = vmatpush.msrb.mxu0 %v539_v63  ;;  %2358 = vmatpush.msrb.mxu1 %v573_v0  ;;  %v747_v49 = vld [vmem:[%s3566_s14 + $0xfd8] sm:$0xff]  ;;  %v713_v57 = vld [vmem:[%s3566_s14 + $0xec8] sm:$0xff] }
 0x1dc   : > { %2379 = vmatpush.msrb.mxu2 %v603_v6  ;;  %2398 = vmatpush.msrb.mxu3 %v637_v45  ;;  %v2026_v17 = vpop.f32.mrf.mxu0  ;;  %v715_v19 = vld [vmem:[%s3566_s14 + $0xed8] sm:$0xff]  ;;  %v777_v63 = vld [vmem:[%s3566_s14 + $0x10c8] sm:$0xff] }
 0x1dd   : > { %2340 = vmatpush.msrb.mxu0 %v537_v7  ;;  %2359 = vmatpush.msrb.mxu1 %v571_v8  ;;  %v2027_v22 = vadd.f32 %v2026_v17, %v4400_v60  ;;  %v679_v23 = vld [vmem:[%s3566_s14 + $0xdb8] sm:$0xff]  ;;  %v677_v0 = vld [vmem:[%s3566_s14 + $0xda8] sm:$0xff] }
 0x1de   : > { %2380 = vmatpush.msrb.mxu2 %v601_v12  ;;  %2399 = vmatpush.msrb.mxu3 %v635_v13  ;;  %v743_v58 = vld [vmem:[%s3566_s14 + $0xfb8] sm:$0xff]  ;;  %v741_v45 = vld [vmem:[%s3566_s14 + $0xfa8] sm:$0xff] }
 0x1df   : > { %2341 = vmatpush.msrb.mxu0 %v535_v46  ;;  %2360 = vmatpush.msrb.mxu1 %v569_v14  ;;  %v2046_v31 = vpop.f32.mrf.mxu1  ;;  %v711_v6 = vld [vmem:[%s3566_s14 + $0xeb8] sm:$0xff]  ;;  %v709_v12 = vld [vmem:[%s3566_s14 + $0xea8] sm:$0xff] }
 0x1e0   : > { %2381 = vmatpush.msrb.mxu2 %v599_v20  ;;  %2400 = vmatpush.msrb.mxu3 %v633_v21  ;;  %v2047_v60 = vadd.f32 %v2046_v31, %v2027_v22  ;;  %v775_v7 = vld [vmem:[%s3566_s14 + $0x10b8] sm:$0xff]  ;;  %v773_v46 = vld [vmem:[%s3566_s14 + $0x10a8] sm:$0xff] }
 0x1e1   : > { %2342 = vmatpush.msrb.mxu0 %v533_v43  ;;  %2361 = vmatpush.msrb.mxu1 %v567_v24  ;;  %v675_v8 = vld [vmem:[%s3566_s14 + $0xd98] sm:$0xff]  ;;  %v673_v14 = vld [vmem:[%s3566_s14 + $0xd88] sm:$0xff] }
 0x1e2   : > { %2382 = vmatpush.msrb.mxu2 %v597_v28  ;;  %2401 = vmatpush.msrb.mxu3 %v631_v29  ;;  %v2066_v35 = vpop.f32.mrf.mxu2  ;;  %v739_v13 = vld [vmem:[%s3566_s14 + $0xf98] sm:$0xff]  ;;  %v737_v20 = vld [vmem:[%s3566_s14 + $0xf88] sm:$0xff] }
 0x1e3   : > { %2343 = vmatpush.msrb.mxu0 %v531_v32  ;;  %2362 = vmatpush.msrb.mxu1 %v565_v61  ;;  %v4465_v44 = vadd.f32 %v2066_v35, %v2047_v60  ;;  %v707_v17 = vld [vmem:[%s3566_s14 + $0xe98] sm:$0xff]  ;;  %v705_v43 = vld [vmem:[%s3566_s14 + $0xe88] sm:$0xff] }
 0x1e4   : > { %2383 = vmatpush.msrb.mxu2 %v595_v33  ;;  %2402 = vmatpush.msrb.mxu3 %v629_v34  ;;  %v771_v21 = vld [vmem:[%s3566_s14 + $0x1098] sm:$0xff]  ;;  %v769_v28 = vld [vmem:[%s3566_s14 + $0x1088] sm:$0xff] }
 0x1e5   : > { %2344 = vmatpush.msrb.mxu0 %v529_v18  ;;  %2363 = vmatpush.msrb.mxu1 %v563_v62  ;;  %v671_v22 = vld [vmem:[%s3566_s14 + $0xd78] sm:$0xff]  ;;  %v669_v29 = vld [vmem:[%s3566_s14 + $0xd68] sm:$0xff]  ;;  %v2086_v60 = vpop.f32.mrf.mxu3 }
 0x1e6   : > { %2384 = vmatpush.msrb.mxu2 %v593_v25  ;;  %2403 = vmatpush.msrb.mxu3 %v627_v1  ;;  %v735_v24 = vld [vmem:[%s3566_s14 + $0xf78] sm:$0xff]  ;;  %v733_v32 = vld [vmem:[%s3566_s14 + $0xf68] sm:$0xff]  ;;  %v2087_v1 = vadd.f32 %v2086_v60, %v4465_v44 }
 0x1e7   : > { %2345 = vmatmul.f32.vlgmr.msrb.gmra.mxu0 %v3748_v27  ;;  %2385 = vmatmul.f32.vlgmr.msrb.gmra.mxu2 %v3752_v30  ;;  %v683_v27 = vld [vmem:[%s3566_s14 + $0xdd8] sm:$0xff]  ;;  %v717_v30 = vld [vmem:[%s3566_s14 + $0xee8] sm:$0xff] }
 0x1e8   : > { %2409 = vmatpush.msra.mxu0 %v687_v36  ;;  %2449 = vmatpush.msra.mxu2 %v751_v37  ;;  %v703_v31 = vld [vmem:[%s3566_s14 + $0xe78] sm:$0xff]  ;;  %v701_v34 = vld [vmem:[%s3566_s14 + $0xe68] sm:$0xff] }
 0x1e9   : > { %2364 = vmatpush.msrb.mxu1 %v561_v59  ;;  %2404 = vmatpush.msrb.mxu3 %v625_v38  ;;  %v767_v61 = vld [vmem:[%s3566_s14 + $0x1078] sm:$0xff]  ;;  %v765_v62 = vld [vmem:[%s3566_s14 + $0x1068] sm:$0xff] }
 0x1ea   : > { %2365 = vmatmul.f32.vlgmr.msrb.gmra.mxu1 %v3746_v26  ;;  %2405 = vmatmul.f32.vlgmr.msrb.gmra.mxu3 %v3823_v41  ;;  %v745_v26 = vld [vmem:[%s3566_s14 + $0xfc8] sm:$0xff]  ;;  %v779_v41 = vld [vmem:[%s3566_s14 + $0x10d8] sm:$0xff] }
 0x1eb   : > { %2410 = vmatpush.msra.mxu0 %v685_v39  ;;  %2429 = vmatpush.msra.mxu1 %v719_v40  ;;  %v667_v33 = vld [vmem:[%s3566_s14 + $0xd58] sm:$0xff]  ;;  %v665_v35 = vld [vmem:[%s3566_s14 + $0xd48] sm:$0xff] }
 0x1ec   : > { %2450 = vmatpush.msra.mxu2 %v749_v11  ;;  %2469 = vmatpush.msra.mxu3 %v783_v48  ;;  %v731_v18 = vld [vmem:[%s3566_s14 + $0xf58] sm:$0xff]  ;;  %v729_v36 = vld [vmem:[%s3566_s14 + $0xf48] sm:$0xff] }
 0x1ed   : > { %2411 = vmatpush.msra.mxu0 %v683_v27  ;;  %2430 = vmatpush.msra.mxu1 %v717_v30  ;;  %v699_v25 = vld [vmem:[%s3566_s14 + $0xe58] sm:$0xff]  ;;  %v697_v38 = vld [vmem:[%s3566_s14 + $0xe48] sm:$0xff] }
 0x1ee   : > { %2451 = vmatpush.msra.mxu2 %v747_v49  ;;  %2470 = vmatpush.msra.mxu3 %v781_v51  ;;  %v763_v37 = vld [vmem:[%s3566_s14 + $0x1058] sm:$0xff]  ;;  %v761_v11 = vld [vmem:[%s3566_s14 + $0x1048] sm:$0xff] }
 0x1ef   : > { %2412 = vmatpush.msra.mxu0 %v681_v54  ;;  %2431 = vmatpush.msra.mxu1 %v715_v19  ;;  %v663_v59 = vld [vmem:[%s3566_s14 + $0xd38] sm:$0xff]  ;;  %v661_v48 = vld [vmem:[%s3566_s14 + $0xd28] sm:$0xff] }
 0x1f0   : > { %2452 = vmatpush.msra.mxu2 %v745_v26  ;;  %2471 = vmatpush.msra.mxu3 %v779_v41  ;;  %v727_v40 = vld [vmem:[%s3566_s14 + $0xf38] sm:$0xff]  ;;  %v725_v30 = vld [vmem:[%s3566_s14 + $0xf28] sm:$0xff] }
 0x1f1   : > { %2413 = vmatpush.msra.mxu0 %v679_v23  ;;  %2432 = vmatpush.msra.mxu1 %v713_v57  ;;  %v695_v27 = vld [vmem:[%s3566_s14 + $0xe38] sm:$0xff]  ;;  %v693_v19 = vld [vmem:[%s3566_s14 + $0xe28] sm:$0xff] }
 0x1f2   : > { %2453 = vmatpush.msra.mxu2 %v743_v58  ;;  %2472 = vmatpush.msra.mxu3 %v777_v63  ;;  %v759_v49 = vld [vmem:[%s3566_s14 + $0x1038] sm:$0xff]  ;;  %v757_v23 = vld [vmem:[%s3566_s14 + $0x1028] sm:$0xff] }
 0x1f3   : > { %2414 = vmatpush.msra.mxu0 %v677_v0  ;;  %2433 = vmatpush.msra.mxu1 %v711_v6  ;;  %v659_v54 = vld [vmem:[%s3566_s14 + $0xd18] sm:$0xff]  ;;  %v657_v57 = vld [vmem:[%s3566_s14 + $0xd08] sm:$0xff] }
 0x1f4   : > { %2454 = vmatpush.msra.mxu2 %v741_v45  ;;  %2473 = vmatpush.msra.mxu3 %v775_v7  ;;  %v723_v41 = vld [vmem:[%s3566_s14 + $0xf18] sm:$0xff]  ;;  %v721_v0 = vld [vmem:[%s3566_s14 + $0xf08] sm:$0xff] }
 0x1f5   : > { %2415 = vmatpush.msra.mxu0 %v675_v8  ;;  %2434 = vmatpush.msra.mxu1 %v709_v12  ;;  %v691_v58 = vld [vmem:[%s3566_s14 + $0xe18] sm:$0xff]  ;;  %v689_v12 = vld [vmem:[%s3566_s14 + $0xe08] sm:$0xff] }
 0x1f6   : > { %2455 = vmatpush.msra.mxu2 %v739_v13  ;;  %2474 = vmatpush.msra.mxu3 %v773_v46  ;;  %v755_v6 = vld [vmem:[%s3566_s14 + $0x1018] sm:$0xff]  ;;  %v753_v13 = vld [vmem:[%s3566_s14 + $0x1008] sm:$0xff] }
 0x1f7   : > { %2416 = vmatpush.msra.mxu0 %v673_v14  ;;  %2435 = vmatpush.msra.mxu1 %v707_v17  ;;  %v815_v7 = vld [vmem:[%s3566_s14 + $0x11f8] sm:$0xff]  ;;  %v813_v46 = vld [vmem:[%s3566_s14 + $0x11e8] sm:$0xff] }
 0x1f8   : > { %2456 = vmatpush.msra.mxu2 %v737_v20  ;;  %2475 = vmatpush.msra.mxu3 %v771_v21  ;;  %v879_v8 = vld [vmem:[%s3566_s14 + $0x13f8] sm:$0xff]  ;;  %v877_v17 = vld [vmem:[%s3566_s14 + $0x13e8] sm:$0xff] }
 0x1f9   : > { %2417 = vmatpush.msra.mxu0 %v671_v22  ;;  %2436 = vmatpush.msra.mxu1 %v705_v43  ;;  %v847_v14 = vld [vmem:[%s3566_s14 + $0x12f8] sm:$0xff]  ;;  %v909_v22 = vld [vmem:[%s3566_s14 + $0x14e8] sm:$0xff] }
 0x1fa   : > { %2457 = vmatpush.msra.mxu2 %v735_v24  ;;  %2476 = vmatpush.msra.mxu3 %v769_v28  ;;  %v911_v20 = vld [vmem:[%s3566_s14 + $0x14f8] sm:$0xff]  ;;  %v809_v43 = vld [vmem:[%s3566_s14 + $0x11c8] sm:$0xff] }
 0x1fb   : > { %2418 = vmatpush.msra.mxu0 %v669_v29  ;;  %2437 = vmatpush.msra.mxu1 %v703_v31  ;;  %v875_v21 = vld [vmem:[%s3566_s14 + $0x13d8] sm:$0xff]  ;;  %v841_v29 = vld [vmem:[%s3566_s14 + $0x12c8] sm:$0xff] }
 0x1fc   : > { %2458 = vmatpush.msra.mxu2 %v733_v32  ;;  %2477 = vmatpush.msra.mxu3 %v767_v61  ;;  %v843_v24 = vld [vmem:[%s3566_s14 + $0x12d8] sm:$0xff]  ;;  %v905_v32 = vld [vmem:[%s3566_s14 + $0x14c8] sm:$0xff] }
 0x1fd   : > { %2419 = vmatpush.msra.mxu0 %v667_v33  ;;  %2438 = vmatpush.msra.mxu1 %v701_v34  ;;  %v807_v28 = vld [vmem:[%s3566_s14 + $0x11b8] sm:$0xff]  ;;  %v805_v61 = vld [vmem:[%s3566_s14 + $0x11a8] sm:$0xff] }
 0x1fe   : > { %2459 = vmatpush.msra.mxu2 %v731_v18  ;;  %2478 = vmatpush.msra.mxu3 %v765_v62  ;;  %v2106_v39 = vpop.f32.mrf.mxu0  ;;  %v871_v31 = vld [vmem:[%s3566_s14 + $0x13b8] sm:$0xff]  ;;  %v869_v33 = vld [vmem:[%s3566_s14 + $0x13a8] sm:$0xff] }
 0x1ff   : > { %2420 = vmatpush.msra.mxu0 %v665_v35  ;;  %2439 = vmatpush.msra.mxu1 %v699_v25  ;;  %v2107_v44 = vadd.f32 %v2106_v39, %v2087_v1  ;;  %v839_v60 = vld [vmem:[%s3566_s14 + $0x12b8] sm:$0xff]  ;;  %v837_v62 = vld [vmem:[%s3566_s14 + $0x12a8] sm:$0xff] }
 0x200   : > { %2460 = vmatpush.msra.mxu2 %v729_v36  ;;  %2479 = vmatpush.msra.mxu3 %v763_v37  ;;  %v903_v34 = vld [vmem:[%s3566_s14 + $0x14b8] sm:$0xff]  ;;  %v901_v25 = vld [vmem:[%s3566_s14 + $0x14a8] sm:$0xff] }
 0x201   : > { %2421 = vmatpush.msra.mxu0 %v663_v59  ;;  %2440 = vmatpush.msra.mxu1 %v697_v38  ;;  %v2126_v51 = vpop.f32.mrf.mxu1  ;;  %v803_v18 = vld [vmem:[%s3566_s14 + $0x1198] sm:$0xff]  ;;  %v801_v1 = vld [vmem:[%s3566_s14 + $0x1188] sm:$0xff] }
 0x202   : > { %2461 = vmatpush.msra.mxu2 %v727_v40  ;;  %2480 = vmatpush.msra.mxu3 %v761_v11  ;;  %v2127_v26 = vadd.f32 %v2126_v51, %v2107_v44  ;;  %v867_v35 = vld [vmem:[%s3566_s14 + $0x1398] sm:$0xff]  ;;  %v865_v37 = vld [vmem:[%s3566_s14 + $0x1388] sm:$0xff] }
 0x203   : > { %2422 = vmatpush.msra.mxu0 %v661_v48  ;;  %2441 = vmatpush.msra.mxu1 %v695_v27  ;;  %v835_v36 = vld [vmem:[%s3566_s14 + $0x1298] sm:$0xff]  ;;  %v833_v39 = vld [vmem:[%s3566_s14 + $0x1288] sm:$0xff] }
 0x204   : > { %2462 = vmatpush.msra.mxu2 %v725_v30  ;;  %2481 = vmatpush.msra.mxu3 %v759_v49  ;;  %v2146_v63 = vpop.f32.mrf.mxu2  ;;  %v899_v59 = vld [vmem:[%s3566_s14 + $0x1498] sm:$0xff]  ;;  %v897_v11 = vld [vmem:[%s3566_s14 + $0x1488] sm:$0xff] }
 0x205   : > { %2423 = vmatpush.msra.mxu0 %v659_v54  ;;  %2442 = vmatpush.msra.mxu1 %v693_v19  ;;  %v4536_v45 = vadd.f32 %v2146_v63, %v2127_v26  ;;  %v799_v38 = vld [vmem:[%s3566_s14 + $0x1178] sm:$0xff]  ;;  %v797_v44 = vld [vmem:[%s3566_s14 + $0x1168] sm:$0xff] }
 0x206   : > { %2463 = vmatpush.msra.mxu2 %v723_v41  ;;  %2482 = vmatpush.msra.mxu3 %v757_v23  ;;  %v863_v40 = vld [vmem:[%s3566_s14 + $0x1378] sm:$0xff]  ;;  %v861_v27 = vld [vmem:[%s3566_s14 + $0x1368] sm:$0xff] }
 0x207   : > { %2424 = vmatpush.msra.mxu0 %v657_v57  ;;  %2443 = vmatpush.msra.mxu1 %v691_v58  ;;  %v831_v48 = vld [vmem:[%s3566_s14 + $0x1278] sm:$0xff]  ;;  %v829_v51 = vld [vmem:[%s3566_s14 + $0x1268] sm:$0xff] }
 0x208   : > { %2464 = vmatpush.msra.mxu2 %v721_v0  ;;  %2483 = vmatpush.msra.mxu3 %v755_v6  ;;  %v895_v30 = vld [vmem:[%s3566_s14 + $0x1478] sm:$0xff]  ;;  %v893_v19 = vld [vmem:[%s3566_s14 + $0x1468] sm:$0xff] }
 0x209   : > { %2425 = vmatmul.f32.vlgmr.msra.gmra.mxu0 %v3827_v47  ;;  %2465 = vmatmul.f32.vlgmr.msra.gmra.mxu2 %v3831_v50  ;;  %v811_v47 = vld [vmem:[%s3566_s14 + $0x11d8] sm:$0xff]  ;;  %v845_v50 = vld [vmem:[%s3566_s14 + $0x12e8] sm:$0xff] }
 0x20a   : > { %2489 = vmatpush.msrb.mxu0 %v815_v7  ;;  %2529 = vmatpush.msrb.mxu2 %v879_v8  ;;  %v795_v49 = vld [vmem:[%s3566_s14 + $0x1158] sm:$0xff]  ;;  %v793_v26 = vld [vmem:[%s3566_s14 + $0x1148] sm:$0xff] }
 0x20b   : > { %2444 = vmatpush.msra.mxu1 %v689_v12  ;;  %2484 = vmatpush.msra.mxu3 %v753_v13  ;;  %v859_v54 = vld [vmem:[%s3566_s14 + $0x1358] sm:$0xff]  ;;  %v857_v23 = vld [vmem:[%s3566_s14 + $0x1348] sm:$0xff] }
 0x20c   : > { %2445 = vmatmul.f32.vlgmr.msra.gmra.mxu1 %v3825_v42  ;;  %2485 = vmatmul.f32.vlgmr.msra.gmra.mxu3 %v3951_v9  ;;  %v873_v42 = vld [vmem:[%s3566_s14 + $0x13c8] sm:$0xff]  ;;  %v907_v9 = vld [vmem:[%s3566_s14 + $0x14d8] sm:$0xff] }
 0x20d   : > { %2490 = vmatpush.msrb.mxu0 %v813_v46  ;;  %2509 = vmatpush.msrb.mxu1 %v847_v14  ;;  %v827_v41 = vld [vmem:[%s3566_s14 + $0x1258] sm:$0xff]  ;;  %v825_v63 = vld [vmem:[%s3566_s14 + $0x1248] sm:$0xff] }
 0x20e   : > { %2530 = vmatpush.msrb.mxu2 %v877_v17  ;;  %2549 = vmatpush.msrb.mxu3 %v911_v20  ;;  %v891_v57 = vld [vmem:[%s3566_s14 + $0x1458] sm:$0xff]  ;;  %v889_v6 = vld [vmem:[%s3566_s14 + $0x1448] sm:$0xff] }
 0x20f   : > { %2491 = vmatpush.msrb.mxu0 %v811_v47  ;;  %2510 = vmatpush.msrb.mxu1 %v845_v50  ;;  %v791_v58 = vld [vmem:[%s3566_s14 + $0x1138] sm:$0xff]  ;;  %v789_v7 = vld [vmem:[%s3566_s14 + $0x1128] sm:$0xff] }
 0x210   : > { %2531 = vmatpush.msrb.mxu2 %v875_v21  ;;  %2550 = vmatpush.msrb.mxu3 %v909_v22  ;;  %v855_v0 = vld [vmem:[%s3566_s14 + $0x1338] sm:$0xff]  ;;  %v853_v12 = vld [vmem:[%s3566_s14 + $0x1328] sm:$0xff] }
 0x211   : > { %2492 = vmatpush.msrb.mxu0 %v809_v43  ;;  %2511 = vmatpush.msrb.mxu1 %v843_v24  ;;  %v823_v8 = vld [vmem:[%s3566_s14 + $0x1238] sm:$0xff]  ;;  %v821_v14 = vld [vmem:[%s3566_s14 + $0x1228] sm:$0xff] }
 0x212   : > { %2532 = vmatpush.msrb.mxu2 %v873_v42  ;;  %2551 = vmatpush.msrb.mxu3 %v907_v9  ;;  %v887_v13 = vld [vmem:[%s3566_s14 + $0x1438] sm:$0xff]  ;;  %v885_v20 = vld [vmem:[%s3566_s14 + $0x1428] sm:$0xff] }
 0x213   : > { %2493 = vmatpush.msrb.mxu0 %v807_v28  ;;  %2512 = vmatpush.msrb.mxu1 %v841_v29  ;;  %v787_v46 = vld [vmem:[%s3566_s14 + $0x1118] sm:$0xff]  ;;  %v785_v47 = vld [vmem:[%s3566_s14 + $0x1108] sm:$0xff] }
 0x214   : > { %2533 = vmatpush.msrb.mxu2 %v871_v31  ;;  %2552 = vmatpush.msrb.mxu3 %v905_v32  ;;  %v851_v17 = vld [vmem:[%s3566_s14 + $0x1318] sm:$0xff]  ;;  %v849_v21 = vld [vmem:[%s3566_s14 + $0x1308] sm:$0xff] }
 0x215   : > { %2494 = vmatpush.msrb.mxu0 %v805_v61  ;;  %2513 = vmatpush.msrb.mxu1 %v839_v60  ;;  %v819_v50 = vld [vmem:[%s3566_s14 + $0x1218] sm:$0xff]  ;;  %v817_v42 = vld [vmem:[%s3566_s14 + $0x1208] sm:$0xff] }
 0x216   : > { %2534 = vmatpush.msrb.mxu2 %v869_v33  ;;  %2553 = vmatpush.msrb.mxu3 %v903_v34  ;;  %v883_v22 = vld [vmem:[%s3566_s14 + $0x1418] sm:$0xff]  ;;  %v881_v9 = vld [vmem:[%s3566_s14 + $0x1408] sm:$0xff] }
 0x217   : > { %2495 = vmatpush.msrb.mxu0 %v803_v18  ;;  %2514 = vmatpush.msrb.mxu1 %v837_v62  ;;  %v943_v43 = vld [vmem:[%s3566_s14 + $0x15f8] sm:$0xff]  ;;  %v941_v28 = vld [vmem:[%s3566_s14 + $0x15e8] sm:$0xff] }
 0x218   : > { %2535 = vmatpush.msrb.mxu2 %v867_v35  ;;  %2554 = vmatpush.msrb.mxu3 %v901_v25  ;;  %v1007_v24 = vld [vmem:[%s3566_s14 + $0x17f8] sm:$0xff]  ;;  %v1005_v31 = vld [vmem:[%s3566_s14 + $0x17e8] sm:$0xff] }
 0x219   : > { %2496 = vmatpush.msrb.mxu0 %v801_v1  ;;  %2515 = vmatpush.msrb.mxu1 %v835_v36  ;;  %v975_v29 = vld [vmem:[%s3566_s14 + $0x16f8] sm:$0xff]  ;;  %v1037_v60 = vld [vmem:[%s3566_s14 + $0x18e8] sm:$0xff] }
 0x21a   : > { %2536 = vmatpush.msrb.mxu2 %v865_v37  ;;  %2555 = vmatpush.msrb.mxu3 %v899_v59  ;;  %v1039_v32 = vld [vmem:[%s3566_s14 + $0x18f8] sm:$0xff]  ;;  %v937_v33 = vld [vmem:[%s3566_s14 + $0x15c8] sm:$0xff] }
 0x21b   : > { %2497 = vmatpush.msrb.mxu0 %v799_v38  ;;  %2516 = vmatpush.msrb.mxu1 %v833_v39  ;;  %v1003_v61 = vld [vmem:[%s3566_s14 + $0x17d8] sm:$0xff]  ;;  %v969_v62 = vld [vmem:[%s3566_s14 + $0x16c8] sm:$0xff] }
 0x21c   : > { %2537 = vmatpush.msrb.mxu2 %v863_v40  ;;  %2556 = vmatpush.msrb.mxu3 %v897_v11  ;;  %v971_v34 = vld [vmem:[%s3566_s14 + $0x16d8] sm:$0xff]  ;;  %v1033_v25 = vld [vmem:[%s3566_s14 + $0x18c8] sm:$0xff] }
 0x21d   : > { %2498 = vmatpush.msrb.mxu0 %v797_v44  ;;  %2517 = vmatpush.msrb.mxu1 %v831_v48  ;;  %v935_v18 = vld [vmem:[%s3566_s14 + $0x15b8] sm:$0xff]  ;;  %v933_v1 = vld [vmem:[%s3566_s14 + $0x15a8] sm:$0xff] }
 0x21e   : > { %2538 = vmatpush.msrb.mxu2 %v861_v27  ;;  %2557 = vmatpush.msrb.mxu3 %v895_v30  ;;  %v999_v35 = vld [vmem:[%s3566_s14 + $0x17b8] sm:$0xff]  ;;  %v997_v37 = vld [vmem:[%s3566_s14 + $0x17a8] sm:$0xff] }
 0x21f   : > { %2499 = vmatpush.msrb.mxu0 %v795_v49  ;;  %2518 = vmatpush.msrb.mxu1 %v829_v51  ;;  %v967_v36 = vld [vmem:[%s3566_s14 + $0x16b8] sm:$0xff]  ;;  %v965_v39 = vld [vmem:[%s3566_s14 + $0x16a8] sm:$0xff] }
 0x220   : > { %2539 = vmatpush.msrb.mxu2 %v859_v54  ;;  %2558 = vmatpush.msrb.mxu3 %v893_v19  ;;  %v1031_v59 = vld [vmem:[%s3566_s14 + $0x18b8] sm:$0xff]  ;;  %v1029_v11 = vld [vmem:[%s3566_s14 + $0x18a8] sm:$0xff] }
 0x221   : > { %2500 = vmatpush.msrb.mxu0 %v793_v26  ;;  %2519 = vmatpush.msrb.mxu1 %v827_v41  ;;  %v931_v38 = vld [vmem:[%s3566_s14 + $0x1598] sm:$0xff]  ;;  %v929_v44 = vld [vmem:[%s3566_s14 + $0x1588] sm:$0xff] }
 0x222   : > { %2540 = vmatpush.msrb.mxu2 %v857_v23  ;;  %2559 = vmatpush.msrb.mxu3 %v891_v57  ;;  %v995_v40 = vld [vmem:[%s3566_s14 + $0x1798] sm:$0xff]  ;;  %v993_v27 = vld [vmem:[%s3566_s14 + $0x1788] sm:$0xff] }
 0x223   : > { %2501 = vmatpush.msrb.mxu0 %v791_v58  ;;  %2520 = vmatpush.msrb.mxu1 %v825_v63  ;;  %v963_v48 = vld [vmem:[%s3566_s14 + $0x1698] sm:$0xff]  ;;  %v961_v51 = vld [vmem:[%s3566_s14 + $0x1688] sm:$0xff] }
 0x224   : > { %2541 = vmatpush.msrb.mxu2 %v855_v0  ;;  %2560 = vmatpush.msrb.mxu3 %v889_v6  ;;  %v1027_v30 = vld [vmem:[%s3566_s14 + $0x1898] sm:$0xff]  ;;  %v1025_v19 = vld [vmem:[%s3566_s14 + $0x1888] sm:$0xff] }
 0x225   : > { %2502 = vmatpush.msrb.mxu0 %v789_v7  ;;  %2521 = vmatpush.msrb.mxu1 %v823_v8  ;;  %v927_v49 = vld [vmem:[%s3566_s14 + $0x1578] sm:$0xff]  ;;  %v925_v26 = vld [vmem:[%s3566_s14 + $0x1568] sm:$0xff] }
 0x226   : > { %2542 = vmatpush.msrb.mxu2 %v853_v12  ;;  %2561 = vmatpush.msrb.mxu3 %v887_v13  ;;  %v991_v54 = vld [vmem:[%s3566_s14 + $0x1778] sm:$0xff]  ;;  %v989_v23 = vld [vmem:[%s3566_s14 + $0x1768] sm:$0xff] }
 0x227   : > { %2503 = vmatpush.msrb.mxu0 %v787_v46  ;;  %2522 = vmatpush.msrb.mxu1 %v821_v14  ;;  %v959_v41 = vld [vmem:[%s3566_s14 + $0x1678] sm:$0xff]  ;;  %v957_v63 = vld [vmem:[%s3566_s14 + $0x1668] sm:$0xff] }
 0x228   : > { %2543 = vmatpush.msrb.mxu2 %v851_v17  ;;  %2562 = vmatpush.msrb.mxu3 %v885_v20  ;;  %v1023_v57 = vld [vmem:[%s3566_s14 + $0x1878] sm:$0xff]  ;;  %v1021_v6 = vld [vmem:[%s3566_s14 + $0x1868] sm:$0xff] }
 0x229   : > { %2504 = vmatpush.msrb.mxu0 %v785_v47  ;;  %2523 = vmatpush.msrb.mxu1 %v819_v50  ;;  %v923_v58 = vld [vmem:[%s3566_s14 + $0x1558] sm:$0xff]  ;;  %v921_v7 = vld [vmem:[%s3566_s14 + $0x1548] sm:$0xff] }
 0x22a   : > { %2544 = vmatpush.msrb.mxu2 %v849_v21  ;;  %2563 = vmatpush.msrb.mxu3 %v883_v22  ;;  %v987_v0 = vld [vmem:[%s3566_s14 + $0x1758] sm:$0xff]  ;;  %v985_v12 = vld [vmem:[%s3566_s14 + $0x1748] sm:$0xff] }
 0x22b   : > { %2505 = vmatmul.f32.vlgmr.msrb.gmra.mxu0 %v3961_v15  ;;  %2545 = vmatmul.f32.vlgmr.msrb.gmra.mxu2 %v3963_v16  ;;  %v939_v15 = vld [vmem:[%s3566_s14 + $0x15d8] sm:$0xff]  ;;  %v973_v16 = vld [vmem:[%s3566_s14 + $0x16e8] sm:$0xff] }
 0x22c   : > { %2569 = vmatpush.msra.mxu0 %v943_v43  ;;  %2609 = vmatpush.msra.mxu2 %v1007_v24  ;;  %v955_v8 = vld [vmem:[%s3566_s14 + $0x1658] sm:$0xff]  ;;  %v953_v14 = vld [vmem:[%s3566_s14 + $0x1648] sm:$0xff] }
 0x22d   : > { %2524 = vmatpush.msrb.mxu1 %v817_v42  ;;  %2564 = vmatpush.msrb.mxu3 %v881_v9  ;;  %v1019_v13 = vld [vmem:[%s3566_s14 + $0x1858] sm:$0xff]  ;;  %v1017_v20 = vld [vmem:[%s3566_s14 + $0x1848] sm:$0xff] }
 0x22e   : > { %2525 = vmatmul.f32.vlgmr.msrb.gmra.mxu1 %v3953_v10  ;;  %2565 = vmatmul.f32.vlgmr.msrb.gmra.mxu3 %v4028_v55  ;;  %v1001_v10 = vld [vmem:[%s3566_s14 + $0x17c8] sm:$0xff]  ;;  %v1035_v55 = vld [vmem:[%s3566_s14 + $0x18d8] sm:$0xff] }
 0x22f   : > { %2570 = vmatpush.msra.mxu0 %v941_v28  ;;  %2589 = vmatpush.msra.mxu1 %v975_v29  ;;  %v919_v46 = vld [vmem:[%s3566_s14 + $0x1538] sm:$0xff]  ;;  %v917_v47 = vld [vmem:[%s3566_s14 + $0x1528] sm:$0xff] }
 0x230   : > { %2610 = vmatpush.msra.mxu2 %v1005_v31  ;;  %2629 = vmatpush.msra.mxu3 %v1039_v32  ;;  %v983_v17 = vld [vmem:[%s3566_s14 + $0x1738] sm:$0xff]  ;;  %v981_v21 = vld [vmem:[%s3566_s14 + $0x1728] sm:$0xff] }
 0x231   : > { %2571 = vmatpush.msra.mxu0 %v939_v15  ;;  %2590 = vmatpush.msra.mxu1 %v973_v16  ;;  %v951_v50 = vld [vmem:[%s3566_s14 + $0x1638] sm:$0xff]  ;;  %v949_v24 = vld [vmem:[%s3566_s14 + $0x1628] sm:$0xff] }
 0x232   : > { %2611 = vmatpush.msra.mxu2 %v1003_v61  ;;  %2630 = vmatpush.msra.mxu3 %v1037_v60  ;;  %v1015_v22 = vld [vmem:[%s3566_s14 + $0x1838] sm:$0xff]  ;;  %v1013_v9 = vld [vmem:[%s3566_s14 + $0x1828] sm:$0xff] }
 0x233   : > { %2572 = vmatpush.msra.mxu0 %v937_v33  ;;  %2591 = vmatpush.msra.mxu1 %v971_v34  ;;  %v915_v43 = vld [vmem:[%s3566_s14 + $0x1518] sm:$0xff]  ;;  %v913_v28 = vld [vmem:[%s3566_s14 + $0x1508] sm:$0xff] }
 0x234   : > { %2612 = vmatpush.msra.mxu2 %v1001_v10  ;;  %2631 = vmatpush.msra.mxu3 %v1035_v55  ;;  %v979_v42 = vld [vmem:[%s3566_s14 + $0x1718] sm:$0xff]  ;;  %v977_v31 = vld [vmem:[%s3566_s14 + $0x1708] sm:$0xff] }
 0x235   : > { %2573 = vmatpush.msra.mxu0 %v935_v18  ;;  %2592 = vmatpush.msra.mxu1 %v969_v62  ;;  %v947_v29 = vld [vmem:[%s3566_s14 + $0x1618] sm:$0xff]  ;;  %v945_v61 = vld [vmem:[%s3566_s14 + $0x1608] sm:$0xff] }
 0x236   : > { %2613 = vmatpush.msra.mxu2 %v999_v35  ;;  %2632 = vmatpush.msra.mxu3 %v1033_v25  ;;  %v1011_v32 = vld [vmem:[%s3566_s14 + $0x1818] sm:$0xff]  ;;  %v1009_v60 = vld [vmem:[%s3566_s14 + $0x1808] sm:$0xff] }
 0x237   : > { %2574 = vmatpush.msra.mxu0 %v933_v1  ;;  %2593 = vmatpush.msra.mxu1 %v967_v36  ;;  %v1071_v15 = vld [vmem:[%s3566_s14 + $0x19f8] sm:$0xff]  ;;  %v1069_v33 = vld [vmem:[%s3566_s14 + $0x19e8] sm:$0xff] }
 0x238   : > { %2614 = vmatpush.msra.mxu2 %v997_v37  ;;  %2633 = vmatpush.msra.mxu3 %v1031_v59  ;;  %v1135_v16 = vld [vmem:[%s3566_s14 + $0x1bf8] sm:$0xff]  ;;  %v1133_v10 = vld [vmem:[%s3566_s14 + $0x1be8] sm:$0xff] }
 0x239   : > { %2575 = vmatpush.msra.mxu0 %v931_v38  ;;  %2594 = vmatpush.msra.mxu1 %v965_v39  ;;  %v1103_v34 = vld [vmem:[%s3566_s14 + $0x1af8] sm:$0xff]  ;;  %v1165_v62 = vld [vmem:[%s3566_s14 + $0x1ce8] sm:$0xff] }
 0x23a   : > { %2615 = vmatpush.msra.mxu2 %v995_v40  ;;  %2634 = vmatpush.msra.mxu3 %v1029_v11  ;;  %v1167_v55 = vld [vmem:[%s3566_s14 + $0x1cf8] sm:$0xff]  ;;  %v1065_v35 = vld [vmem:[%s3566_s14 + $0x19c8] sm:$0xff] }
 0x23b   : > { %2576 = vmatpush.msra.mxu0 %v929_v44  ;;  %2595 = vmatpush.msra.mxu1 %v963_v48  ;;  %v1131_v18 = vld [vmem:[%s3566_s14 + $0x1bd8] sm:$0xff]  ;;  %v1097_v36 = vld [vmem:[%s3566_s14 + $0x1ac8] sm:$0xff] }
 0x23c   : > { %2616 = vmatpush.msra.mxu2 %v993_v27  ;;  %2635 = vmatpush.msra.mxu3 %v1027_v30  ;;  %v1099_v25 = vld [vmem:[%s3566_s14 + $0x1ad8] sm:$0xff]  ;;  %v1161_v59 = vld [vmem:[%s3566_s14 + $0x1cc8] sm:$0xff] }
 0x23d   : > { %2577 = vmatpush.msra.mxu0 %v927_v49  ;;  %2596 = vmatpush.msra.mxu1 %v961_v51  ;;  %v1063_v1 = vld [vmem:[%s3566_s14 + $0x19b8] sm:$0xff]  ;;  %v1061_v38 = vld [vmem:[%s3566_s14 + $0x19a8] sm:$0xff] }
 0x23e   : > { %2617 = vmatpush.msra.mxu2 %v991_v54  ;;  %2636 = vmatpush.msra.mxu3 %v1025_v19  ;;  %v1127_v37 = vld [vmem:[%s3566_s14 + $0x1bb8] sm:$0xff]  ;;  %v1125_v40 = vld [vmem:[%s3566_s14 + $0x1ba8] sm:$0xff] }
 0x23f   : > { %2578 = vmatpush.msra.mxu0 %v925_v26  ;;  %2597 = vmatpush.msra.mxu1 %v959_v41  ;;  %v1095_v39 = vld [vmem:[%s3566_s14 + $0x1ab8] sm:$0xff]  ;;  %v1093_v48 = vld [vmem:[%s3566_s14 + $0x1aa8] sm:$0xff] }
 0x240   : > { %2618 = vmatpush.msra.mxu2 %v989_v23  ;;  %2637 = vmatpush.msra.mxu3 %v1023_v57  ;;  %v1159_v11 = vld [vmem:[%s3566_s14 + $0x1cb8] sm:$0xff]  ;;  %v1157_v30 = vld [vmem:[%s3566_s14 + $0x1ca8] sm:$0xff] }
 0x241   : > { %2579 = vmatpush.msra.mxu0 %v923_v58  ;;  %2598 = vmatpush.msra.mxu1 %v957_v63  ;;  %v1059_v44 = vld [vmem:[%s3566_s14 + $0x1998] sm:$0xff]  ;;  %v1057_v49 = vld [vmem:[%s3566_s14 + $0x1988] sm:$0xff] }
 0x242   : > { %2619 = vmatpush.msra.mxu2 %v987_v0  ;;  %2638 = vmatpush.msra.mxu3 %v1021_v6  ;;  %v1123_v27 = vld [vmem:[%s3566_s14 + $0x1b98] sm:$0xff]  ;;  %v1121_v54 = vld [vmem:[%s3566_s14 + $0x1b88] sm:$0xff] }
 0x243   : > { %2580 = vmatpush.msra.mxu0 %v921_v7  ;;  %2599 = vmatpush.msra.mxu1 %v955_v8  ;;  %v1091_v51 = vld [vmem:[%s3566_s14 + $0x1a98] sm:$0xff]  ;;  %v1089_v41 = vld [vmem:[%s3566_s14 + $0x1a88] sm:$0xff] }
 0x244   : > { %2620 = vmatpush.msra.mxu2 %v985_v12  ;;  %2639 = vmatpush.msra.mxu3 %v1019_v13  ;;  %v1155_v19 = vld [vmem:[%s3566_s14 + $0x1c98] sm:$0xff]  ;;  %v1153_v57 = vld [vmem:[%s3566_s14 + $0x1c88] sm:$0xff] }
 0x245   : > { %2581 = vmatpush.msra.mxu0 %v919_v46  ;;  %2600 = vmatpush.msra.mxu1 %v953_v14  ;;  %v1055_v26 = vld [vmem:[%s3566_s14 + $0x1978] sm:$0xff]  ;;  %v1053_v58 = vld [vmem:[%s3566_s14 + $0x1968] sm:$0xff] }
 0x246   : > { %2621 = vmatpush.msra.mxu2 %v983_v17  ;;  %2640 = vmatpush.msra.mxu3 %v1017_v20  ;;  %v1119_v23 = vld [vmem:[%s3566_s14 + $0x1b78] sm:$0xff]  ;;  %v1117_v0 = vld [vmem:[%s3566_s14 + $0x1b68] sm:$0xff] }
 0x247   : > { %2582 = vmatpush.msra.mxu0 %v917_v47  ;;  %2601 = vmatpush.msra.mxu1 %v951_v50  ;;  %v1087_v63 = vld [vmem:[%s3566_s14 + $0x1a78] sm:$0xff]  ;;  %v1085_v8 = vld [vmem:[%s3566_s14 + $0x1a68] sm:$0xff] }
 0x248   : > { %2622 = vmatpush.msra.mxu2 %v981_v21  ;;  %2641 = vmatpush.msra.mxu3 %v1015_v22  ;;  %v1151_v6 = vld [vmem:[%s3566_s14 + $0x1c78] sm:$0xff]  ;;  %v1149_v13 = vld [vmem:[%s3566_s14 + $0x1c68] sm:$0xff] }
 0x249   : > { %2583 = vmatpush.msra.mxu0 %v915_v43  ;;  %2602 = vmatpush.msra.mxu1 %v949_v24  ;;  %v1051_v7 = vld [vmem:[%s3566_s14 + $0x1958] sm:$0xff]  ;;  %v1049_v46 = vld [vmem:[%s3566_s14 + $0x1948] sm:$0xff] }
 0x24a   : > { %2623 = vmatpush.msra.mxu2 %v979_v42  ;;  %2642 = vmatpush.msra.mxu3 %v1013_v9  ;;  %v1115_v12 = vld [vmem:[%s3566_s14 + $0x1b58] sm:$0xff]  ;;  %v1113_v17 = vld [vmem:[%s3566_s14 + $0x1b48] sm:$0xff] }
 0x24b   : > { %2584 = vmatpush.msra.mxu0 %v913_v28  ;;  %2603 = vmatpush.msra.mxu1 %v947_v29  ;;  %v1083_v14 = vld [vmem:[%s3566_s14 + $0x1a58] sm:$0xff]  ;;  %v1081_v50 = vld [vmem:[%s3566_s14 + $0x1a48] sm:$0xff] }
 0x24c   : > { %2624 = vmatpush.msra.mxu2 %v977_v31  ;;  %2643 = vmatpush.msra.mxu3 %v1011_v32  ;;  %v1147_v20 = vld [vmem:[%s3566_s14 + $0x1c58] sm:$0xff]  ;;  %v1145_v22 = vld [vmem:[%s3566_s14 + $0x1c48] sm:$0xff] }
 0x24d   : > { %2585 = vmatmul.f32.vlgmr.msra.gmra.mxu0 %v4038_v4  ;;  %2625 = vmatmul.f32.vlgmr.msra.gmra.mxu2 %v4040_v5  ;;  %v1067_v4 = vld [vmem:[%s3566_s14 + $0x19d8] sm:$0xff]  ;;  %v1101_v5 = vld [vmem:[%s3566_s14 + $0x1ae8] sm:$0xff] }
 0x24e   : > { %2649 = vmatpush.msrb.mxu0 %v1071_v15  ;;  %2689 = vmatpush.msrb.mxu2 %v1135_v16  ;;  %v1047_v47 = vld [vmem:[%s3566_s14 + $0x1938] sm:$0xff]  ;;  %v1045_v43 = vld [vmem:[%s3566_s14 + $0x1928] sm:$0xff] }
 0x24f   : > { %2604 = vmatpush.msra.mxu1 %v945_v61  ;;  %2644 = vmatpush.msra.mxu3 %v1009_v60  ;;  %v1111_v21 = vld [vmem:[%s3566_s14 + $0x1b38] sm:$0xff]  ;;  %v1109_v42 = vld [vmem:[%s3566_s14 + $0x1b28] sm:$0xff] }
 0x250   : > { %2605 = vmatmul.f32.vlgmr.msra.gmra.mxu1 %v4030_v56  ;;  %2645 = vmatmul.f32.vlgmr.msra.gmra.mxu3 %v4108_v52  ;;  %v1129_v56 = vld [vmem:[%s3566_s14 + $0x1bc8] sm:$0xff]  ;;  %v1163_v52 = vld [vmem:[%s3566_s14 + $0x1cd8] sm:$0xff] }
 0x251   : > { %2650 = vmatpush.msrb.mxu0 %v1069_v33  ;;  %2669 = vmatpush.msrb.mxu1 %v1103_v34  ;;  %v1079_v24 = vld [vmem:[%s3566_s14 + $0x1a38] sm:$0xff]  ;;  %v1077_v29 = vld [vmem:[%s3566_s14 + $0x1a28] sm:$0xff] }
 0x252   : > { %2690 = vmatpush.msrb.mxu2 %v1133_v10  ;;  %2709 = vmatpush.msrb.mxu3 %v1167_v55  ;;  %v1143_v9 = vld [vmem:[%s3566_s14 + $0x1c38] sm:$0xff]  ;;  %v1141_v32 = vld [vmem:[%s3566_s14 + $0x1c28] sm:$0xff] }
 0x253   : > { %2651 = vmatpush.msrb.mxu0 %v1067_v4  ;;  %2670 = vmatpush.msrb.mxu1 %v1101_v5  ;;  %v1043_v28 = vld [vmem:[%s3566_s14 + $0x1918] sm:$0xff]  ;;  %v1041_v15 = vld [vmem:[%s3566_s14 + $0x1908] sm:$0xff] }
 0x254   : > { %2691 = vmatpush.msrb.mxu2 %v1131_v18  ;;  %2710 = vmatpush.msrb.mxu3 %v1165_v62  ;;  %v1107_v31 = vld [vmem:[%s3566_s14 + $0x1b18] sm:$0xff]  ;;  %v1105_v61 = vld [vmem:[%s3566_s14 + $0x1b08] sm:$0xff] }
 0x255   : > { %2652 = vmatpush.msrb.mxu0 %v1065_v35  ;;  %2671 = vmatpush.msrb.mxu1 %v1099_v25  ;;  %v1075_v16 = vld [vmem:[%s3566_s14 + $0x1a18] sm:$0xff]  ;;  %v1073_v10 = vld [vmem:[%s3566_s14 + $0x1a08] sm:$0xff] }
 0x256   : > { %2692 = vmatpush.msrb.mxu2 %v1129_v56  ;;  %2711 = vmatpush.msrb.mxu3 %v1163_v52  ;;  %v1139_v60 = vld [vmem:[%s3566_s14 + $0x1c18] sm:$0xff]  ;;  %v1137_v55 = vld [vmem:[%s3566_s14 + $0x1c08] sm:$0xff] }
 0x257   : > { %2653 = vmatpush.msrb.mxu0 %v1063_v1  ;;  %2672 = vmatpush.msrb.mxu1 %v1097_v36  ;;  %v1199_v33 = vld [vmem:[%s3566_s14 + $0x1df8] sm:$0xff]  ;;  %v1197_v4 = vld [vmem:[%s3566_s14 + $0x1de8] sm:$0xff] }
 0x258   : > { %2693 = vmatpush.msrb.mxu2 %v1127_v37  ;;  %2712 = vmatpush.msrb.mxu3 %v1161_v59  ;;  %v1263_v34 = vld [vmem:[%s3566_s14 + $0x1ff8] sm:$0xff]  ;;  %v1261_v18 = vld [vmem:[%s3566_s14 + $0x1fe8] sm:$0xff] }
 0x259   : > { %2654 = vmatpush.msrb.mxu0 %v1061_v38  ;;  %2673 = vmatpush.msrb.mxu1 %v1095_v39  ;;  %v1231_v5 = vld [vmem:[%s3566_s14 + $0x1ef8] sm:$0xff]  ;;  %v3139_v35 = vld.sshfl [vmem:[#allocation1 + $0x20] sm:$0xff pattern:$0x73625140] }
 0x25a   : > { %2694 = vmatpush.msrb.mxu2 %v1125_v40  ;;  %2713 = vmatpush.msrb.mxu3 %v1159_v11  ;;  %v1295_v62 = vld [vmem:[%s3566_s14 + $0x20f8] sm:$0xff]  ;;  %v1293_v56 = vld [vmem:[%s3566_s14 + $0x20e8] sm:$0xff] }
 0x25b   : > { %2655 = vmatpush.msrb.mxu0 %v1059_v44  ;;  %2674 = vmatpush.msrb.mxu1 %v1093_v48  ;;  %v1259_v25 = vld [vmem:[%s3566_s14 + $0x1fd8] sm:$0xff]  ;;  %v1193_v52 = vld [vmem:[%s3566_s14 + $0x1dc8] sm:$0xff] }
 0x25c   : > { %2695 = vmatpush.msrb.mxu2 %v1123_v27  ;;  %2714 = vmatpush.msrb.mxu3 %v1157_v30  ;;  %v1227_v1 = vld [vmem:[%s3566_s14 + $0x1ed8] sm:$0xff]  ;;  %v1225_v59 = vld [vmem:[%s3566_s14 + $0x1ec8] sm:$0xff] }
 0x25d   : > { %2656 = vmatpush.msrb.mxu0 %v1057_v49  ;;  %2675 = vmatpush.msrb.mxu1 %v1091_v51  ;;  %v1291_v36 = vld [vmem:[%s3566_s14 + $0x20d8] sm:$0xff]  ;;  %v1289_v39 = vld [vmem:[%s3566_s14 + $0x20c8] sm:$0xff] }
 0x25e   : > { %2696 = vmatpush.msrb.mxu2 %v1121_v54  ;;  %2715 = vmatpush.msrb.mxu3 %v1155_v19  ;;  %v1191_v37 = vld [vmem:[%s3566_s14 + $0x1db8] sm:$0xff]  ;;  %v1189_v40 = vld [vmem:[%s3566_s14 + $0x1da8] sm:$0xff] }
 0x25f   : > { %2657 = vmatpush.msrb.mxu0 %v1055_v26  ;;  %2676 = vmatpush.msrb.mxu1 %v1089_v41  ;;  %v1255_v38 = vld [vmem:[%s3566_s14 + $0x1fb8] sm:$0xff]  ;;  %v1253_v44 = vld [vmem:[%s3566_s14 + $0x1fa8] sm:$0xff] }
 0x260   : > { %2697 = vmatpush.msrb.mxu2 %v1119_v23  ;;  %2716 = vmatpush.msrb.mxu3 %v1153_v57  ;;  %v1223_v11 = vld [vmem:[%s3566_s14 + $0x1eb8] sm:$0xff]  ;;  %v1221_v30 = vld [vmem:[%s3566_s14 + $0x1ea8] sm:$0xff] }
 0x261   : > { %2658 = vmatpush.msrb.mxu0 %v1053_v58  ;;  %2677 = vmatpush.msrb.mxu1 %v1087_v63  ;;  %v1287_v48 = vld [vmem:[%s3566_s14 + $0x20b8] sm:$0xff]  ;;  %v1285_v51 = vld [vmem:[%s3566_s14 + $0x20a8] sm:$0xff] }
 0x262   : > { %2698 = vmatpush.msrb.mxu2 %v1117_v0  ;;  %2717 = vmatpush.msrb.mxu3 %v1151_v6  ;;  %v1187_v27 = vld [vmem:[%s3566_s14 + $0x1d98] sm:$0xff]  ;;  %v1185_v54 = vld [vmem:[%s3566_s14 + $0x1d88] sm:$0xff] }
 0x263   : > { %2659 = vmatpush.msrb.mxu0 %v1051_v7  ;;  %2678 = vmatpush.msrb.mxu1 %v1085_v8  ;;  %v1251_v49 = vld [vmem:[%s3566_s14 + $0x1f98] sm:$0xff]  ;;  %v1249_v26 = vld [vmem:[%s3566_s14 + $0x1f88] sm:$0xff] }
 0x264   : > { %2699 = vmatpush.msrb.mxu2 %v1115_v12  ;;  %2718 = vmatpush.msrb.mxu3 %v1149_v13  ;;  %v1219_v19 = vld [vmem:[%s3566_s14 + $0x1e98] sm:$0xff]  ;;  %v1217_v57 = vld [vmem:[%s3566_s14 + $0x1e88] sm:$0xff] }
 0x265   : > { %2660 = vmatpush.msrb.mxu0 %v1049_v46  ;;  %2679 = vmatpush.msrb.mxu1 %v1083_v14  ;;  %v1283_v41 = vld [vmem:[%s3566_s14 + $0x2098] sm:$0xff]  ;;  %v1281_v63 = vld [vmem:[%s3566_s14 + $0x2088] sm:$0xff] }
 0x266   : > { %2700 = vmatpush.msrb.mxu2 %v1113_v17  ;;  %2719 = vmatpush.msrb.mxu3 %v1147_v20  ;;  %v1183_v23 = vld [vmem:[%s3566_s14 + $0x1d78] sm:$0xff]  ;;  %v1181_v0 = vld [vmem:[%s3566_s14 + $0x1d68] sm:$0xff] }
 0x267   : > { %2661 = vmatpush.msrb.mxu0 %v1047_v47  ;;  %2680 = vmatpush.msrb.mxu1 %v1081_v50  ;;  %v1247_v58 = vld [vmem:[%s3566_s14 + $0x1f78] sm:$0xff]  ;;  %v1245_v7 = vld [vmem:[%s3566_s14 + $0x1f68] sm:$0xff] }
 0x268   : > { %2701 = vmatpush.msrb.mxu2 %v1111_v21  ;;  %2720 = vmatpush.msrb.mxu3 %v1145_v22  ;;  %v1215_v6 = vld [vmem:[%s3566_s14 + $0x1e78] sm:$0xff]  ;;  %v1213_v13 = vld [vmem:[%s3566_s14 + $0x1e68] sm:$0xff] }
 0x269   : > { %2662 = vmatpush.msrb.mxu0 %v1045_v43  ;;  %2681 = vmatpush.msrb.mxu1 %v1079_v24  ;;  %v1279_v8 = vld [vmem:[%s3566_s14 + $0x2078] sm:$0xff]  ;;  %v1277_v14 = vld [vmem:[%s3566_s14 + $0x2068] sm:$0xff] }
 0x26a   : > { %2702 = vmatpush.msrb.mxu2 %v1109_v42  ;;  %2721 = vmatpush.msrb.mxu3 %v1143_v9  ;;  %v1179_v12 = vld [vmem:[%s3566_s14 + $0x1d58] sm:$0xff]  ;;  %v1177_v17 = vld [vmem:[%s3566_s14 + $0x1d48] sm:$0xff] }
 0x26b   : > { %2663 = vmatpush.msrb.mxu0 %v1043_v28  ;;  %2682 = vmatpush.msrb.mxu1 %v1077_v29  ;;  %v1243_v46 = vld [vmem:[%s3566_s14 + $0x1f58] sm:$0xff]  ;;  %v1241_v47 = vld [vmem:[%s3566_s14 + $0x1f48] sm:$0xff] }
 0x26c   : > { %2703 = vmatpush.msrb.mxu2 %v1107_v31  ;;  %2722 = vmatpush.msrb.mxu3 %v1141_v32  ;;  %v1211_v20 = vld [vmem:[%s3566_s14 + $0x1e58] sm:$0xff]  ;;  %v1209_v22 = vld [vmem:[%s3566_s14 + $0x1e48] sm:$0xff] }
 0x26d   : > { %2664 = vmatpush.msrb.mxu0 %v1041_v15  ;;  %2683 = vmatpush.msrb.mxu1 %v1075_v16  ;;  %v1275_v50 = vld [vmem:[%s3566_s14 + $0x2058] sm:$0xff]  ;;  %v1273_v24 = vld [vmem:[%s3566_s14 + $0x2048] sm:$0xff] }
 0x26e   : > { %2704 = vmatpush.msrb.mxu2 %v1105_v61  ;;  %2723 = vmatpush.msrb.mxu3 %v1139_v60  ;;  %v1175_v21 = vld [vmem:[%s3566_s14 + $0x1d38] sm:$0xff]  ;;  %v1173_v42 = vld [vmem:[%s3566_s14 + $0x1d28] sm:$0xff] }
 0x26f   : > { %2665 = vmatmul.f32.vlgmr.msrb.gmra.mxu0 %v4120_v2  ;;  %2705 = vmatmul.f32.vlgmr.msrb.gmra.mxu2 %v4122_v3  ;;  %v1195_v2 = vld [vmem:[%s3566_s14 + $0x1dd8] sm:$0xff]  ;;  %v1229_v3 = vld [vmem:[%s3566_s14 + $0x1ee8] sm:$0xff] }
 0x270   : > { %2729 = vmatpush.msra.mxu0 %v1199_v33  ;;  %2769 = vmatpush.msra.mxu2 %v1263_v34  ;;  %v1239_v43 = vld [vmem:[%s3566_s14 + $0x1f38] sm:$0xff]  ;;  %v1237_v28 = vld [vmem:[%s3566_s14 + $0x1f28] sm:$0xff] }
 0x271   : > { %2684 = vmatpush.msrb.mxu1 %v1073_v10  ;;  %2724 = vmatpush.msrb.mxu3 %v1137_v55  ;;  %v1207_v9 = vld [vmem:[%s3566_s14 + $0x1e38] sm:$0xff]  ;;  %v1205_v32 = vld [vmem:[%s3566_s14 + $0x1e28] sm:$0xff] }
 0x272   : > { %2685 = vmatmul.f32.vlgmr.msrb.gmra.mxu1 %v4110_v53  ;;  %2725 = vmatmul.f32.vlgmr.msrb.gmra.mxu3 %v3139_v35  ;;  %v1257_v53 = vld [vmem:[%s3566_s14 + $0x1fc8] sm:$0xff]  ;;  %v1271_v29 = vld [vmem:[%s3566_s14 + $0x2038] sm:$0xff] }
 0x273   : > { %2730 = vmatpush.msra.mxu0 %v1197_v4  ;;  %2749 = vmatpush.msra.mxu1 %v1231_v5  ;;  %v1171_v31 = vld [vmem:[%s3566_s14 + $0x1d18] sm:$0xff]  ;;  %v1269_v16 = vld [vmem:[%s3566_s14 + $0x2028] sm:$0xff] }
 0x274   : > { %2770 = vmatpush.msra.mxu2 %v1261_v18  ;;  %2789 = vmatpush.msra.mxu3 %v1295_v62  ;;  %v1235_v15 = vld [vmem:[%s3566_s14 + $0x1f18] sm:$0xff]  ;;  %v1169_v61 = vld [vmem:[%s3566_s14 + $0x1d08] sm:$0xff] }
 0x275   : > { %2731 = vmatpush.msra.mxu0 %v1195_v2  ;;  %2750 = vmatpush.msra.mxu1 %v1229_v3  ;;  %v1203_v60 = vld [vmem:[%s3566_s14 + $0x1e18] sm:$0xff]  ;;  %v1233_v33 = vld [vmem:[%s3566_s14 + $0x1f08] sm:$0xff] }
 0x276   : > { %2771 = vmatpush.msra.mxu2 %v1259_v25  ;;  %2790 = vmatpush.msra.mxu3 %v1293_v56  ;;  %v1267_v34 = vld [vmem:[%s3566_s14 + $0x2018] sm:$0xff]  ;;  %v1201_v55 = vld [vmem:[%s3566_s14 + $0x1e08] sm:$0xff] }
 0x277   : > { %2732 = vmatpush.msra.mxu0 %v1193_v52  ;;  %2751 = vmatpush.msra.mxu1 %v1227_v1  ;;  %v1327_v10 = vld [vmem:[%s3566_s14 + $0x21f8] sm:$0xff]  ;;  %v1265_v4 = vld [vmem:[%s3566_s14 + $0x2008] sm:$0xff] }
 0x278   : > { %2772 = vmatpush.msra.mxu2 %v1257_v53  ;;  %2791 = vmatpush.msra.mxu3 %v1291_v36  ;;  %v3140_v5 = vld.sshfl [vmem:[#allocation1 + $0x28] sm:$0xff pattern:$0x73625140]  ;;  %v3141_v18 = vld.sshfl [vmem:[#allocation1 + $0x38] sm:$0xff pattern:$0x73625140] }
 0x279   : > { %2733 = vmatpush.msra.mxu0 %v1191_v37  ;;  %2752 = vmatpush.msra.mxu1 %v1225_v59  ;;  %v1325_v62 = vld [vmem:[%s3566_s14 + $0x21e8] sm:$0xff]  ;;  %v1359_v35 = vld [vmem:[%s3566_s14 + $0x22f8] sm:$0xff] }
 0x27a   : > { %2773 = vmatpush.msra.mxu2 %v1255_v38  ;;  %2792 = vmatpush.msra.mxu3 %v1289_v39  ;;  %v3142_v2 = vld.sshfl [vmem:[#allocation1 + $0x30] sm:$0xff pattern:$0x73625140]  ;;  %v3143_v25 = vld.sshfl [vmem:[#allocation1] sm:$0xff pattern:$0x73625140] }
 0x27b   : > { %2734 = vmatpush.msra.mxu0 %v1189_v40  ;;  %2753 = vmatpush.msra.mxu1 %v1223_v11  ;;  %v1323_v3 = vld [vmem:[%s3566_s14 + $0x21d8] sm:$0xff]  ;;  %v1357_v56 = vld [vmem:[%s3566_s14 + $0x22e8] sm:$0xff] }
 0x27c   : > { %2774 = vmatpush.msra.mxu2 %v1253_v44  ;;  %2793 = vmatpush.msra.mxu3 %v1287_v48  ;;  %v1321_v52 = vld [vmem:[%s3566_s14 + $0x21c8] sm:$0xff]  ;;  %v1355_v1 = vld [vmem:[%s3566_s14 + $0x22d8] sm:$0xff] }
 0x27d   : > { %2735 = vmatpush.msra.mxu0 %v1187_v27  ;;  %2754 = vmatpush.msra.mxu1 %v1221_v30  ;;  %v1319_v53 = vld [vmem:[%s3566_s14 + $0x21b8] sm:$0xff]  ;;  %v1353_v36 = vld [vmem:[%s3566_s14 + $0x22c8] sm:$0xff] }
 0x27e   : > { %2775 = vmatpush.msra.mxu2 %v1251_v49  ;;  %2794 = vmatpush.msra.mxu3 %v1285_v51  ;;  %v1317_v37 = vld [vmem:[%s3566_s14 + $0x21a8] sm:$0xff]  ;;  %v1351_v59 = vld [vmem:[%s3566_s14 + $0x22b8] sm:$0xff] }
 0x27f   : > { %2736 = vmatpush.msra.mxu0 %v1185_v54  ;;  %2755 = vmatpush.msra.mxu1 %v1219_v19  ;;  %v1315_v38 = vld [vmem:[%s3566_s14 + $0x2198] sm:$0xff]  ;;  %v1349_v39 = vld [vmem:[%s3566_s14 + $0x22a8] sm:$0xff] }
 0x280   : > { %2776 = vmatpush.msra.mxu2 %v1249_v26  ;;  %2795 = vmatpush.msra.mxu3 %v1283_v41  ;;  %v1313_v40 = vld [vmem:[%s3566_s14 + $0x2188] sm:$0xff]  ;;  %v1347_v11 = vld [vmem:[%s3566_s14 + $0x2298] sm:$0xff] }
 0x281   : > { %2737 = vmatpush.msra.mxu0 %v1183_v23  ;;  %2756 = vmatpush.msra.mxu1 %v1217_v57  ;;  %v1311_v44 = vld [vmem:[%s3566_s14 + $0x2178] sm:$0xff]  ;;  %v1345_v48 = vld [vmem:[%s3566_s14 + $0x2288] sm:$0xff] }
 0x282   : > { %2777 = vmatpush.msra.mxu2 %v1247_v58  ;;  %2796 = vmatpush.msra.mxu3 %v1281_v63  ;;  %v1309_v27 = vld [vmem:[%s3566_s14 + $0x2168] sm:$0xff]  ;;  %v1343_v30 = vld [vmem:[%s3566_s14 + $0x2278] sm:$0xff] }
 0x283   : > { %2738 = vmatpush.msra.mxu0 %v1181_v0  ;;  %2757 = vmatpush.msra.mxu1 %v1215_v6  ;;  %v1307_v49 = vld [vmem:[%s3566_s14 + $0x2158] sm:$0xff]  ;;  %v1341_v51 = vld [vmem:[%s3566_s14 + $0x2268] sm:$0xff] }
 0x284   : > { %2778 = vmatpush.msra.mxu2 %v1245_v7  ;;  %2797 = vmatpush.msra.mxu3 %v1279_v8  ;;  %v1305_v54 = vld [vmem:[%s3566_s14 + $0x2148] sm:$0xff]  ;;  %v1339_v19 = vld [vmem:[%s3566_s14 + $0x2258] sm:$0xff] }
 0x285   : > { %2739 = vmatpush.msra.mxu0 %v1179_v12  ;;  %2758 = vmatpush.msra.mxu1 %v1213_v13  ;;  %v1303_v26 = vld [vmem:[%s3566_s14 + $0x2138] sm:$0xff]  ;;  %v1337_v41 = vld [vmem:[%s3566_s14 + $0x2248] sm:$0xff]  ;;  %v2186_v13 = vpop.f32.mrf.mxu0 }
 0x286   : > { %2779 = vmatpush.msra.mxu2 %v1243_v46  ;;  %2798 = vmatpush.msra.mxu3 %v1277_v14  ;;  %v1301_v23 = vld [vmem:[%s3566_s14 + $0x2128] sm:$0xff]  ;;  %v1335_v57 = vld [vmem:[%s3566_s14 + $0x2238] sm:$0xff]  ;;  %v2166_v46 = vpop.f32.mrf.mxu3 }
 0x287   : > { %2740 = vmatpush.msra.mxu0 %v1177_v17  ;;  %2759 = vmatpush.msra.mxu1 %v1211_v20  ;;  %v1299_v58 = vld [vmem:[%s3566_s14 + $0x2118] sm:$0xff]  ;;  %v1333_v63 = vld [vmem:[%s3566_s14 + $0x2228] sm:$0xff]  ;;  %v2187_v14 = vadd.f32 %v2186_v13, %v2166_v46  ;;  %v2206_v17 = vpop.f32.mrf.mxu1 }
 0x288   : > { %2780 = vmatpush.msra.mxu2 %v1241_v47  ;;  %2799 = vmatpush.msra.mxu3 %v1275_v50  ;;  %v1297_v0 = vld [vmem:[%s3566_s14 + $0x2108] sm:$0xff]  ;;  %v1331_v6 = vld [vmem:[%s3566_s14 + $0x2218] sm:$0xff]  ;;  %v2226_v47 = vpop.f32.mrf.mxu2 }
 0x289   : > { %2741 = vmatpush.msra.mxu0 %v1175_v21  ;;  %2760 = vmatpush.msra.mxu1 %v1209_v22  ;;  %v1329_v7 = vld [vmem:[%s3566_s14 + $0x2208] sm:$0xff]  ;;  %v3144_v8 = vld.sshfl [vmem:[#allocation1 + $0x8] sm:$0xff pattern:$0x73625140]  ;;  %v2207_v20 = vadd.f32 %v2206_v17, %v2187_v14 }
 0x28a   : > { %2781 = vmatpush.msra.mxu2 %v1239_v43  ;;  %2800 = vmatpush.msra.mxu3 %v1273_v24  ;;  %v3145_v12 = vld.sshfl [vmem:[#allocation1 + $0x10] sm:$0xff pattern:$0x73625140] }
 0x28b   : > { %2742 = vmatpush.msra.mxu0 %v1173_v42  ;;  %2761 = vmatpush.msra.mxu1 %v1207_v9  ;;  %v2227_v50 = vadd.f32 %v2226_v47, %v2207_v20 }
 0x28c   : > { %2782 = vmatpush.msra.mxu2 %v1237_v28  ;;  %2801 = vmatpush.msra.mxu3 %v1271_v29 }
 0x28d   : > { %2743 = vmatpush.msra.mxu0 %v1171_v31  ;;  %2762 = vmatpush.msra.mxu1 %v1205_v32  ;;  %v2266_v43 = vpop.f32.mrf.mxu0 }
 0x28e   : > { %2783 = vmatpush.msra.mxu2 %v1235_v15  ;;  %2802 = vmatpush.msra.mxu3 %v1269_v16  ;;  %v2246_v21 = vpop.f32.mrf.mxu3 }
 0x28f   : > { %2744 = vmatpush.msra.mxu0 %v1169_v61  ;;  %2763 = vmatpush.msra.mxu1 %v1203_v60  ;;  %v2247_v22 = vadd.f32 %v2246_v21, %v2227_v50  ;;  %v2286_v42 = vpop.f32.mrf.mxu1  ;;  %v230_v21 = vld [vmem:[%s3575_s26] sm:$0xf] }
 0x290   : > { %2784 = vmatpush.msra.mxu2 %v1233_v33  ;;  %2803 = vmatpush.msra.mxu3 %v1267_v34  ;;  %v2306_v28 = vpop.f32.mrf.mxu2 }
 0x291   : > { %2745 = vmatmul.f32.vlgmr.msra.gmra.mxu0 %v3140_v5  ;;  %2785 = vmatmul.f32.vlgmr.msra.gmra.mxu2 %v3141_v18  ;;  %v2267_v24 = vadd.f32 %v2266_v43, %v2247_v22 }
 0x292   : > { %2809 = vmatpush.msrb.mxu0 %v1327_v10  ;;  %2764 = vmatpush.msra.mxu1 %v1201_v55 }
 0x293   : > { %2804 = vmatpush.msra.mxu3 %v1265_v4  ;;  %2765 = vmatmul.f32.vlgmr.msra.gmra.mxu1 %v3142_v2  ;;  %v2287_v9 = vadd.f32 %v2286_v42, %v2267_v24 }
 0x294   : > { %2805 = vmatmul.f32.vlgmr.msra.gmra.mxu3 %v3143_v25  ;;  %2810 = vmatpush.msrb.mxu0 %v1325_v62 }
 0x295   : > { %2829 = vmatpush.msrb.mxu1 %v1359_v35  ;;  %v2307_v29 = vadd.f32 %v2306_v28, %v2287_v9  ;;  %v2346_v32 = vpop.f32.mrf.mxu0 }
 0x296   : > { %2811 = vmatpush.msrb.mxu0 %v1323_v3  ;;  %v2326_v31 = vpop.f32.mrf.mxu3 }
 0x297   : > { %2830 = vmatpush.msrb.mxu1 %v1357_v56  ;;  %v2327_v15 = vadd.f32 %v2326_v31, %v2307_v29  ;;  %v2366_v61 = vpop.f32.mrf.mxu1 }
 0x298   : > { %2812 = vmatpush.msrb.mxu0 %v1321_v52  ;;  %v2386_v60 = vpop.f32.mrf.mxu2 }
 0x299   : > { %2831 = vmatpush.msrb.mxu1 %v1355_v1  ;;  %v2347_v16 = vadd.f32 %v2346_v32, %v2327_v15 }
 0x29a   : > { %2813 = vmatpush.msrb.mxu0 %v1319_v53 }
 0x29b   : > { %2832 = vmatpush.msrb.mxu1 %v1353_v36  ;;  %v2367_v33 = vadd.f32 %v2366_v61, %v2347_v16 }
 0x29c   : > { %2814 = vmatpush.msrb.mxu0 %v1317_v37 }
 0x29d   : > { %2833 = vmatpush.msrb.mxu1 %v1351_v59  ;;  %v2387_v34 = vadd.f32 %v2386_v60, %v2367_v33  ;;  %v2426_v55 = vpop.f32.mrf.mxu0 }
 0x29e   : > { %2815 = vmatpush.msrb.mxu0 %v1315_v38  ;;  %v2406_v10 = vpop.f32.mrf.mxu3 }
 0x29f   : > { %2834 = vmatpush.msrb.mxu1 %v1349_v39  ;;  %v2407_v4 = vadd.f32 %v2406_v10, %v2387_v34  ;;  %v2446_v18 = vpop.f32.mrf.mxu1 }
 0x2a0   : > { %2816 = vmatpush.msrb.mxu0 %v1313_v40  ;;  %v2466_v62 = vpop.f32.mrf.mxu2 }
 0x2a1   : > { %2835 = vmatpush.msrb.mxu1 %v1347_v11  ;;  %v2427_v5 = vadd.f32 %v2426_v55, %v2407_v4 }
 0x2a2   : > { %2817 = vmatpush.msrb.mxu0 %v1311_v44 }
 0x2a3   : > { %2836 = vmatpush.msrb.mxu1 %v1345_v48  ;;  %v2447_v35 = vadd.f32 %v2446_v18, %v2427_v5 }
 0x2a4   : > { %2818 = vmatpush.msrb.mxu0 %v1309_v27 }
 0x2a5   : > { %2837 = vmatpush.msrb.mxu1 %v1343_v30  ;;  %v2467_v2 = vadd.f32 %v2466_v62, %v2447_v35 }
 0x2a6   : > { %2819 = vmatpush.msrb.mxu0 %v1307_v49  ;;  %v2486_v3 = vpop.f32.mrf.mxu3 }
 0x2a7   : > { %2838 = vmatpush.msrb.mxu1 %v1341_v51  ;;  %v2487_v56 = vadd.f32 %v2486_v3, %v2467_v2 }
 0x2a8   : > { %2820 = vmatpush.msrb.mxu0 %v1305_v54  ;;  %v2506_v25 = vpop.f32.mrf.mxu0 }
 0x2a9   : > { %2839 = vmatpush.msrb.mxu1 %v1339_v19  ;;  %v2507_v52 = vadd.f32 %v2506_v25, %v2487_v56 }
 0x2aa   : > { %2821 = vmatpush.msrb.mxu0 %v1303_v26 }
 0x2ab   : > { %2840 = vmatpush.msrb.mxu1 %v1337_v41  ;;  %v2526_v1 = vpop.f32.mrf.mxu1 }
 0x2ac   : > { %2822 = vmatpush.msrb.mxu0 %v1301_v23  ;;  %v2527_v36 = vadd.f32 %v2526_v1, %v2507_v52 }
 0x2ad   : > { %2841 = vmatpush.msrb.mxu1 %v1335_v57 }
 0x2ae   : > { %2823 = vmatpush.msrb.mxu0 %v1299_v58  ;;  %v2546_v53 = vpop.f32.mrf.mxu2 }
 0x2af   : > { %2842 = vmatpush.msrb.mxu1 %v1333_v63  ;;  %v2547_v37 = vadd.f32 %v2546_v53, %v2527_v36 }
 0x2b0   : > { %2824 = vmatpush.msrb.mxu0 %v1297_v0 }
 0x2b1   : > { %2843 = vmatpush.msrb.mxu1 %v1331_v6  ;;  %2825 = vmatmul.f32.vlgmr.msrb.gmra.mxu0 %v3144_v8  ;;  %v2566_v59 = vpop.f32.mrf.mxu3 }
 0x2b2   : > { %v2567_v39 = vadd.f32 %v2566_v59, %v2547_v37 }
 0x2b3   : > { %2844 = vmatpush.msrb.mxu1 %v1329_v7 }
 0x2b4   : > { %2845 = vmatmul.f32.vlgmr.msrb.gmra.mxu1 %v3145_v12 }
 0x2ca   : > { %v2586_v38 = vpop.f32.mrf.mxu0 }
 0x2cb   : > { %v2587_v40 = vadd.f32 %v2586_v38, %v2567_v39 }
 0x2cd   : > { %v2606_v11 = vpop.f32.mrf.mxu1 }
 0x2ce   : > { %v2607_v48 = vadd.f32 %v2606_v11, %v2587_v40 }
 0x2d0   : > { %v2626_v44 = vpop.f32.mrf.mxu2 }
 0x2d1   : > { %v2627_v27 = vadd.f32 %v2626_v44, %v2607_v48 }
 0x2d3   : > { %v2646_v30 = vpop.f32.mrf.mxu3 }
 0x2d4   : > { %v2647_v51 = vadd.f32 %v2646_v30, %v2627_v27 }
 0x2ec   : > { %v2666_v49 = vpop.f32.mrf.mxu0 }
 0x2ed   : > { %v2667_v54 = vadd.f32 %v2666_v49, %v2647_v51 }
 0x2ef   : > { %v2686_v19 = vpop.f32.mrf.mxu1 }
 0x2f0   : > { %v2687_v41 = vadd.f32 %v2686_v19, %v2667_v54 }
 0x2f2   : > { %v2706_v26 = vpop.f32.mrf.mxu2 }
 0x2f3   : > { %v2707_v23 = vadd.f32 %v2706_v26, %v2687_v41 }
 0x2f5   : > { %v2726_v57 = vpop.f32.mrf.mxu3 }
 0x2f6   : > { %v2727_v63 = vadd.f32 %v2726_v57, %v2707_v23 }
 0x30e   : > { %v2746_v58 = vpop.f32.mrf.mxu0 }
 0x30f   : > { %v2747_v0 = vadd.f32 %v2746_v58, %v2727_v63 }
 0x310   : > { %v2766_v6 = vpop.f32.mrf.mxu1 }
 0x311   : > { %v2767_v8 = vadd.f32 %v2766_v6, %v2747_v0 }
 0x314   : > { %v2786_v7 = vpop.f32.mrf.mxu2 }
 0x315   : > { %v2787_v12 = vadd.f32 %v2786_v7, %v2767_v8 }
 0x317   : > { %v2806_v13 = vpop.f32.mrf.mxu3 }
 0x318   : > { %v2807_v46 = vadd.f32 %v2806_v13, %v2787_v12 }
 0x32e   : > { %v2826_v14 = vpop.f32.mrf.mxu0 }
 0x32f   : > { %v2827_v17 = vadd.f32 %v2826_v14, %v2807_v46 }
 0x331   : > { %v2846_v20 = vpop.f32.mrf.mxu1 }
 0x332   : > { %v2847_v47 = vadd.f32 %v2846_v20, %v2827_v17 }
 0x334   : > { %v2851_v50 = vrot.slane %v2847_v47, 6 }
 0x336   : > { %v2853_v22 = vsel %vm2852_vm0, %v4536_v45, %v2851_v50 }
 0x337   : > { %v2855_v43 = vadd.f32 %v2853_v22, %v230_v21 }
 0x339   : > { %2856 = vst [vmem:[%s3575_s26] sm:$0xf] %v2855_v43 }
 0x33a   : > { %3233 = shalt.err (!%p3230_p10)
}
 0x33b   : > { %3008 = dma.vmem_to_hbm [thread:$0]  (%p3516_p9), %s2872_s6, 64, %s2874_s11, %s2858_s19  }
 0x33c PF: > { %p3022_p11 = scmp.ge.s32.totalorder %s3356_s22, 2  ;;  %s2885_s29 = sand.u32 1, %s3304_s9  }
 0x33d   : > { %s2886_s17 = scalar_lea.sflag [#allocation4], %s2885_s29 }
 0x33e   : > { %p3018_p3 = pnand %p3022_p11, %p3521_p7 }
 0x340   : > { %p3019_p12 = pneg %p3018_p3 }
 0x342   : > { %3299 = dma.done.wait (%p3019_p12), %s2886_s17, 64  }
 0x343   : > { %3301 = vsyncadd (%p3019_p12), %s2886_s17, 4294967232  ;;  %s21_s22 = sadd.s32 1, %s3356_s22   ;;  %s4948_s5 = sld [smem:[#allocation11_spill]] }
 0x344   : > { %p4868_p1 = scmp.ge.s32.totalorder %s21_s22, 12   ;;  %s4949_s11 = sld [smem:[#allocation19_spill]] }
 0x345   : > { %s4950_s14 = sld [smem:[#allocation12_spill]]  ;;  %s4957_s9 = smov %s3308_s10 }
 0x346   : > { %s4951_s20 = sld [smem:[#allocation18_spill]]  ;;  %s4959_s12 = smov %s3320_s13 }
 0x347   : > { %s4952_s30 = sld [smem:[#allocation13_spill]]  ;;  %s4962_s15 = smov %s3332_s16 }
 0x348   : > { %s4953_s17 = sld [smem:[#allocation17_spill]]  ;;  %s4964_s19 = smov %s3352_s21 }
 0x349   : > { %s4954_s18 = sld [smem:[#allocation14_spill]]  ;;  %s4958_s10 = smov %s4948_s5 }
 0x34a   : > { %s4955_s26 = sld [smem:[#allocation15_spill]] }
 0x34b   : > { %s4956_s4 = sld [smem:[#allocation16_spill]]  ;;  %s4960_s13 = smov %s4950_s14 }
 0x34c   : > { %s4961_s14 = smov %s4951_s20 }
 0x34d   : > { %s4963_s16 = smov %s4952_s30  ;;  %20 = sbr.rel (!%p4868_p1) target bundleno = 14 (0xe), region = 91 }
 0x350   : > { %s4965_s20 = smov %s4955_s26 }
 0x351   : > { %s4966_s21 = smov %s4956_s4 }
 0x352   :  { %2892 = vsyncpa [#allocation3], 1 }
 0x353   :  { %2894 = vsyncpa [#allocation3 + $0x1], 1 }
 0x354   :  { %2895 = vsyncpa [#allocation6], 1 }
 0x355   :  { %2897 = vsyncpa [#allocation6 + $0x1], 1 }
 0x356   :  { %2898 = vsyncpa [#allocation4], 1 }
 0x357   :  { %2900 = vsyncpa [#allocation4 + $0x1], 1 }

</bundles_post_ra>
